<compile_context>
chip_gen: v6e
topology: v6e:2x2x1
jax: 0.10.0
libtpu: 0.0.40
codegen_flags: <defaults>
</compile_context>

<pallas_src>
import functools

import jax
import jax.numpy as jnp
from jax import lax
from jax.experimental import pallas as pl
from jax.experimental.pallas import tpu as pltpu

LANES = 128


def _round_up(n, m):
    return ((n + m - 1) // m) * m


def _conv_packing(C):
    """Tap-packing geometry for the 3x3 im2col matmuls."""
    Cp = _round_up(C, LANES)
    if C < LANES and LANES % C == 0:
        tpg = LANES // C                       # taps packed per 128-lane group
    else:
        tpg = 1
    n_groups = -(-9 // tpg)                    # ceil(9 / tpg)
    return Cp, tpg, n_groups, n_groups * Cp    # (Cp, taps/group, groups, K)


# ----------------------------------------------------------------------------
# Kernel factory: everything fused in VMEM, B images per grid step.
# ----------------------------------------------------------------------------
def _make_irblock_kernel(B, H, W, C, Cp, tpg, n_groups):
    HW = H * W
    M = B * HW

    def kernel(x_ref, w1_ref, w2_ref,
               bn0s_ref, bn0b_ref, bn1s_ref, bn1b_ref, a1_ref,
               bn2s_ref, bn2b_ref,
               sew1_ref, seb1_ref, sea_ref, sew2_ref, seb2_ref,
               aout_ref, o_ref):
        # Per-pixel row/col indices, hoisted once and reused by both convs.
        yi = lax.broadcasted_iota(jnp.int32, (H, W, Cp), 0).reshape(HW, Cp)
        xi = lax.broadcasted_iota(jnp.int32, (H, W, Cp), 1).reshape(HW, Cp)
        if B > 1:
            yi = jnp.tile(yi, (B, 1))
            xi = jnp.tile(xi, (B, 1))

        def conv3x3(h, w_ref):
            """SAME 3x3 conv as n_groups accumulated MXU matmuls (K=Cp each).

            Tap (dy,dx) of the zero-padded conv input is a cyclic sublane roll
            of the flattened activation by (dy-1)*W+(dx-1), zero-masked where
            the window reads the padding (this also kills cross-row / cross-
            image wraps of the cyclic roll).  tpg taps are lane-packed into
            each 128-lane group to avoid multiplying zero-padded channels.
            """
            acc = jnp.zeros((M, Cp), jnp.float32)
            for g in range(n_groups):
                grp = None
                for j in range(tpg):
                    t = g * tpg + j
                    if t >= 9:
                        continue
                    dy, dx = divmod(t, 3)
                    off = (dy - 1) * W + (dx - 1)
                    tap = pltpu.roll(h, shift=(-off) % M, axis=0) if off else h
                    valid = None
                    if dy == 0:
                        valid = yi >= 1
                    elif dy == 2:
                        valid = yi <= H - 2
                    if dx == 0:
                        vx = xi >= 1
                        valid = vx if valid is None else (valid & vx)
                    elif dx == 2:
                        vx = xi <= W - 2
                        valid = vx if valid is None else (valid & vx)
                    if valid is not None:
                        tap = jnp.where(valid, tap, jnp.zeros_like(tap))
                    if j > 0:                          # lane-pack into the group
                        tap = pltpu.roll(tap, shift=j * C, axis=1)
                    grp = tap if grp is None else grp + tap
                acc = acc + jnp.dot(grp.astype(jnp.bfloat16),
                                    w_ref[g * Cp:(g + 1) * Cp, :],
                                    preferred_element_type=jnp.float32)
            return acc                                  # (M, Cp) f32

        x = x_ref[...].reshape(M, Cp).astype(jnp.float32)

        # bn0 (affine=False, eval mode, folded) -> conv1 -> bn1 -> PReLU
        h = x * bn0s_ref[...] + bn0b_ref[...]
        h = conv3x3(h, w1_ref)
        h = h * bn1s_ref[...] + bn1b_ref[...]
        h = jnp.where(h >= 0, h, h * a1_ref[...])

        # conv2 -> bn2
        h = conv3x3(h, w2_ref)
        h = h * bn2s_ref[...] + bn2b_ref[...]

        # SE + residual + output PReLU, one image at a time (2-D ops only).
        # The residual is re-read from the VMEM-resident input block here
        # instead of holding a kernel-long copy live.
        for b in range(B):
            hb = h[b * HW:(b + 1) * HW, :]
            y = jnp.mean(hb, axis=0, keepdims=True)                      # (1, Cp)
            z = jnp.dot(y, sew1_ref[...],
                        preferred_element_type=jnp.float32) + seb1_ref[...]
            z = jnp.where(z >= 0, z, z * sea_ref[...])
            z = jnp.dot(z, sew2_ref[...],
                        preferred_element_type=jnp.float32) + seb2_ref[...]
            g = jax.nn.sigmoid(z)                                        # (1, Cp)
            out = hb * g + x_ref[b].reshape(HW, Cp).astype(jnp.float32)
            out = jnp.where(out >= 0, out, out * aout_ref[...])
            o_ref[b] = out.reshape(H, W, Cp).astype(o_ref.dtype)         # lane-dense

    return kernel


# ----------------------------------------------------------------------------
# Wrapper: NCHW in/out, channels lane-padded, grid over batch ("parallel").
# ----------------------------------------------------------------------------
@functools.partial(jax.jit, static_argnames=("images_per_step",))
def irblock_forward(x_nchw, params, images_per_step=1):
    N, C, H, W = x_nchw.shape
    B = images_per_step
    assert N % B == 0, "batch must be divisible by images_per_step"
    Cp, tpg, n_groups, K = _conv_packing(C)
    dc = Cp - C
    HW = H * W

    # NCHW -> NHWC + zero-pad channels to the lane width.
    # TODO(synk): in an NHWC/Cp-resident model these transposes/pads (and the
    #             slice + transpose at the exit) disappear - they are layout
    #             plumbing for the PyTorch NCHW interface and at small sizes
    #             cost as much HBM traffic as the fused kernel itself.
    x = jnp.transpose(x_nchw, (0, 2, 3, 1)).astype(jnp.float32)
    x = jnp.pad(x, ((0, 0), (0, 0), (0, 0), (0, dc)))

    def pad_vec(v):                        # (1, C) -> (1, Cp)
        return jnp.pad(v, ((0, 0), (0, dc))).astype(jnp.float32)

    def pack_weight(w):                    # (3,3,Cin,Cout) HWIO -> (K, Cp) bf16
        wr = w.reshape(9, C, -1)
        cout = wr.shape[-1]
        wm = jnp.zeros((K, Cp), jnp.float32)
        for t in range(9):
            g, j = divmod(t, tpg)
            wm = wm.at[g * Cp + j * C:g * Cp + (j + 1) * C, :cout].set(wr[t])
        return wm.astype(jnp.bfloat16)

    pvals = [
        pack_weight(params['w1']),
        pack_weight(params['w2']),
        pad_vec(params['bn0_s']), pad_vec(params['bn0_b']),
        pad_vec(params['bn1_s']), pad_vec(params['bn1_b']),
        pad_vec(params['a1']),
        pad_vec(params['bn2_s']), pad_vec(params['bn2_b']),
        jnp.pad(params['se_w1'], ((0, dc), (0, 0))).astype(jnp.float32),
        params['se_b1'].astype(jnp.float32),
        params['se_a'].astype(jnp.float32),
        jnp.pad(params['se_w2'], ((0, 0), (0, dc))).astype(jnp.float32),
        pad_vec(params['se_b2']),
        pad_vec(params['aout']),
    ]

    kernel = _make_irblock_kernel(B, H, W, C, Cp, tpg, n_groups)

    in_specs = [pl.BlockSpec((B, H, W, Cp), lambda n: (n, 0, 0, 0))]
    # Constant-index parameter inputs.
    # TODO(synk): on v7x mark these pipeline_mode=pl.Buffered(1) to skip the
    #             pointless double-buffering once Cp / spatial tiles grow.
    in_specs += [pl.BlockSpec(p.shape, lambda n: (0, 0)) for p in pvals]

    # Scoped-VMEM budget from the actual footprint (v5e default is only 16 MiB).
    block_bytes = B * H * W * Cp * 4
    param_bytes = sum(int(p.size) * p.dtype.itemsize for p in pvals)
    est = 4 * block_bytes                   # double-buffered input + output blocks
    est += 2 * param_bytes
    est += 10 * B * HW * Cp * 4             # conv/SE intermediates headroom
    vmem_limit = int(min(96 * 2**20, max(32 * 2**20, est)))

    out = pl.pallas_call(
        kernel,
        out_shape=jax.ShapeDtypeStruct((N, H, W, Cp), jnp.float32),
        grid=(N // B,),
        in_specs=in_specs,
        out_specs=pl.BlockSpec((B, H, W, Cp), lambda n: (n, 0, 0, 0)),
        compiler_params=pltpu.CompilerParams(
            dimension_semantics=("parallel",),      # megacore / v7x 2-TC sharding
            vmem_limit_bytes=vmem_limit),
    )(x, *pvals)
    # TODO(synk): for large H*W add a row-strip grid axis with a 1-row halo so
    #             the per-step footprint stays inside v7x's 64 MiB VMEM.

    out = out[..., :C]                                  # drop lane padding
    return jnp.transpose(out, (0, 3, 1, 2)).astype(x_nchw.dtype)   # -> NCHW


# ----------------------------------------------------------------------------
# Deterministic parameter construction (IRBlock(inplanes, planes, se_ratio)).
# BatchNorm is eval-mode: folded to scale = gamma/sqrt(var+eps),
#                                  bias  = beta - mean*scale.
# TODO(synk): training-mode BatchNorm (batch statistics over N,H,W) is not
#             implemented; eval-mode running-stat semantics are used instead.
# ----------------------------------------------------------------------------
def make_params(key, inplanes, planes, se_ratio, eps=1e-5):
    ks = list(jax.random.split(key, 16))
    k = iter(ks)

    def fold_bn(mean, var, gamma, beta):
        s = gamma / jnp.sqrt(var + eps)
        return (s[None, :].astype(jnp.float32),
                (beta - mean * s)[None, :].astype(jnp.float32))

    # bn0 (affine=False)
    m0 = jax.random.normal(next(k), (inplanes,)) * 0.1
    v0 = jax.random.uniform(next(k), (inplanes,), minval=0.5, maxval=1.5)
    bn0_s, bn0_b = fold_bn(m0, v0, jnp.ones((inplanes,)), jnp.zeros((inplanes,)))

    # conv1 (HWIO), bn1, prelu
    w1 = jax.random.normal(next(k), (3, 3, inplanes, inplanes), jnp.float32) * 0.05
    m1 = jax.random.normal(next(k), (inplanes,)) * 0.1
    v1 = jax.random.uniform(next(k), (inplanes,), minval=0.5, maxval=1.5)
    g1 = 1.0 + jax.random.normal(next(k), (inplanes,)) * 0.1
    b1 = jax.random.normal(next(k), (inplanes,)) * 0.1
    bn1_s, bn1_b = fold_bn(m1, v1, g1, b1)
    a1 = jnp.full((1, inplanes), 0.25, jnp.float32)            # PReLU default init

    # conv2 (HWIO), bn2
    w2 = jax.random.normal(next(k), (3, 3, inplanes, planes), jnp.float32) * 0.05
    m2 = jax.random.normal(next(k), (planes,)) * 0.1
    v2 = jax.random.uniform(next(k), (planes,), minval=0.5, maxval=1.5)
    g2 = 1.0 + jax.random.normal(next(k), (planes,)) * 0.1
    b2 = jax.random.normal(next(k), (planes,)) * 0.1
    bn2_s, bn2_b = fold_bn(m2, v2, g2, b2)

    # SE block (Linear weights stored already-transposed: (in, out))
    hidden = planes // se_ratio
    se_w1 = jax.random.normal(next(k), (planes, hidden), jnp.float32) * 0.2
    se_b1 = jax.random.normal(next(k), (1, hidden), jnp.float32) * 0.1
    se_a = jnp.full((1, hidden), 0.25, jnp.float32)
    se_w2 = jax.random.normal(next(k), (hidden, planes), jnp.float32) * 0.2
    se_b2 = jax.random.normal(next(k), (1, planes), jnp.float32) * 0.1

    aout = jnp.full((1, planes), 0.25, jnp.float32)            # prelu_out

    return dict(w1=w1, w2=w2, bn0_s=bn0_s, bn0_b=bn0_b,
                bn1_s=bn1_s, bn1_b=bn1_b, a1=a1,
                bn2_s=bn2_s, bn2_b=bn2_b,
                se_w1=se_w1, se_b1=se_b1, se_a=se_a,
                se_w2=se_w2, se_b2=se_b2, aout=aout)


# ----------------------------------------------------------------------------
# Pure-JAX f32 reference (for correctness check).
# ----------------------------------------------------------------------------
def irblock_ref(x_nchw, p):
    x = jnp.transpose(x_nchw, (0, 2, 3, 1))                    # NHWC
    c = lambda a: a.reshape(1, 1, 1, -1)
    conv = lambda h, w: lax.conv_general_dilated(
        h, w, (1, 1), 'SAME',
        dimension_numbers=('NHWC', 'HWIO', 'NHWC'),
        precision=lax.Precision.HIGHEST)

    h = x * c(p['bn0_s']) + c(p['bn0_b'])
    h = conv(h, p['w1'])
    h = h * c(p['bn1_s']) + c(p['bn1_b'])
    h = jnp.where(h >= 0, h, h * c(p['a1']))
    h = conv(h, p['w2'])
    h = h * c(p['bn2_s']) + c(p['bn2_b'])
    y = jnp.mean(h, axis=(1, 2))                               # (N, Cout)
    z = y @ p['se_w1'] + p['se_b1']
    z = jnp.where(z >= 0, z, z * p['se_a'])
    z = z @ p['se_w2'] + p['se_b2']
    g = jax.nn.sigmoid(z)[:, None, None, :]
    h = h * g
    out = h + x
    out = jnp.where(out >= 0, out, out * c(p['aout']))
    return jnp.transpose(out, (0, 3, 1, 2))                    # NCHW


if __name__ == "__main__":
    N, C, H, W = 2, 64, 16, 16      # inplanes = planes = 64, stride = 1
    SE_RATIO = 4                    # SE hidden = 16

    key = jax.random.PRNGKey(0)
    kx, kp = jax.random.split(key)
    x = jax.random.normal(kx, (N, C, H, W), jnp.float32)       # NCHW like PyTorch
    params = make_params(kp, C, C, SE_RATIO)

    ref = irblock_ref(x, params)

    # 1 image / grid step (keeps both v7x TensorCores busy when N >= 2).
    out = jax.block_until_ready(irblock_forward(x, params, images_per_step=1))
    assert out.shape == (N, C, H, W)
    err1 = float(jnp.max(jnp.abs(out - ref)))
    # bf16 MXU matmuls with f32 accumulation vs an f32 HIGHEST reference.
    assert jnp.allclose(out, ref, atol=5e-2, rtol=5e-2), err1

    # Batched grid step (fatter MXU M dim; preferred on single-TC v5e/v6e).
    out2 = jax.block_until_ready(irblock_forward(x, params, images_per_step=2))
    err2 = float(jnp.max(jnp.abs(out2 - ref)))
    assert jnp.allclose(out2, ref, atol=5e-2, rtol=5e-2), err2

    print("KERNEL_OK")
</pallas_src>

<mosaic_0001>
module attributes {stable_mosaic.version = 11 : i64} {
  func.func @kernel(%arg0: i32, %arg1: memref<1x16x16x128xf32, #tpu.memory_space<vmem>>, %arg2: memref<640x128xbf16, #tpu.memory_space<vmem>>, %arg3: memref<640x128xbf16, #tpu.memory_space<vmem>>, %arg4: memref<1x128xf32, #tpu.memory_space<vmem>>, %arg5: memref<1x128xf32, #tpu.memory_space<vmem>>, %arg6: memref<1x128xf32, #tpu.memory_space<vmem>>, %arg7: memref<1x128xf32, #tpu.memory_space<vmem>>, %arg8: memref<1x128xf32, #tpu.memory_space<vmem>>, %arg9: memref<1x128xf32, #tpu.memory_space<vmem>>, %arg10: memref<1x128xf32, #tpu.memory_space<vmem>>, %arg11: memref<128x16xf32, #tpu.memory_space<vmem>>, %arg12: memref<1x16xf32, #tpu.memory_space<vmem>>, %arg13: memref<1x16xf32, #tpu.memory_space<vmem>>, %arg14: memref<16x128xf32, #tpu.memory_space<vmem>>, %arg15: memref<1x128xf32, #tpu.memory_space<vmem>>, %arg16: memref<1x128xf32, #tpu.memory_space<vmem>>, %arg17: memref<1x16x16x128xf32, #tpu.memory_space<vmem>>) attributes {dimension_semantics = [#tpu.dimension_semantics<parallel>], iteration_bounds = array<i64: 2>, scalar_prefetch = 0 : i64, scratch_operands = 0 : i64, tpu.core_type = #tpu.core_type<tc>, window_params = [{transform_indices = @transform_0, window_bounds = array<i64: 1, 16, 16, 128>}, {pipeline_mode = #tpu.pipeline_mode<synchronous>, transform_indices = @transform_1, window_bounds = array<i64: 640, 128>}, {pipeline_mode = #tpu.pipeline_mode<synchronous>, transform_indices = @transform_2, window_bounds = array<i64: 640, 128>}, {pipeline_mode = #tpu.pipeline_mode<synchronous>, transform_indices = @transform_3, window_bounds = array<i64: 1, 128>}, {pipeline_mode = #tpu.pipeline_mode<synchronous>, transform_indices = @transform_4, window_bounds = array<i64: 1, 128>}, {pipeline_mode = #tpu.pipeline_mode<synchronous>, transform_indices = @transform_5, window_bounds = array<i64: 1, 128>}, {pipeline_mode = #tpu.pipeline_mode<synchronous>, transform_indices = @transform_6, window_bounds = array<i64: 1, 128>}, {pipeline_mode = #tpu.pipeline_mode<synchronous>, transform_indices = @transform_7, window_bounds = array<i64: 1, 128>}, {pipeline_mode = #tpu.pipeline_mode<synchronous>, transform_indices = @transform_8, window_bounds = array<i64: 1, 128>}, {pipeline_mode = #tpu.pipeline_mode<synchronous>, transform_indices = @transform_9, window_bounds = array<i64: 1, 128>}, {pipeline_mode = #tpu.pipeline_mode<synchronous>, transform_indices = @transform_10, window_bounds = array<i64: 128, 16>}, {pipeline_mode = #tpu.pipeline_mode<synchronous>, transform_indices = @transform_11, window_bounds = array<i64: 1, 16>}, {pipeline_mode = #tpu.pipeline_mode<synchronous>, transform_indices = @transform_12, window_bounds = array<i64: 1, 16>}, {pipeline_mode = #tpu.pipeline_mode<synchronous>, transform_indices = @transform_13, window_bounds = array<i64: 16, 128>}, {pipeline_mode = #tpu.pipeline_mode<synchronous>, transform_indices = @transform_14, window_bounds = array<i64: 1, 128>}, {pipeline_mode = #tpu.pipeline_mode<synchronous>, transform_indices = @transform_15, window_bounds = array<i64: 1, 128>}, {transform_indices = @transform_16, window_bounds = array<i64: 1, 16, 16, 128>}]} {
    %0 = tpu.iota {dimensions = array<i32: 0>} : vector<16x16x128xi32>
    %1 = vector.shape_cast %0 : vector<16x16x128xi32> to vector<256x128xi32>
    %2 = tpu.iota {dimensions = array<i32: 1>} : vector<16x16x128xi32>
    %3 = vector.shape_cast %2 : vector<16x16x128xi32> to vector<256x128xi32>
    %c0 = arith.constant 0 : index
    %c0_0 = arith.constant 0 : index
    %c0_1 = arith.constant 0 : index
    %c0_2 = arith.constant 0 : index
    %4 = vector.load %arg1[%c0, %c0_0, %c0_1, %c0_2] : memref<1x16x16x128xf32, #tpu.memory_space<vmem>>, vector<1x16x16x128xf32>
    %5 = vector.shape_cast %4 : vector<1x16x16x128xf32> to vector<256x128xf32>
    %c0_3 = arith.constant 0 : index
    %c0_4 = arith.constant 0 : index
    %6 = vector.load %arg4[%c0_3, %c0_4] : memref<1x128xf32, #tpu.memory_space<vmem>>, vector<1x128xf32>
    %7 = vector.broadcast %6 : vector<1x128xf32> to vector<256x128xf32>
    %8 = arith.mulf %5, %7 : vector<256x128xf32>
    %c0_5 = arith.constant 0 : index
    %c0_6 = arith.constant 0 : index
    %9 = vector.load %arg5[%c0_5, %c0_6] : memref<1x128xf32, #tpu.memory_space<vmem>>, vector<1x128xf32>
    %10 = vector.broadcast %9 : vector<1x128xf32> to vector<256x128xf32>
    %11 = arith.addf %8, %10 : vector<256x128xf32>
    %cst = arith.constant 0.000000e+00 : f32
    %12 = vector.broadcast %cst : f32 to vector<256x128xf32>
    %c17_i32 = arith.constant 17 : i32
    %13 = tpu.dynamic_rotate %11 by %c17_i32 dim 0 : vector<256x128xf32>, i32 -> vector<256x128xf32>
    %c1_i32 = arith.constant 1 : i32
    %14 = vector.broadcast %c1_i32 : i32 to vector<256x128xi32>
    %15 = arith.cmpi sge, %1, %14 : vector<256x128xi32>
    %c1_i32_7 = arith.constant 1 : i32
    %16 = vector.broadcast %c1_i32_7 : i32 to vector<256x128xi32>
    %17 = arith.cmpi sge, %3, %16 : vector<256x128xi32>
    %18 = arith.andi %15, %17 : vector<256x128xi1>
    %cst_8 = arith.constant 0.000000e+00 : f32
    %19 = vector.broadcast %cst_8 : f32 to vector<256x128xf32>
    %20 = arith.select %18, %13, %19 : vector<256x128xi1>, vector<256x128xf32>
    %c16_i32 = arith.constant 16 : i32
    %21 = tpu.dynamic_rotate %11 by %c16_i32 dim 0 : vector<256x128xf32>, i32 -> vector<256x128xf32>
    %c1_i32_9 = arith.constant 1 : i32
    %22 = vector.broadcast %c1_i32_9 : i32 to vector<256x128xi32>
    %23 = arith.cmpi sge, %1, %22 : vector<256x128xi32>
    %cst_10 = arith.constant 0.000000e+00 : f32
    %24 = vector.broadcast %cst_10 : f32 to vector<256x128xf32>
    %25 = arith.select %23, %21, %24 : vector<256x128xi1>, vector<256x128xf32>
    %c64_i32 = arith.constant 64 : i32
    %26 = tpu.dynamic_rotate %25 by %c64_i32 dim 1 : vector<256x128xf32>, i32 -> vector<256x128xf32>
    %27 = arith.addf %20, %26 : vector<256x128xf32>
    %28 = arith.truncf %27 : vector<256x128xf32> to vector<256x128xbf16>
    %c0_11 = arith.constant 0 : index
    %c0_12 = arith.constant 0 : index
    %29 = vector.load %arg2[%c0_11, %c0_12] : memref<640x128xbf16, #tpu.memory_space<vmem>>, vector<128x128xbf16>
    %cst_13 = arith.constant dense<0.000000e+00> : vector<256x128xf32>
    %30 = tpu.matmul %28, %29, %cst_13 {dimension_numbers = #tpu.dot_dimension_numbers<[1], [0], [0], [1], [0, 0, 1, 1], [], []>} : vector<256x128xbf16>, vector<128x128xbf16>, vector<256x128xf32> -> vector<256x128xf32>
    %31 = arith.addf %12, %30 : vector<256x128xf32>
    %c15_i32 = arith.constant 15 : i32
    %32 = tpu.dynamic_rotate %11 by %c15_i32 dim 0 : vector<256x128xf32>, i32 -> vector<256x128xf32>
    %c1_i32_14 = arith.constant 1 : i32
    %33 = vector.broadcast %c1_i32_14 : i32 to vector<256x128xi32>
    %34 = arith.cmpi sge, %1, %33 : vector<256x128xi32>
    %c14_i32 = arith.constant 14 : i32
    %35 = vector.broadcast %c14_i32 : i32 to vector<256x128xi32>
    %36 = arith.cmpi sle, %3, %35 : vector<256x128xi32>
    %37 = arith.andi %34, %36 : vector<256x128xi1>
    %cst_15 = arith.constant 0.000000e+00 : f32
    %38 = vector.broadcast %cst_15 : f32 to vector<256x128xf32>
    %39 = arith.select %37, %32, %38 : vector<256x128xi1>, vector<256x128xf32>
    %c1_i32_16 = arith.constant 1 : i32
    %40 = tpu.dynamic_rotate %11 by %c1_i32_16 dim 0 : vector<256x128xf32>, i32 -> vector<256x128xf32>
    %c1_i32_17 = arith.constant 1 : i32
    %41 = vector.broadcast %c1_i32_17 : i32 to vector<256x128xi32>
    %42 = arith.cmpi sge, %3, %41 : vector<256x128xi32>
    %cst_18 = arith.constant 0.000000e+00 : f32
    %43 = vector.broadcast %cst_18 : f32 to vector<256x128xf32>
    %44 = arith.select %42, %40, %43 : vector<256x128xi1>, vector<256x128xf32>
    %c64_i32_19 = arith.constant 64 : i32
    %45 = tpu.dynamic_rotate %44 by %c64_i32_19 dim 1 : vector<256x128xf32>, i32 -> vector<256x128xf32>
    %46 = arith.addf %39, %45 : vector<256x128xf32>
    %47 = arith.truncf %46 : vector<256x128xf32> to vector<256x128xbf16>
    %c128 = arith.constant 128 : index
    %c0_20 = arith.constant 0 : index
    %48 = vector.load %arg2[%c128, %c0_20] : memref<640x128xbf16, #tpu.memory_space<vmem>>, vector<128x128xbf16>
    %cst_21 = arith.constant dense<0.000000e+00> : vector<256x128xf32>
    %49 = tpu.matmul %47, %48, %cst_21 {dimension_numbers = #tpu.dot_dimension_numbers<[1], [0], [0], [1], [0, 0, 1, 1], [], []>} : vector<256x128xbf16>, vector<128x128xbf16>, vector<256x128xf32> -> vector<256x128xf32>
    %50 = arith.addf %31, %49 : vector<256x128xf32>
    %c255_i32 = arith.constant 255 : i32
    %51 = tpu.dynamic_rotate %11 by %c255_i32 dim 0 : vector<256x128xf32>, i32 -> vector<256x128xf32>
    %c14_i32_22 = arith.constant 14 : i32
    %52 = vector.broadcast %c14_i32_22 : i32 to vector<256x128xi32>
    %53 = arith.cmpi sle, %3, %52 : vector<256x128xi32>
    %cst_23 = arith.constant 0.000000e+00 : f32
    %54 = vector.broadcast %cst_23 : f32 to vector<256x128xf32>
    %55 = arith.select %53, %51, %54 : vector<256x128xi1>, vector<256x128xf32>
    %c64_i32_24 = arith.constant 64 : i32
    %56 = tpu.dynamic_rotate %55 by %c64_i32_24 dim 1 : vector<256x128xf32>, i32 -> vector<256x128xf32>
    %57 = arith.addf %11, %56 : vector<256x128xf32>
    %58 = arith.truncf %57 : vector<256x128xf32> to vector<256x128xbf16>
    %c256 = arith.constant 256 : index
    %c0_25 = arith.constant 0 : index
    %59 = vector.load %arg2[%c256, %c0_25] : memref<640x128xbf16, #tpu.memory_space<vmem>>, vector<128x128xbf16>
    %cst_26 = arith.constant dense<0.000000e+00> : vector<256x128xf32>
    %60 = tpu.matmul %58, %59, %cst_26 {dimension_numbers = #tpu.dot_dimension_numbers<[1], [0], [0], [1], [0, 0, 1, 1], [], []>} : vector<256x128xbf16>, vector<128x128xbf16>, vector<256x128xf32> -> vector<256x128xf32>
    %61 = arith.addf %50, %60 : vector<256x128xf32>
    %c241_i32 = arith.constant 241 : i32
    %62 = tpu.dynamic_rotate %11 by %c241_i32 dim 0 : vector<256x128xf32>, i32 -> vector<256x128xf32>
    %c14_i32_27 = arith.constant 14 : i32
    %63 = vector.broadcast %c14_i32_27 : i32 to vector<256x128xi32>
    %64 = arith.cmpi sle, %1, %63 : vector<256x128xi32>
    %c1_i32_28 = arith.constant 1 : i32
    %65 = vector.broadcast %c1_i32_28 : i32 to vector<256x128xi32>
    %66 = arith.cmpi sge, %3, %65 : vector<256x128xi32>
    %67 = arith.andi %64, %66 : vector<256x128xi1>
    %cst_29 = arith.constant 0.000000e+00 : f32
    %68 = vector.broadcast %cst_29 : f32 to vector<256x128xf32>
    %69 = arith.select %67, %62, %68 : vector<256x128xi1>, vector<256x128xf32>
    %c240_i32 = arith.constant 240 : i32
    %70 = tpu.dynamic_rotate %11 by %c240_i32 dim 0 : vector<256x128xf32>, i32 -> vector<256x128xf32>
    %c14_i32_30 = arith.constant 14 : i32
    %71 = vector.broadcast %c14_i32_30 : i32 to vector<256x128xi32>
    %72 = arith.cmpi sle, %1, %71 : vector<256x128xi32>
    %cst_31 = arith.constant 0.000000e+00 : f32
    %73 = vector.broadcast %cst_31 : f32 to vector<256x128xf32>
    %74 = arith.select %72, %70, %73 : vector<256x128xi1>, vector<256x128xf32>
    %c64_i32_32 = arith.constant 64 : i32
    %75 = tpu.dynamic_rotate %74 by %c64_i32_32 dim 1 : vector<256x128xf32>, i32 -> vector<256x128xf32>
    %76 = arith.addf %69, %75 : vector<256x128xf32>
    %77 = arith.truncf %76 : vector<256x128xf32> to vector<256x128xbf16>
    %c384 = arith.constant 384 : index
    %c0_33 = arith.constant 0 : index
    %78 = vector.load %arg2[%c384, %c0_33] : memref<640x128xbf16, #tpu.memory_space<vmem>>, vector<128x128xbf16>
    %cst_34 = arith.constant dense<0.000000e+00> : vector<256x128xf32>
    %79 = tpu.matmul %77, %78, %cst_34 {dimension_numbers = #tpu.dot_dimension_numbers<[1], [0], [0], [1], [0, 0, 1, 1], [], []>} : vector<256x128xbf16>, vector<128x128xbf16>, vector<256x128xf32> -> vector<256x128xf32>
    %80 = arith.addf %61, %79 : vector<256x128xf32>
    %c239_i32 = arith.constant 239 : i32
    %81 = tpu.dynamic_rotate %11 by %c239_i32 dim 0 : vector<256x128xf32>, i32 -> vector<256x128xf32>
    %c14_i32_35 = arith.constant 14 : i32
    %82 = vector.broadcast %c14_i32_35 : i32 to vector<256x128xi32>
    %83 = arith.cmpi sle, %1, %82 : vector<256x128xi32>
    %c14_i32_36 = arith.constant 14 : i32
    %84 = vector.broadcast %c14_i32_36 : i32 to vector<256x128xi32>
    %85 = arith.cmpi sle, %3, %84 : vector<256x128xi32>
    %86 = arith.andi %83, %85 : vector<256x128xi1>
    %cst_37 = arith.constant 0.000000e+00 : f32
    %87 = vector.broadcast %cst_37 : f32 to vector<256x128xf32>
    %88 = arith.select %86, %81, %87 : vector<256x128xi1>, vector<256x128xf32>
    %89 = arith.truncf %88 : vector<256x128xf32> to vector<256x128xbf16>
    %c512 = arith.constant 512 : index
    %c0_38 = arith.constant 0 : index
    %90 = vector.load %arg2[%c512, %c0_38] : memref<640x128xbf16, #tpu.memory_space<vmem>>, vector<128x128xbf16>
    %cst_39 = arith.constant dense<0.000000e+00> : vector<256x128xf32>
    %91 = tpu.matmul %89, %90, %cst_39 {dimension_numbers = #tpu.dot_dimension_numbers<[1], [0], [0], [1], [0, 0, 1, 1], [], []>} : vector<256x128xbf16>, vector<128x128xbf16>, vector<256x128xf32> -> vector<256x128xf32>
    %92 = arith.addf %80, %91 : vector<256x128xf32>
    %c0_40 = arith.constant 0 : index
    %c0_41 = arith.constant 0 : index
    %93 = vector.load %arg6[%c0_40, %c0_41] : memref<1x128xf32, #tpu.memory_space<vmem>>, vector<1x128xf32>
    %94 = vector.broadcast %93 : vector<1x128xf32> to vector<256x128xf32>
    %95 = arith.mulf %92, %94 : vector<256x128xf32>
    %c0_42 = arith.constant 0 : index
    %c0_43 = arith.constant 0 : index
    %96 = vector.load %arg7[%c0_42, %c0_43] : memref<1x128xf32, #tpu.memory_space<vmem>>, vector<1x128xf32>
    %97 = vector.broadcast %96 : vector<1x128xf32> to vector<256x128xf32>
    %98 = arith.addf %95, %97 : vector<256x128xf32>
    %cst_44 = arith.constant 0.000000e+00 : f32
    %99 = vector.broadcast %cst_44 : f32 to vector<256x128xf32>
    %100 = arith.cmpf oge, %98, %99 : vector<256x128xf32>
    %c0_45 = arith.constant 0 : index
    %c0_46 = arith.constant 0 : index
    %101 = vector.load %arg8[%c0_45, %c0_46] : memref<1x128xf32, #tpu.memory_space<vmem>>, vector<1x128xf32>
    %102 = vector.broadcast %101 : vector<1x128xf32> to vector<256x128xf32>
    %103 = arith.mulf %98, %102 : vector<256x128xf32>
    %104 = arith.select %100, %98, %103 : vector<256x128xi1>, vector<256x128xf32>
    %cst_47 = arith.constant 0.000000e+00 : f32
    %105 = vector.broadcast %cst_47 : f32 to vector<256x128xf32>
    %c17_i32_48 = arith.constant 17 : i32
    %106 = tpu.dynamic_rotate %104 by %c17_i32_48 dim 0 : vector<256x128xf32>, i32 -> vector<256x128xf32>
    %c1_i32_49 = arith.constant 1 : i32
    %107 = vector.broadcast %c1_i32_49 : i32 to vector<256x128xi32>
    %108 = arith.cmpi sge, %1, %107 : vector<256x128xi32>
    %c1_i32_50 = arith.constant 1 : i32
    %109 = vector.broadcast %c1_i32_50 : i32 to vector<256x128xi32>
    %110 = arith.cmpi sge, %3, %109 : vector<256x128xi32>
    %111 = arith.andi %108, %110 : vector<256x128xi1>
    %cst_51 = arith.constant 0.000000e+00 : f32
    %112 = vector.broadcast %cst_51 : f32 to vector<256x128xf32>
    %113 = arith.select %111, %106, %112 : vector<256x128xi1>, vector<256x128xf32>
    %c16_i32_52 = arith.constant 16 : i32
    %114 = tpu.dynamic_rotate %104 by %c16_i32_52 dim 0 : vector<256x128xf32>, i32 -> vector<256x128xf32>
    %c1_i32_53 = arith.constant 1 : i32
    %115 = vector.broadcast %c1_i32_53 : i32 to vector<256x128xi32>
    %116 = arith.cmpi sge, %1, %115 : vector<256x128xi32>
    %cst_54 = arith.constant 0.000000e+00 : f32
    %117 = vector.broadcast %cst_54 : f32 to vector<256x128xf32>
    %118 = arith.select %116, %114, %117 : vector<256x128xi1>, vector<256x128xf32>
    %c64_i32_55 = arith.constant 64 : i32
    %119 = tpu.dynamic_rotate %118 by %c64_i32_55 dim 1 : vector<256x128xf32>, i32 -> vector<256x128xf32>
    %120 = arith.addf %113, %119 : vector<256x128xf32>
    %121 = arith.truncf %120 : vector<256x128xf32> to vector<256x128xbf16>
    %c0_56 = arith.constant 0 : index
    %c0_57 = arith.constant 0 : index
    %122 = vector.load %arg3[%c0_56, %c0_57] : memref<640x128xbf16, #tpu.memory_space<vmem>>, vector<128x128xbf16>
    %cst_58 = arith.constant dense<0.000000e+00> : vector<256x128xf32>
    %123 = tpu.matmul %121, %122, %cst_58 {dimension_numbers = #tpu.dot_dimension_numbers<[1], [0], [0], [1], [0, 0, 1, 1], [], []>} : vector<256x128xbf16>, vector<128x128xbf16>, vector<256x128xf32> -> vector<256x128xf32>
    %124 = arith.addf %105, %123 : vector<256x128xf32>
    %c15_i32_59 = arith.constant 15 : i32
    %125 = tpu.dynamic_rotate %104 by %c15_i32_59 dim 0 : vector<256x128xf32>, i32 -> vector<256x128xf32>
    %c1_i32_60 = arith.constant 1 : i32
    %126 = vector.broadcast %c1_i32_60 : i32 to vector<256x128xi32>
    %127 = arith.cmpi sge, %1, %126 : vector<256x128xi32>
    %c14_i32_61 = arith.constant 14 : i32
    %128 = vector.broadcast %c14_i32_61 : i32 to vector<256x128xi32>
    %129 = arith.cmpi sle, %3, %128 : vector<256x128xi32>
    %130 = arith.andi %127, %129 : vector<256x128xi1>
    %cst_62 = arith.constant 0.000000e+00 : f32
    %131 = vector.broadcast %cst_62 : f32 to vector<256x128xf32>
    %132 = arith.select %130, %125, %131 : vector<256x128xi1>, vector<256x128xf32>
    %c1_i32_63 = arith.constant 1 : i32
    %133 = tpu.dynamic_rotate %104 by %c1_i32_63 dim 0 : vector<256x128xf32>, i32 -> vector<256x128xf32>
    %c1_i32_64 = arith.constant 1 : i32
    %134 = vector.broadcast %c1_i32_64 : i32 to vector<256x128xi32>
    %135 = arith.cmpi sge, %3, %134 : vector<256x128xi32>
    %cst_65 = arith.constant 0.000000e+00 : f32
    %136 = vector.broadcast %cst_65 : f32 to vector<256x128xf32>
    %137 = arith.select %135, %133, %136 : vector<256x128xi1>, vector<256x128xf32>
    %c64_i32_66 = arith.constant 64 : i32
    %138 = tpu.dynamic_rotate %137 by %c64_i32_66 dim 1 : vector<256x128xf32>, i32 -> vector<256x128xf32>
    %139 = arith.addf %132, %138 : vector<256x128xf32>
    %140 = arith.truncf %139 : vector<256x128xf32> to vector<256x128xbf16>
    %c128_67 = arith.constant 128 : index
    %c0_68 = arith.constant 0 : index
    %141 = vector.load %arg3[%c128_67, %c0_68] : memref<640x128xbf16, #tpu.memory_space<vmem>>, vector<128x128xbf16>
    %cst_69 = arith.constant dense<0.000000e+00> : vector<256x128xf32>
    %142 = tpu.matmul %140, %141, %cst_69 {dimension_numbers = #tpu.dot_dimension_numbers<[1], [0], [0], [1], [0, 0, 1, 1], [], []>} : vector<256x128xbf16>, vector<128x128xbf16>, vector<256x128xf32> -> vector<256x128xf32>
    %143 = arith.addf %124, %142 : vector<256x128xf32>
    %c255_i32_70 = arith.constant 255 : i32
    %144 = tpu.dynamic_rotate %104 by %c255_i32_70 dim 0 : vector<256x128xf32>, i32 -> vector<256x128xf32>
    %c14_i32_71 = arith.constant 14 : i32
    %145 = vector.broadcast %c14_i32_71 : i32 to vector<256x128xi32>
    %146 = arith.cmpi sle, %3, %145 : vector<256x128xi32>
    %cst_72 = arith.constant 0.000000e+00 : f32
    %147 = vector.broadcast %cst_72 : f32 to vector<256x128xf32>
    %148 = arith.select %146, %144, %147 : vector<256x128xi1>, vector<256x128xf32>
    %c64_i32_73 = arith.constant 64 : i32
    %149 = tpu.dynamic_rotate %148 by %c64_i32_73 dim 1 : vector<256x128xf32>, i32 -> vector<256x128xf32>
    %150 = arith.addf %104, %149 : vector<256x128xf32>
    %151 = arith.truncf %150 : vector<256x128xf32> to vector<256x128xbf16>
    %c256_74 = arith.constant 256 : index
    %c0_75 = arith.constant 0 : index
    %152 = vector.load %arg3[%c256_74, %c0_75] : memref<640x128xbf16, #tpu.memory_space<vmem>>, vector<128x128xbf16>
    %cst_76 = arith.constant dense<0.000000e+00> : vector<256x128xf32>
    %153 = tpu.matmul %151, %152, %cst_76 {dimension_numbers = #tpu.dot_dimension_numbers<[1], [0], [0], [1], [0, 0, 1, 1], [], []>} : vector<256x128xbf16>, vector<128x128xbf16>, vector<256x128xf32> -> vector<256x128xf32>
    %154 = arith.addf %143, %153 : vector<256x128xf32>
    %c241_i32_77 = arith.constant 241 : i32
    %155 = tpu.dynamic_rotate %104 by %c241_i32_77 dim 0 : vector<256x128xf32>, i32 -> vector<256x128xf32>
    %c14_i32_78 = arith.constant 14 : i32
    %156 = vector.broadcast %c14_i32_78 : i32 to vector<256x128xi32>
    %157 = arith.cmpi sle, %1, %156 : vector<256x128xi32>
    %c1_i32_79 = arith.constant 1 : i32
    %158 = vector.broadcast %c1_i32_79 : i32 to vector<256x128xi32>
    %159 = arith.cmpi sge, %3, %158 : vector<256x128xi32>
    %160 = arith.andi %157, %159 : vector<256x128xi1>
    %cst_80 = arith.constant 0.000000e+00 : f32
    %161 = vector.broadcast %cst_80 : f32 to vector<256x128xf32>
    %162 = arith.select %160, %155, %161 : vector<256x128xi1>, vector<256x128xf32>
    %c240_i32_81 = arith.constant 240 : i32
    %163 = tpu.dynamic_rotate %104 by %c240_i32_81 dim 0 : vector<256x128xf32>, i32 -> vector<256x128xf32>
    %c14_i32_82 = arith.constant 14 : i32
    %164 = vector.broadcast %c14_i32_82 : i32 to vector<256x128xi32>
    %165 = arith.cmpi sle, %1, %164 : vector<256x128xi32>
    %cst_83 = arith.constant 0.000000e+00 : f32
    %166 = vector.broadcast %cst_83 : f32 to vector<256x128xf32>
    %167 = arith.select %165, %163, %166 : vector<256x128xi1>, vector<256x128xf32>
    %c64_i32_84 = arith.constant 64 : i32
    %168 = tpu.dynamic_rotate %167 by %c64_i32_84 dim 1 : vector<256x128xf32>, i32 -> vector<256x128xf32>
    %169 = arith.addf %162, %168 : vector<256x128xf32>
    %170 = arith.truncf %169 : vector<256x128xf32> to vector<256x128xbf16>
    %c384_85 = arith.constant 384 : index
    %c0_86 = arith.constant 0 : index
    %171 = vector.load %arg3[%c384_85, %c0_86] : memref<640x128xbf16, #tpu.memory_space<vmem>>, vector<128x128xbf16>
    %cst_87 = arith.constant dense<0.000000e+00> : vector<256x128xf32>
    %172 = tpu.matmul %170, %171, %cst_87 {dimension_numbers = #tpu.dot_dimension_numbers<[1], [0], [0], [1], [0, 0, 1, 1], [], []>} : vector<256x128xbf16>, vector<128x128xbf16>, vector<256x128xf32> -> vector<256x128xf32>
    %173 = arith.addf %154, %172 : vector<256x128xf32>
    %c239_i32_88 = arith.constant 239 : i32
    %174 = tpu.dynamic_rotate %104 by %c239_i32_88 dim 0 : vector<256x128xf32>, i32 -> vector<256x128xf32>
    %c14_i32_89 = arith.constant 14 : i32
    %175 = vector.broadcast %c14_i32_89 : i32 to vector<256x128xi32>
    %176 = arith.cmpi sle, %1, %175 : vector<256x128xi32>
    %c14_i32_90 = arith.constant 14 : i32
    %177 = vector.broadcast %c14_i32_90 : i32 to vector<256x128xi32>
    %178 = arith.cmpi sle, %3, %177 : vector<256x128xi32>
    %179 = arith.andi %176, %178 : vector<256x128xi1>
    %cst_91 = arith.constant 0.000000e+00 : f32
    %180 = vector.broadcast %cst_91 : f32 to vector<256x128xf32>
    %181 = arith.select %179, %174, %180 : vector<256x128xi1>, vector<256x128xf32>
    %182 = arith.truncf %181 : vector<256x128xf32> to vector<256x128xbf16>
    %c512_92 = arith.constant 512 : index
    %c0_93 = arith.constant 0 : index
    %183 = vector.load %arg3[%c512_92, %c0_93] : memref<640x128xbf16, #tpu.memory_space<vmem>>, vector<128x128xbf16>
    %cst_94 = arith.constant dense<0.000000e+00> : vector<256x128xf32>
    %184 = tpu.matmul %182, %183, %cst_94 {dimension_numbers = #tpu.dot_dimension_numbers<[1], [0], [0], [1], [0, 0, 1, 1], [], []>} : vector<256x128xbf16>, vector<128x128xbf16>, vector<256x128xf32> -> vector<256x128xf32>
    %185 = arith.addf %173, %184 : vector<256x128xf32>
    %c0_95 = arith.constant 0 : index
    %c0_96 = arith.constant 0 : index
    %186 = vector.load %arg9[%c0_95, %c0_96] : memref<1x128xf32, #tpu.memory_space<vmem>>, vector<1x128xf32>
    %187 = vector.broadcast %186 : vector<1x128xf32> to vector<256x128xf32>
    %188 = arith.mulf %185, %187 : vector<256x128xf32>
    %c0_97 = arith.constant 0 : index
    %c0_98 = arith.constant 0 : index
    %189 = vector.load %arg10[%c0_97, %c0_98] : memref<1x128xf32, #tpu.memory_space<vmem>>, vector<1x128xf32>
    %190 = vector.broadcast %189 : vector<1x128xf32> to vector<256x128xf32>
    %191 = arith.addf %188, %190 : vector<256x128xf32>
    %cst_99 = arith.constant dense<0.000000e+00> : vector<128xf32>
    %192 = vector.multi_reduction <add>, %191, %cst_99 [0] : vector<256x128xf32> to vector<128xf32>
    %193 = vector.shape_cast %192 : vector<128xf32> to vector<1x128xf32>
    %cst_100 = arith.constant 2.560000e+02 : f32
    %194 = vector.broadcast %cst_100 : f32 to vector<1x128xf32>
    %195 = arith.divf %193, %194 : vector<1x128xf32>
    %c0_101 = arith.constant 0 : index
    %c0_102 = arith.constant 0 : index
    %196 = vector.load %arg11[%c0_101, %c0_102] : memref<128x16xf32, #tpu.memory_space<vmem>>, vector<128x16xf32>
    %cst_103 = arith.constant dense<0.000000e+00> : vector<1x16xf32>
    %197 = tpu.matmul %195, %196, %cst_103 {dimension_numbers = #tpu.dot_dimension_numbers<[1], [0], [0], [1], [0, 0, 1, 1], [], []>} : vector<1x128xf32>, vector<128x16xf32>, vector<1x16xf32> -> vector<1x16xf32>
    %c0_104 = arith.constant 0 : index
    %c0_105 = arith.constant 0 : index
    %198 = vector.load %arg12[%c0_104, %c0_105] : memref<1x16xf32, #tpu.memory_space<vmem>>, vector<1x16xf32>
    %199 = arith.addf %197, %198 : vector<1x16xf32>
    %cst_106 = arith.constant 0.000000e+00 : f32
    %200 = vector.broadcast %cst_106 : f32 to vector<1x16xf32>
    %201 = arith.cmpf oge, %199, %200 : vector<1x16xf32>
    %c0_107 = arith.constant 0 : index
    %c0_108 = arith.constant 0 : index
    %202 = vector.load %arg13[%c0_107, %c0_108] : memref<1x16xf32, #tpu.memory_space<vmem>>, vector<1x16xf32>
    %203 = arith.mulf %199, %202 : vector<1x16xf32>
    %204 = arith.select %201, %199, %203 : vector<1x16xi1>, vector<1x16xf32>
    %c0_109 = arith.constant 0 : index
    %c0_110 = arith.constant 0 : index
    %205 = vector.load %arg14[%c0_109, %c0_110] : memref<16x128xf32, #tpu.memory_space<vmem>>, vector<16x128xf32>
    %cst_111 = arith.constant dense<0.000000e+00> : vector<1x128xf32>
    %206 = tpu.matmul %204, %205, %cst_111 {dimension_numbers = #tpu.dot_dimension_numbers<[1], [0], [0], [1], [0, 0, 1, 1], [], []>} : vector<1x16xf32>, vector<16x128xf32>, vector<1x128xf32> -> vector<1x128xf32>
    %c0_112 = arith.constant 0 : index
    %c0_113 = arith.constant 0 : index
    %207 = vector.load %arg15[%c0_112, %c0_113] : memref<1x128xf32, #tpu.memory_space<vmem>>, vector<1x128xf32>
    %208 = arith.addf %206, %207 : vector<1x128xf32>
    %209 = arith.negf %208 : vector<1x128xf32>
    %210 = math.exp %209 : vector<1x128xf32>
    %cst_114 = arith.constant 1.000000e+00 : f32
    %211 = vector.broadcast %cst_114 : f32 to vector<1x128xf32>
    %212 = arith.addf %211, %210 : vector<1x128xf32>
    %213 = arith.divf %211, %212 : vector<1x128xf32>
    %214 = vector.broadcast %213 : vector<1x128xf32> to vector<256x128xf32>
    %215 = arith.mulf %191, %214 : vector<256x128xf32>
    %c0_115 = arith.constant 0 : index
    %c0_116 = arith.constant 0 : index
    %c0_117 = arith.constant 0 : index
    %c0_118 = arith.constant 0 : index
    %216 = vector.load %arg1[%c0_115, %c0_116, %c0_117, %c0_118] : memref<1x16x16x128xf32, #tpu.memory_space<vmem>>, vector<1x16x16x128xf32>
    %217 = vector.shape_cast %216 : vector<1x16x16x128xf32> to vector<16x16x128xf32>
    %218 = vector.shape_cast %217 : vector<16x16x128xf32> to vector<256x128xf32>
    %219 = arith.addf %215, %218 : vector<256x128xf32>
    %cst_119 = arith.constant 0.000000e+00 : f32
    %220 = vector.broadcast %cst_119 : f32 to vector<256x128xf32>
    %221 = arith.cmpf oge, %219, %220 : vector<256x128xf32>
    %c0_120 = arith.constant 0 : index
    %c0_121 = arith.constant 0 : index
    %222 = vector.load %arg16[%c0_120, %c0_121] : memref<1x128xf32, #tpu.memory_space<vmem>>, vector<1x128xf32>
    %223 = vector.broadcast %222 : vector<1x128xf32> to vector<256x128xf32>
    %224 = arith.mulf %219, %223 : vector<256x128xf32>
    %225 = arith.select %221, %219, %224 : vector<256x128xi1>, vector<256x128xf32>
    %226 = vector.shape_cast %225 : vector<256x128xf32> to vector<16x16x128xf32>
    %c0_122 = arith.constant 0 : index
    %c0_123 = arith.constant 0 : index
    %c0_124 = arith.constant 0 : index
    %c0_125 = arith.constant 0 : index
    %227 = vector.load %arg17[%c0_122, %c0_123, %c0_124, %c0_125] : memref<1x16x16x128xf32, #tpu.memory_space<vmem>>, vector<1x16x16x128xf32>
    %228 = vector.shape_cast %227 : vector<1x16x16x128xf32> to vector<16x16x128xf32>
    %229 = vector.shape_cast %226 : vector<16x16x128xf32> to vector<1x16x16x128xf32>
    tpu.vector_store %arg17[%c0_122, %c0_123, %c0_124, %c0_125], %229 {strides = array<i32>} : memref<1x16x16x128xf32, #tpu.memory_space<vmem>>, vector<1x16x16x128xf32>,
    return
  }
  func.func @transform_0(%arg0: i32) -> (i32, i32, i32, i32) {
    %c0_i32 = arith.constant 0 : i32
    %c0_i32_0 = arith.constant 0 : i32
    %c0_i32_1 = arith.constant 0 : i32
    %c0_i32_2 = arith.constant 0 : i32
    return %arg0, %c0_i32, %c0_i32_0, %c0_i32_1 : i32, i32, i32, i32
  }
  func.func @transform_1(%arg0: i32) -> (i32, i32) {
    %c0_i32 = arith.constant 0 : i32
    %c0_i32_0 = arith.constant 0 : i32
    %c0_i32_1 = arith.constant 0 : i32
    return %c0_i32, %c0_i32_0 : i32, i32
  }
  func.func @transform_2(%arg0: i32) -> (i32, i32) {
    %c0_i32 = arith.constant 0 : i32
    %c0_i32_0 = arith.constant 0 : i32
    %c0_i32_1 = arith.constant 0 : i32
    return %c0_i32, %c0_i32_0 : i32, i32
  }
  func.func @transform_3(%arg0: i32) -> (i32, i32) {
    %c0_i32 = arith.constant 0 : i32
    %c0_i32_0 = arith.constant 0 : i32
    %c0_i32_1 = arith.constant 0 : i32
    return %c0_i32, %c0_i32_0 : i32, i32
  }
  func.func @transform_4(%arg0: i32) -> (i32, i32) {
    %c0_i32 = arith.constant 0 : i32
    %c0_i32_0 = arith.constant 0 : i32
    %c0_i32_1 = arith.constant 0 : i32
    return %c0_i32, %c0_i32_0 : i32, i32
  }
  func.func @transform_5(%arg0: i32) -> (i32, i32) {
    %c0_i32 = arith.constant 0 : i32
    %c0_i32_0 = arith.constant 0 : i32
    %c0_i32_1 = arith.constant 0 : i32
    return %c0_i32, %c0_i32_0 : i32, i32
  }
  func.func @transform_6(%arg0: i32) -> (i32, i32) {
    %c0_i32 = arith.constant 0 : i32
    %c0_i32_0 = arith.constant 0 : i32
    %c0_i32_1 = arith.constant 0 : i32
    return %c0_i32, %c0_i32_0 : i32, i32
  }
  func.func @transform_7(%arg0: i32) -> (i32, i32) {
    %c0_i32 = arith.constant 0 : i32
    %c0_i32_0 = arith.constant 0 : i32
    %c0_i32_1 = arith.constant 0 : i32
    return %c0_i32, %c0_i32_0 : i32, i32
  }
  func.func @transform_8(%arg0: i32) -> (i32, i32) {
    %c0_i32 = arith.constant 0 : i32
    %c0_i32_0 = arith.constant 0 : i32
    %c0_i32_1 = arith.constant 0 : i32
    return %c0_i32, %c0_i32_0 : i32, i32
  }
  func.func @transform_9(%arg0: i32) -> (i32, i32) {
    %c0_i32 = arith.constant 0 : i32
    %c0_i32_0 = arith.constant 0 : i32
    %c0_i32_1 = arith.constant 0 : i32
    return %c0_i32, %c0_i32_0 : i32, i32
  }
  func.func @transform_10(%arg0: i32) -> (i32, i32) {
    %c0_i32 = arith.constant 0 : i32
    %c0_i32_0 = arith.constant 0 : i32
    %c0_i32_1 = arith.constant 0 : i32
    return %c0_i32, %c0_i32_0 : i32, i32
  }
  func.func @transform_11(%arg0: i32) -> (i32, i32) {
    %c0_i32 = arith.constant 0 : i32
    %c0_i32_0 = arith.constant 0 : i32
    %c0_i32_1 = arith.constant 0 : i32
    return %c0_i32, %c0_i32_0 : i32, i32
  }
  func.func @transform_12(%arg0: i32) -> (i32, i32) {
    %c0_i32 = arith.constant 0 : i32
    %c0_i32_0 = arith.constant 0 : i32
    %c0_i32_1 = arith.constant 0 : i32
    return %c0_i32, %c0_i32_0 : i32, i32
  }
  func.func @transform_13(%arg0: i32) -> (i32, i32) {
    %c0_i32 = arith.constant 0 : i32
    %c0_i32_0 = arith.constant 0 : i32
    %c0_i32_1 = arith.constant 0 : i32
    return %c0_i32, %c0_i32_0 : i32, i32
  }
  func.func @transform_14(%arg0: i32) -> (i32, i32) {
    %c0_i32 = arith.constant 0 : i32
    %c0_i32_0 = arith.constant 0 : i32
    %c0_i32_1 = arith.constant 0 : i32
    return %c0_i32, %c0_i32_0 : i32, i32
  }
  func.func @transform_15(%arg0: i32) -> (i32, i32) {
    %c0_i32 = arith.constant 0 : i32
    %c0_i32_0 = arith.constant 0 : i32
    %c0_i32_1 = arith.constant 0 : i32
    return %c0_i32, %c0_i32_0 : i32, i32
  }
  func.func @transform_16(%arg0: i32) -> (i32, i32, i32, i32) {
    %c0_i32 = arith.constant 0 : i32
    %c0_i32_0 = arith.constant 0 : i32
    %c0_i32_1 = arith.constant 0 : i32
    %c0_i32_2 = arith.constant 0 : i32
    return %arg0, %c0_i32, %c0_i32_0, %c0_i32_1 : i32, i32, i32, i32
  }
}

</mosaic_0001>

<bundles_post_ra>
// kernel: irblock_forward.1
= control target key start
LH: loop header
LB: loop body
LE: loop exit
PB: predicated region body
PF: predicated region fallthrough
CT: control target
= control target key end

     0   :  { %s6117_s21 = smov 0   ;;  %s9678_s0 = inlined_call_operand.vmem [shape: f32[2,16,16,128], index: 0, kind: input, shape index: {}]   ;;  %s9679_s1 = inlined_call_operand.vmem [shape: bf16[640,128], index: 1, kind: input, shape index: {}]   ;;  %s9680_s2 = inlined_call_operand.vmem [shape: bf16[640,128], index: 2, kind: input, shape index: {}]   ;;  %s9681_s3 = inlined_call_operand.vmem [shape: f32[1,128], index: 3, kind: input, shape index: {}]   ;;  %s9682_s4 = inlined_call_operand.vmem [shape: f32[1,128], index: 4, kind: input, shape index: {}]   ;;  %s9683_s5 = inlined_call_operand.vmem [shape: f32[1,128], index: 5, kind: input, shape index: {}]   ;;  %s9684_s6 = inlined_call_operand.vmem [shape: f32[1,128], index: 6, kind: input, shape index: {}]   ;;  %s9685_s7 = inlined_call_operand.vmem [shape: f32[1,128], index: 7, kind: input, shape index: {}]   ;;  %s9686_s8 = inlined_call_operand.vmem [shape: f32[1,128], index: 8, kind: input, shape index: {}]   ;;  %s9687_s9 = inlined_call_operand.vmem [shape: f32[1,128], index: 9, kind: input, shape index: {}]   ;;  %s9688_s10 = inlined_call_operand.vmem [shape: f32[128,16], index: 10, kind: input, shape index: {}]   ;;  %s9689_s11 = inlined_call_operand.vmem [shape: f32[1,16], index: 11, kind: input, shape index: {}]   ;;  %s9690_s12 = inlined_call_operand.vmem [shape: f32[1,16], index: 12, kind: input, shape index: {}]   ;;  %s9691_s13 = inlined_call_operand.vmem [shape: f32[16,128], index: 13, kind: input, shape index: {}]   ;;  %s9692_s14 = inlined_call_operand.vmem [shape: f32[1,128], index: 14, kind: input, shape index: {}]   ;;  %s9693_s15 = inlined_call_operand.vmem [shape: f32[1,128], index: 15, kind: input, shape index: {}]   ;;  %s9694_s16 = inlined_call_operand.vmem [shape: f32[2,16,16,128], index: 16, kind: output, shape index: {}]  }
   0x1   :  { %9851 = sst [smem:[#allocation90_spill]] %s9678_s0 }
   0x2 LB: > { %s4905_s22 = sadd.s32 4294967295, %s6025_s21   ;;  %p4909_p0 = scmp.ge.s32.totalorder %s6025_s21, 1  ;;  %s6025_s21 = sphi %s6117_s21, %s26_s21  }
   0x3   : > { %p462_p1 = scmp.lt.s32.totalorder %s6025_s21, 3 }
   0x5   : > { %p463_p2 = pnand %p4909_p0, %p462_p1 }
   0x7   : > { %466 = sbr.rel (%p463_p2) target bundleno = 1628 (0x65c), region = 84 }
   0xc   : > { %p512_p3 = scmp.lt.s32.totalorder %s4905_s22, 1  ;;  %v523_v0 = vlaneseq  ;;  %v5903_v1 = vld [vmem:[%s9679_s1 + $0x78] sm:$0xff]   ;;  %v5904_v3 = vld [vmem:[%s9679_s1 + $0x70] sm:$0xff]   ;;  %v6139_v4 = vld [vmem:[%s9681_s3] ss:$0 sm:$0xff]  ;;  %s9853_s19 = sld [smem:[#allocation90_spill]] }
   0xd   : > { %5358 = vmatprep.subr.bf16.mxu0 %v5903_v1  ;;  %v6144_v5 = vld [vmem:[%s9682_s4] ss:$0 sm:$0xff]  ;;  %v5905_v6 = vld [vmem:[%s9679_s1 + $0x68] sm:$0xff]   ;;  %s6027_s28 = smov 64   ;;  %v5907_v62 = vld [vmem:[%s9679_s1 + $0x58] sm:$0xff]   ;;  %vm6029_vm4 = vmmov 1  }
   0xe   : > { %s10213_s22 = smov (!%p512_p3, %s4905_s22), 1  ;;  %v6130_v2 = vshrl.u32 %v523_v0, 7  ;;  %5359 = vmatpush3.bf16.msra.mxu0 %v5903_v1  ;;  %v5906_v26 = vld [vmem:[%s9679_s1 + $0x60] sm:$0xff]  }
   0xf   : > { %s5096_s27 = sshll.u32 %s10213_s22, 8  ;;  %5360 = vmatprep.subr.bf16.mxu0 %v5904_v3 }
  0x10   : > { %9852 = vst [vmem:[#allocation2_spill] sm:$0xff] %v6130_v2  ;;  %vm667_vm0 = vcmp.lt.s32.totalorder %v6130_v2, 1  ;;  %vm698_vm1 = vcmp.ge.s32.totalorder %v6130_v2, 1  ;;  %vm886_vm2 = vcmp.lt.s32.totalorder %v6130_v2, 7  ;;  %s9537_s29 = scalar_lea.vmem %s9694_s16, %s5096_s27 }
  0x12   : > { %s6151_s20 = scalar_lea.vmem %s9853_s19, %s5096_s27  ;;  %5361 = vmatpush3.bf16.msra.mxu0 %v5904_v3 }
  0x13   : > { %v528_v7 = vld [vmem:[%s6151_s20 + $0x10] sm:$0xff]  ;;  %v529_v8 = vld [vmem:[%s6151_s20 + $0x18] sm:$0xff]  ;;  %v526_v9 = vld [vmem:[%s6151_s20] sm:$0xff]  ;;  %5362 = vmatprep.subr.bf16.mxu0 %v5905_v6 }
  0x14   : > { %v567_v10 = vmul.f32 %v6139_v4, %v528_v7  ;;  %v568_v11 = vmul.f32 %v6139_v4, %v529_v8  ;;  %v527_v12 = vld [vmem:[%s6151_s20 + $0x8] sm:$0xff]  ;;  %v557_v13 = vld [vmem:[%s6151_s20 + $0xf8] sm:$0xff]  ;;  %v565_v14 = vmul.f32 %v6139_v4, %v526_v9  ;;  %v530_v15 = vld [vmem:[%s6151_s20 + $0x20] sm:$0xff] }
  0x15   : > { %v566_v16 = vmul.f32 %v6139_v4, %v527_v12  ;;  %v596_v17 = vmul.f32 %v6139_v4, %v557_v13  ;;  %v531_v18 = vld [vmem:[%s6151_s20 + $0x28] sm:$0xff]  ;;  %v569_v19 = vmul.f32 %v6139_v4, %v530_v15  ;;  %v532_v20 = vld [vmem:[%s6151_s20 + $0x30] sm:$0xff]  ;;  %v533_v25 = vld [vmem:[%s6151_s20 + $0x38] sm:$0xff] }
  0x16   : > { %v6173_v21 = vadd.f32 %v6144_v5, %v567_v10  ;;  %v6176_v22 = vadd.f32 %v6144_v5, %v568_v11  ;;  %v6179_v23 = vadd.f32 %v6144_v5, %v565_v14  ;;  %v570_v24 = vmul.f32 %v6139_v4, %v531_v18  ;;  %v534_v31 = vld [vmem:[%s6151_s20 + $0x40] sm:$0xff]  ;;  %5363 = vmatpush3.bf16.msra.mxu0 %v5905_v6  ;;  %v535_v48 = vld [vmem:[%s6151_s20 + $0x48] sm:$0xff]  ;;  %v536_v49 = vld [vmem:[%s6151_s20 + $0x50] sm:$0xff] }
  0x17   : > { %v6187_v27 = vadd.f32 %v6144_v5, %v566_v16  ;;  %v6190_v28 = vadd.f32 %v6144_v5, %v596_v17  ;;  %v6193_v29 = vadd.f32 %v6144_v5, %v569_v19  ;;  %v571_v30 = vmul.f32 %v6139_v4, %v532_v20  ;;  %5364 = vmatprep.subr.bf16.mxu0 %v5906_v26  ;;  %v537_v56 = vld [vmem:[%s6151_s20 + $0x58] sm:$0xff]  ;;  %v538_v57 = vld [vmem:[%s6151_s20 + $0x60] sm:$0xff]  ;;  %v539_v61 = vld [vmem:[%s6151_s20 + $0x68] sm:$0xff] }
  0x18   : > { %v638_v32 = vrot.slane %v6173_v21, 7  ;;  %v639_v33 = vrot.slane %v6176_v22, 7  ;;  %v636_v34 = vrot.slane %v6179_v23, 7  ;;  %v6201_v35 = vadd.f32 %v6144_v5, %v570_v24  ;;  %v5908_v6 = vld [vmem:[%s9679_s1 + $0x50] sm:$0xff]   ;;  %v541_v13 = vld [vmem:[%s6151_s20 + $0x78] sm:$0xff]  ;;  %v5909_v14 = vld [vmem:[%s9679_s1 + $0x48] sm:$0xff]  }
  0x19   : > { %v637_v36 = vrot.slane %v6187_v27, 7  ;;  %v9695_v37 = vrot.slane %v6190_v28, 7  ;;  %v640_v38 = vrot.slane %v6193_v29, 7  ;;  %v572_v39 = vmul.f32 %v6139_v4, %v533_v25  ;;  %v540_v11 = vld [vmem:[%s6151_s20 + $0x70] sm:$0xff] }
  0x1a   : > { %v6209_v40 = vsel %vm667_vm0, %v638_v32, %v639_v33  ;;  %v641_v41 = vrot.slane %v6201_v35, 7  ;;  %v6213_v42 = vadd.f32 %v6144_v5, %v571_v30  ;;  %v573_v43 = vmul.f32 %v6139_v4, %v534_v31  ;;  %5365 = vmatpush3.bf16.msra.mxu0 %v5906_v26  ;;  %v542_v26 = vld [vmem:[%s6151_s20 + $0x80] sm:$0xff] }
  0x1b   : > { %960 = vrot.lane.b32.xlu0 %v6209_v40, %s6027_s28  ;;  %v6220_v44 = vsel %vm667_vm0, %v636_v34, %v637_v36  ;;  %v697_v45 = vsel %vm667_vm0, %v9695_v37, %v636_v34  ;;  %v693_v46 = vsel %vm667_vm0, %v639_v33, %v640_v38  ;;  %v6229_v47 = vadd.f32 %v6144_v5, %v572_v39  ;;  %v5910_v31 = vld [vmem:[%s9679_s1 + $0x40] sm:$0xff]  }
  0x1c   : > { %9854 = vst [vmem:[#allocation3_spill] sm:$0xff] %v6213_v42  ;;  %v6235_v50 = vsel %vm698_vm1, %v697_v45, 0.0  ;;  %v6239_v51 = vsel %vm667_vm0, %v640_v38, %v641_v41  ;;  %v642_v52 = vrot.slane %v6213_v42, 7  ;;  %v6246_v55 = vadd.f32 %v6144_v5, %v573_v43  ;;  %5366 = vmatprep.subr.bf16.mxu0 %v5907_v62  ;;  %v543_v38 = vld [vmem:[%s6151_s20 + $0x88] sm:$0xff] }
  0x1d   : > { %9855 = vst [vmem:[#allocation4_spill] sm:$0xff] %v6229_v47  ;;  %v5893_v53 = vpack.i.bf16 %v6220_v44, %v6235_v50  ;;  %v643_v54 = vrot.slane %v6229_v47, 7  ;;  %v6252_v58 = vsel %vm698_vm1, %v693_v46, 0.0  ;;  %v574_v59 = vmul.f32 %v6139_v4, %v535_v48  ;;  %v544_v48 = vld [vmem:[%s6151_s20 + $0x90] sm:$0xff] }
  0x1e   : > { %9856 = vst [vmem:[#allocation5_spill] sm:$0xff] %v6246_v55  ;;  %v575_v60 = vmul.f32 %v6139_v4, %v536_v49  ;;  %v691_v0 = vsel %vm667_vm0, %v641_v41, %v642_v52  ;;  %v695_v1 = vsel %vm667_vm0, %v637_v36, %v638_v32  ;;  %v644_v3 = vrot.slane %v6246_v55, 7  ;;  %5367 = vmatpush3.bf16.msra.mxu0 %v5907_v62  ;;  %v546_v62 = vld [vmem:[%s6151_s20 + $0xa0] sm:$0xff] }
  0x1f   : > { %5894 = vrot.lane.b32.xlu1 %v5893_v53, %s6027_s28  ;;  %964 = vrot.lane.b32.xlu0 %v6239_v51, %s6027_s28  ;;  %v6265_v63 = vsel %vm667_vm0, %v642_v52, %v643_v54  ;;  %v6276_v7 = vadd.f32 %v6144_v5, %v574_v59  ;;  %v576_v9 = vmul.f32 %v6139_v4, %v537_v56  ;;  %v6286_v12 = vsel %vm698_vm1, %v695_v1, 0.0 }
  0x20   : > { %9857 = vst [vmem:[#allocation6_spill] sm:$0xff] %v6265_v63  ;;  %v6279_v8 = vadd.f32 %v6144_v5, %v575_v60  ;;  %v577_v10 = vmul.f32 %v6139_v4, %v538_v57  ;;  %5368 = vmatprep.subr.bf16.mxu0 %v5908_v6  ;;  %v6298_v15 = vsel %vm698_vm1, %v691_v0, 0.0  ;;  %v578_v17 = vmul.f32 %v6139_v4, %v539_v61  ;;  %v545_v61 = vld [vmem:[%s6151_s20 + $0x98] sm:$0xff] }
  0x21   : > { %9858 = vst [vmem:[#allocation7_spill] sm:$0xff] %v6276_v7  ;;  %9860 = vst [vmem:[#allocation9_spill] sm:$0xff] %v6298_v15  ;;  %v579_v18 = vmul.f32 %v6139_v4, %v540_v11  ;;  %v689_v19 = vsel %vm667_vm0, %v643_v54, %v644_v3  ;;  %v645_v20 = vrot.slane %v6276_v7, 7  ;;  %v6307_v24 = vadd.f32 %v6144_v5, %v576_v9  ;;  %v547_v11 = vld [vmem:[%s6151_s20 + $0xa8] sm:$0xff] }
  0x22   : > { %9859 = vst [vmem:[#allocation8_spill] sm:$0xff] %v6279_v8  ;;  %v646_v16 = vrot.slane %v6279_v8, 7  ;;  %v6310_v25 = vadd.f32 %v6144_v5, %v577_v10  ;;  %5369 = vmatpush3.bf16.msra.mxu0 %v5908_v6  ;;  %v580_v30 = vmul.f32 %v6139_v4, %v541_v13  ;;  %v6323_v32 = vsel %vm698_vm1, %v689_v19, 0.0  ;;  %v5911_v19 = vld [vmem:[%s9679_s1 + $0x38] sm:$0xff]  }
  0x23   : > { %962 = vrot.lane.b32.xlu1 %v6252_v58, %s6027_s28  ;;  %968 = vrot.lane.b32.xlu0 %v6265_v63, %s6027_s28  ;;  %9861 = vst [vmem:[#allocation10_spill] sm:$0xff] %v6307_v24  ;;  %9863 = vst [vmem:[#allocation12_spill] sm:$0xff] %v6323_v32  ;;  %v6328_v34 = vadd.f32 %v6144_v5, %v578_v17  ;;  %v6331_v36 = vadd.f32 %v6144_v5, %v579_v18  ;;  %v647_v41 = vrot.slane %v6307_v24, 7  ;;  %v548_v17 = vld [vmem:[%s6151_s20 + $0xb0] sm:$0xff] }
  0x24   : > { %9862 = vst [vmem:[#allocation11_spill] sm:$0xff] %v6310_v25  ;;  %5370 = vmatprep.subr.bf16.mxu0 %v5909_v14  ;;  %v687_v33 = vsel %vm667_vm0, %v645_v20, %v646_v16  ;;  %v6336_v39 = vsel %vm667_vm0, %v644_v3, %v645_v20  ;;  %v648_v43 = vrot.slane %v6310_v25, 7  ;;  %v581_v45 = vmul.f32 %v6139_v4, %v542_v26 }
  0x25   : > { %9864 = vst [vmem:[#allocation13_spill] sm:$0xff] %v6328_v34  ;;  %9865 = vst [vmem:[#allocation14_spill] sm:$0xff] %v6331_v36  ;;  %v6343_v46 = vsel %vm698_vm1, %v687_v33, 0.0  ;;  %v649_v49 = vrot.slane %v6328_v34, 7  ;;  %v650_v52 = vrot.slane %v6331_v36, 7  ;;  %v6353_v53 = vadd.f32 %v6144_v5, %v580_v30  ;;  %v549_v33 = vld [vmem:[%s6151_s20 + $0xb8] sm:$0xff]  ;;  %5406 = vmatprep.subr.bf16.mxu1 %v5911_v19 }
  0x26   : > { %9866 = vst [vmem:[#allocation15_spill] sm:$0xff] %v6336_v39  ;;  %5371 = vmatpush3.bf16.msra.mxu0 %v5909_v14  ;;  %9867 = vst [vmem:[#allocation16_spill] sm:$0xff] %v6343_v46  ;;  %v6357_v54 = vsel %vm667_vm0, %v646_v16, %v647_v41  ;;  %v685_v56 = vsel %vm667_vm0, %v647_v41, %v648_v43  ;;  %v582_v57 = vmul.f32 %v6139_v4, %v543_v38 }
  0x27   : > { %966 = vrot.lane.b32.xlu1 %v6298_v15, %s6027_s28  ;;  %958 = vrot.lane.b32.xlu0 %v6286_v12, %s6027_s28  ;;  %9868 = vst [vmem:[#allocation17_spill] sm:$0xff] %v6357_v54  ;;  %v6363_v59 = vadd.f32 %v6144_v5, %v581_v45  ;;  %v583_v60 = vmul.f32 %v6139_v4, %v544_v48  ;;  %v6374_v0 = vsel %vm698_vm1, %v685_v56, 0.0  ;;  %v651_v1 = vrot.slane %v6353_v53, 7  ;;  %v550_v48 = vld [vmem:[%s6151_s20 + $0xc0] sm:$0xff] }
  0x28   : > { %5372 = vmatprep.subr.bf16.mxu0 %v5910_v31  ;;  %9869 = vst [vmem:[#allocation18_spill] sm:$0xff] %v6374_v0  ;;  %v6379_v3 = vsel %vm667_vm0, %v648_v43, %v649_v49  ;;  %v683_v6 = vsel %vm667_vm0, %v649_v49, %v650_v52  ;;  %v6384_v9 = vadd.f32 %v6144_v5, %v582_v57 }
  0x29   : > { %9870 = vst [vmem:[#allocation19_spill] sm:$0xff] %v6379_v3  ;;  %v584_v10 = vmul.f32 %v6139_v4, %v545_v61  ;;  %v652_v13 = vrot.slane %v6363_v59, 7  ;;  %v6390_v14 = vadd.f32 %v6144_v5, %v583_v60  ;;  %v585_v16 = vmul.f32 %v6139_v4, %v546_v62  ;;  %5407 = vmatpush3.bf16.msra.mxu1 %v5911_v19 }
  0x2a   : > { %5373 = vmatpush3.bf16.msra.mxu0 %v5910_v31  ;;  %v6400_v18 = vsel %vm698_vm1, %v683_v6, 0.0  ;;  %v6407_v20 = vsel %vm667_vm0, %v650_v52, %v651_v1  ;;  %v653_v26 = vrot.slane %v6384_v9, 7  ;;  %v586_v31 = vmul.f32 %v6139_v4, %v547_v11  ;;  %v5912_v52 = vld [vmem:[%s9679_s1 + $0x30] sm:$0xff]   ;;  %v551_v11 = vld [vmem:[%s6151_s20 + $0xc8] sm:$0xff] }
  0x2b   : > { %970 = vrot.lane.b32.xlu1 %v6323_v32, %s6027_s28  ;;  %972 = vrot.lane.b32.xlu0 %v6336_v39, %s6027_s28  ;;  %9871 = vst [vmem:[#allocation20_spill] sm:$0xff] %v6400_v18  ;;  %9872 = vst [vmem:[#allocation21_spill] sm:$0xff] %v6407_v20  ;;  %v6411_v30 = vadd.f32 %v6144_v5, %v584_v10  ;;  %v681_v38 = vsel %vm667_vm0, %v651_v1, %v652_v13  ;;  %v654_v41 = vrot.slane %v6390_v14, 7  ;;  %v6810_v39 = vld [vmem:[%s9679_s1 + $0xf8] sm:$0xff]  }
  0x2c   : > { %v6419_v43 = vadd.f32 %v6144_v5, %v585_v16  ;;  %v587_v45 = vmul.f32 %v6139_v4, %v548_v17  ;;  %v588_v49 = vmul.f32 %v6139_v4, %v549_v33  ;;  %v6433_v56 = vsel %vm698_vm1, %v681_v38, 0.0  ;;  %5408 = vmatprep.subr.bf16.mxu1 %v5912_v52  ;;  %v5913_v17 = vld [vmem:[%s9679_s1 + $0x28] sm:$0xff]   ;;  %v553_v38 = vld [vmem:[%s6151_s20 + $0xd8] sm:$0xff] }
  0x2d   : > { %9873 = vst [vmem:[#allocation22_spill] sm:$0xff] %v6433_v56  ;;  %v6437_v57 = vsel %vm667_vm0, %v652_v13, %v653_v26  ;;  %v655_v60 = vrot.slane %v6411_v30, 7  ;;  %v6441_v61 = vadd.f32 %v6144_v5, %v586_v31  ;;  %v679_v62 = vsel %vm667_vm0, %v653_v26, %v654_v41  ;;  %v552_v13 = vld [vmem:[%s6151_s20 + $0xd0] sm:$0xff]  ;;  %5409 = vmatpush3.bf16.msra.mxu1 %v5912_v52 }
  0x2e   : > { %9874 = vst [vmem:[#allocation23_spill] sm:$0xff] %v6437_v57  ;;  %v656_v1 = vrot.slane %v6419_v43, 7  ;;  %v6447_v6 = vadd.f32 %v6144_v5, %v587_v45  ;;  %v589_v10 = vmul.f32 %v6139_v4, %v550_v48  ;;  %v6457_v16 = vadd.f32 %v6144_v5, %v588_v49  ;;  %5410 = vmatprep.subr.bf16.mxu1 %v5913_v17 }
  0x2f   : > { %974 = vrot.lane.b32.xlu1 %v6343_v46, %s6027_s28  ;;  %976 = vrot.lane.b32.xlu0 %v6357_v54, %s6027_s28  ;;  %v6464_v19 = vsel %vm698_vm1, %v679_v62, 0.0  ;;  %v6468_v26 = vsel %vm667_vm0, %v654_v41, %v655_v60  ;;  %v657_v31 = vrot.slane %v6441_v61, 7  ;;  %v590_v33 = vmul.f32 %v6139_v4, %v551_v11  ;;  %v6483_v41 = vld [vmem:[%s9679_s1 + $0xb8] sm:$0xff]   ;;  %v554_v62 = vld [vmem:[%s6151_s20 + $0xe0] sm:$0xff] }
  0x30   : > { %9875 = vst [vmem:[#allocation24_spill] sm:$0xff] %v6464_v19  ;;  %9876 = vst [vmem:[#allocation25_spill] sm:$0xff] %v6468_v26  ;;  %v677_v45 = vsel %vm667_vm0, %v655_v60, %v656_v1  ;;  %v658_v48 = vrot.slane %v6447_v6, 7  ;;  %v6477_v49 = vadd.f32 %v6144_v5, %v589_v10  ;;  %v591_v52 = vmul.f32 %v6139_v4, %v552_v13  ;;  %v5915_v10 = vld [vmem:[%s9679_s1 + $0x20] sm:$0xff]  }
  0x31   : > { %5411 = vmatpush3.bf16.msra.mxu1 %v5913_v17  ;;  %v659_v60 = vrot.slane %v6457_v16, 7  ;;  %v6496_v11 = vsel %vm698_vm1, %v677_v45, 0.0  ;;  %v6500_v13 = vsel %vm667_vm0, %v656_v1, %v657_v31  ;;  %v6503_v17 = vadd.f32 %v6144_v5, %v590_v33  ;;  %5454 = vmatprep.subr.bf16.mxu0 %v6483_v41  ;;  %v556_v1 = vld [vmem:[%s6151_s20 + $0xf0] sm:$0xff] }
  0x32   : > { %9877 = vst [vmem:[#allocation26_spill] sm:$0xff] %v6496_v11  ;;  %9878 = vst [vmem:[#allocation27_spill] sm:$0xff] %v6500_v13  ;;  %v592_v37 = vmul.f32 %v6139_v4, %v553_v38  ;;  %v6512_v45 = vadd.f32 %v6144_v5, %v591_v52  ;;  %5412 = vmatprep.subr.bf16.mxu1 %v5915_v10  ;;  %v5917_v38 = vld [vmem:[%s9679_s1 + $0x18] sm:$0xff]   ;;  %v872_v63 = vrot.slane %v6384_v9, 1  ;;  %v873_v15 = vrot.slane %v6390_v14, 1 }
  0x33   : > { %978 = vrot.lane.b32.xlu1 %v6374_v0, %s6027_s28  ;;  %980 = vrot.lane.b32.xlu0 %v6379_v3, %s6027_s28  ;;  %v6522_v33 = vsel %vm667_vm0, %v658_v48, %v659_v60 }
  0x34   : > { %9879 = vst [vmem:[#allocation28_spill] sm:$0xff] %v6522_v33 }
  0x35   : > { %5413 = vmatpush3.bf16.msra.mxu1 %v5915_v10  ;;  %v6534_v10 = vadd.f32 %v6144_v5, %v592_v37 }
  0x36   : > { %5414 = vmatprep.subr.bf16.mxu1 %v5917_v38 }
  0x37   : > { %982 = vrot.lane.b32.xlu1 %v6400_v18, %s6027_s28  ;;  %984 = vrot.lane.b32.xlu0 %v6407_v20, %s6027_s28  ;;  %v867_v18 = vrot.slane %v6310_v25, 1 }
  0x39   : > { %5415 = vmatpush3.bf16.msra.mxu1 %v5917_v38 }
  0x3b   : > { %986 = vrot.lane.b32.xlu1 %v6433_v56, %s6027_s28  ;;  %988 = vrot.lane.b32.xlu0 %v6437_v57, %s6027_s28  ;;  %v660_v57 = vrot.slane %v6477_v49, 7  ;;  %v593_v56 = vmul.f32 %v6139_v4, %v554_v62  ;;  %v661_v62 = vrot.slane %v6503_v17, 7 }
  0x3f   : > { %990 = vrot.lane.b32.xlu1 %v6464_v19, %s6027_s28  ;;  %992 = vrot.lane.b32.xlu0 %v6468_v26, %s6027_s28  ;;  %v555_v26 = vld [vmem:[%s6151_s20 + $0xe8] sm:$0xff]  ;;  %v675_v19 = vsel %vm667_vm0, %v657_v31, %v658_v48  ;;  %v673_v48 = vsel %vm667_vm0, %v659_v60, %v660_v57  ;;  %v663_v60 = vrot.slane %v6534_v10, 7 }
  0x40   : > { %v594_v31 = vmul.f32 %v6139_v4, %v555_v26  ;;  %v6530_v52 = vsel %vm698_vm1, %v675_v19, 0.0  ;;  %v662_v26 = vrot.slane %v6512_v45, 7  ;;  %v6555_v19 = vsel %vm698_vm1, %v673_v48, 0.0 }
  0x41   : > { %9880 = vst [vmem:[#allocation29_spill] sm:$0xff] %v6530_v52  ;;  %9881 = vst [vmem:[#allocation30_spill] sm:$0xff] %v6555_v19 }
  0x42   : > { %v6548_v37 = vadd.f32 %v6144_v5, %v594_v31  ;;  %v671_v31 = vsel %vm667_vm0, %v661_v62, %v662_v26 }
  0x43   : > { %994 = vrot.lane.b32.xlu1 %v6496_v11, %s6027_s28  ;;  %996 = vrot.lane.b32.xlu0 %v6500_v13, %s6027_s28  ;;  %v595_v13 = vmul.f32 %v6139_v4, %v556_v1  ;;  %v6541_v11 = vadd.f32 %v6144_v5, %v593_v56  ;;  %v5919_v4 = vld [vmem:[%s9679_s1 + $0x10] sm:$0xff]   ;;  %v6559_v56 = vsel %vm667_vm0, %v660_v57, %v661_v62 }
  0x44   : > { %9882 = vst [vmem:[#allocation31_spill] sm:$0xff] %v6559_v56  ;;  %5416 = vmatprep.subr.bf16.mxu1 %v5919_v4  ;;  %v665_v57 = vrot.slane %v6548_v37, 7  ;;  %v6582_v62 = vsel %vm667_vm0, %v662_v26, %v663_v60 }
  0x45   : > { %v6563_v1 = vadd.f32 %v6144_v5, %v595_v13  ;;  %v664_v38 = vrot.slane %v6541_v11, 7  ;;  %5417 = vmatpush3.bf16.msra.mxu1 %v5919_v4  ;;  %v5921_v5 = vld [vmem:[%s9679_s1 + $0x8] sm:$0xff]   ;;  %v6578_v13 = vsel %vm698_vm1, %v671_v31, 0.0  ;;  %9884 = vst [vmem:[#allocation33_spill] sm:$0xff] %v6582_v62  ;;  %v5923_v31 = vld [vmem:[%s9679_s1] sm:$0xff]  }
  0x46   : > { %9883 = vst [vmem:[#allocation32_spill] sm:$0xff] %v6578_v13  ;;  %5418 = vmatprep.subr.bf16.mxu1 %v5921_v5 }
  0x47   : > { %998 = vrot.lane.b32.xlu1 %v6530_v52, %s6027_s28  ;;  %1000 = vrot.lane.b32.xlu0 %v6522_v33, %s6027_s28  ;;  %v949_v48 = vrot.slane %v6563_v1, 7  ;;  %v669_v4 = vsel %vm667_vm0, %v663_v60, %v664_v38 }
  0x48   : > { %v6596_v26 = vsel %vm698_vm1, %v669_v4, 0.0  ;;  %v9888_v4 = vrot.slane %v6190_v28, 7 }
  0x49   : > { %5419 = vmatpush3.bf16.msra.mxu1 %v5921_v5  ;;  %9885 = vst [vmem:[#allocation34_spill] sm:$0xff] %v6596_v26  ;;  %v951_v60 = vsel %vm667_vm0, %v665_v57, %v949_v48 }
  0x4a   : > { %5420 = vmatprep.subr.bf16.mxu1 %v5923_v31  ;;  %v6610_v5 = vsel %vm698_vm1, %v951_v60, 0.0  ;;  %v856_v60 = vrot.slane %v6187_v27, 1 }
  0x4b   : > { %1002 = vrot.lane.b32.xlu1 %v6555_v19, %s6027_s28  ;;  %1004 = vrot.lane.b32.xlu0 %v6559_v56, %s6027_s28  ;;  %v6600_v56 = vsel %vm667_vm0, %v664_v38, %v665_v57  ;;  %9887 = vst [vmem:[#allocation36_spill] sm:$0xff] %v6610_v5  ;;  %v6616_v38 = vsel %vm667_vm0, %v949_v48, %v9888_v4  ;;  %v6619_v57 = vadd.s32 8, %v6130_v2  ;;  %v858_v48 = vrot.slane %v6176_v22, 1 }
  0x4c   : > { %9886 = vst [vmem:[#allocation35_spill] sm:$0xff] %v6600_v56  ;;  %9889 = vst [vmem:[#allocation37_spill] sm:$0xff] %v6616_v38  ;;  %v859_v4 = vrot.slane %v6193_v29, 1  ;;  %v863_v19 = vrot.slane %v6246_v55, 1 }
  0x4d   : > { %5421 = vmatpush3.bf16.msra.mxu1 %v5923_v31  ;;  %v9709_v31 = vrot.slane %v6179_v23, 1  ;;  %vm918_vm3 = vcmp.le.s32.totalorder %v6619_v57, 14 }
  0x4e   : > { %5502 = vmatprep.subr.bf16.mxu1 %v6810_v39  ;;  %vm7195_vm5 = vmpackc.low %vm918_vm3, %vm6029_vm4 }
  0x4f   : > { %1006 = vrot.lane.b32.xlu1 %v6578_v13, %s6027_s28  ;;  %1008 = vrot.lane.b32.xlu0 %v6582_v62, %s6027_s28 }
  0x53   : > { %1010 = vrot.lane.b32.xlu1 %v6596_v26, %s6027_s28  ;;  %1012 = vrot.lane.b32.xlu0 %v6600_v56, %s6027_s28  ;;  %v857_v56 = vrot.slane %v6173_v21, 1  ;;  %v9710_v26 = vmov 0.0  }
  0x55   : > { %v6654_v13 = vsel %vm886_vm2, %v857_v56, %v858_v48 }
  0x56   : > { %9890 = vst [vmem:[#allocation38_spill] sm:$0xff] %v6654_v13 }
  0x57   : > { %1014 = vrot.lane.b32.xlu1 %v6610_v5, %s6027_s28  ;;  %1016 = vrot.lane.b32.xlu0 %v6616_v38, %s6027_s28  ;;  %v6640_v38 = vsel %vm886_vm2, %v9709_v31, %v856_v60  ;;  %v915_v5 = vsel %vm886_vm2, %v856_v60, %v857_v56  ;;  %v6658_v31 = vsel %vm886_vm2, %v858_v48, %v859_v4  ;;  %v860_v56 = vrot.slane %v6201_v35, 1 }
  0x58   : > { %v6650_v62 = vsel %vm918_vm3, %v915_v5, 0.0  ;;  %9891 = vst [vmem:[#allocation39_spill] sm:$0xff] %v6658_v31  ;;  %v6667_v60 = vsel %vm918_vm3, %v6658_v31, 0.0  ;;  %v861_v5 = vrot.slane %v6213_v42, 1 }
  0x59   : > { %v6681_v48 = vsel %vm886_vm2, %v859_v4, %v860_v56 }
  0x5a   : > { %v6686_v31 = vsel %vm886_vm2, %v860_v56, %v861_v5 }
  0x5b   : > { %732 = vrot.lane.b32.xlu1 %v6179_v23, %s6027_s28  ;;  %734 = vrot.lane.b32.xlu0 %v6187_v27, %s6027_s28  ;;  %9892 = vst [vmem:[#allocation40_spill] sm:$0xff] %v6686_v31  ;;  %v6696_v33 = vsel %vm918_vm3, %v6686_v31, 0.0  ;;  %v866_v31 = vrot.slane %v6307_v24, 1 }
  0x5f   : > { %730 = vrot.lane.b32.xlu1 %v9710_v26, %s6027_s28  ;;  %1505 = vrot.lane.b32.xlu0 %v6640_v38, %s6027_s28  ;;  %v862_v26 = vrot.slane %v6229_v47, 1 }
  0x61   : > { %v6700_v4 = vsel %vm886_vm2, %v861_v5, %v862_v26  ;;  %v6704_v56 = vsel %vm886_vm2, %v862_v26, %v863_v19  ;;  %v864_v26 = vrot.slane %v6276_v7, 1  ;;  %v865_v5 = vrot.slane %v6279_v8, 1 }
  0x62   : > { %9893 = vst [vmem:[#allocation41_spill] sm:$0xff] %v6704_v56  ;;  %v6713_v52 = vsel %vm918_vm3, %v6704_v56, 0.0 }
  0x63   : > { %1507 = vrot.lane.b32.xlu1 %v6650_v62, %s6027_s28  ;;  %1509 = vrot.lane.b32.xlu0 %v6654_v13, %s6027_s28  ;;  %v6727_v56 = vsel %vm886_vm2, %v863_v19, %v864_v26  ;;  %v6732_v20 = vsel %vm886_vm2, %v864_v26, %v865_v5  ;;  %v6746_v19 = vsel %vm886_vm2, %v865_v5, %v866_v31  ;;  %v869_v5 = vrot.slane %v6331_v36, 1 }
  0x64   : > { %9894 = vst [vmem:[#allocation42_spill] sm:$0xff] %v6732_v20  ;;  %v6742_v3 = vsel %vm918_vm3, %v6732_v20, 0.0  ;;  %v6750_v26 = vsel %vm886_vm2, %v866_v31, %v867_v18  ;;  %v868_v31 = vrot.slane %v6328_v34, 1  ;;  %v870_v20 = vrot.slane %v6353_v53, 1 }
  0x65   : > { %9895 = vst [vmem:[#allocation43_spill] sm:$0xff] %v6750_v26  ;;  %v6759_v0 = vsel %vm918_vm3, %v6750_v26, 0.0 }
  0x66   : > { %v6773_v26 = vsel %vm886_vm2, %v867_v18, %v868_v31  ;;  %v6778_v46 = vsel %vm886_vm2, %v868_v31, %v869_v5 }
  0x67   : > { %1511 = vrot.lane.b32.xlu1 %v6667_v60, %s6027_s28  ;;  %736 = vrot.lane.b32.xlu0 %v6173_v21, %s6027_s28  ;;  %9896 = vst [vmem:[#allocation44_spill] sm:$0xff] %v6778_v46  ;;  %v6788_v18 = vsel %vm918_vm3, %v6778_v46, 0.0 }
  0x6b   : > { %738 = vrot.lane.b32.xlu1 %v6176_v22, %s6027_s28  ;;  %740 = vrot.lane.b32.xlu0 %v6193_v29, %s6027_s28 }
  0x6f   : > { %742 = vrot.lane.b32.xlu1 %v6201_v35, %s6027_s28  ;;  %1513 = vrot.lane.b32.xlu0 %v6681_v48, %s6027_s28 }
  0x73   : > { %1515 = vrot.lane.b32.xlu1 %v6696_v33, %s6027_s28  ;;  %1517 = vrot.lane.b32.xlu0 %v6700_v4, %s6027_s28 }
  0x77   : > { %1519 = vrot.lane.b32.xlu1 %v6713_v52, %s6027_s28  ;;  %744 = vrot.lane.b32.xlu0 %v6213_v42, %s6027_s28 }
  0x7b   : > { %746 = vrot.lane.b32.xlu1 %v6229_v47, %s6027_s28  ;;  %748 = vrot.lane.b32.xlu0 %v6246_v55, %s6027_s28 }
  0x7f   : > { %750 = vrot.lane.b32.xlu1 %v6276_v7, %s6027_s28  ;;  %1521 = vrot.lane.b32.xlu0 %v6727_v56, %s6027_s28 }
  0x83   : > { %1523 = vrot.lane.b32.xlu1 %v6742_v3, %s6027_s28  ;;  %1525 = vrot.lane.b32.xlu0 %v6746_v19, %s6027_s28 }
  0x87   : > { %1527 = vrot.lane.b32.xlu1 %v6759_v0, %s6027_s28  ;;  %752 = vrot.lane.b32.xlu0 %v6279_v8, %s6027_s28  ;;  %v871_v8 = vrot.slane %v6363_v59, 1 }
  0x89   : > { %v6796_v7 = vsel %vm886_vm2, %v870_v20, %v871_v8  ;;  %v6830_v42 = vsel %vm886_vm2, %v871_v8, %v872_v63 }
  0x8a   : > { %9897 = vst [vmem:[#allocation45_spill] sm:$0xff] %v6796_v7 }
  0x8b   : > { %754 = vrot.lane.b32.xlu1 %v6307_v24, %s6027_s28  ;;  %756 = vrot.lane.b32.xlu0 %v6310_v25, %s6027_s28  ;;  %v6792_v25 = vsel %vm886_vm2, %v869_v5, %v870_v20  ;;  %v6805_v5 = vsel %vm918_vm3, %v6796_v7, 0.0 }
  0x8d   : > { %v961_v54 = vpop.permute.xlu0 %960 }
  0x8f   : > { %758 = vrot.lane.b32.xlu1 %v6328_v34, %s6027_s28  ;;  %1529 = vrot.lane.b32.xlu0 %v6773_v26, %s6027_s28 }
  0x91   : > { %v5895_v24 = vpop.permute.xlu1 %5894  ;;  %v965_v31 = vpop.permute.xlu0 %964 }
  0x92   : > { %v5897_v55 = vunpack.i.h.bf16 %v5895_v24  ;;  %v5896_v34 = vunpack.i.l.bf16 %v5895_v24 }
  0x93   : > { %1531 = vrot.lane.b32.xlu1 %v6788_v18, %s6027_s28  ;;  %1533 = vrot.lane.b32.xlu0 %v6792_v25, %s6027_s28 }
  0x94   : > { %v1050_v46 = vpack.c.bf16 %v5897_v55, %v5896_v34  ;;  %v1023_v55 = vadd.f32 %v965_v31, %v6667_v60  ;;  %v874_v60 = vrot.slane %v6411_v30, 1 }
  0x95   : > { %v963_v20 = vpop.permute.xlu1 %962  ;;  %v969_v32 = vpop.permute.xlu0 %968 }
  0x96   : > { %5374 = vmatprep.mubr.bf16.mxu0 %v1050_v46  ;;  %v1022_v24 = vadd.f32 %v963_v20, %v6654_v13  ;;  %v1021_v46 = vadd.f32 %v961_v54, %v6650_v62  ;;  %v6834_v54 = vsel %vm886_vm2, %v872_v63, %v873_v15  ;;  %v5916_v62 = vld [vmem:[%s9679_s1 + $0xb0] sm:$0xff]  }
  0x97   : > { %1535 = vrot.lane.b32.xlu1 %v6805_v5, %s6027_s28  ;;  %760 = vrot.lane.b32.xlu0 %v6331_v36, %s6027_s28  ;;  %v6849_v63 = vsel %vm918_vm3, %v6834_v54, 0.0 }
  0x98   : > { %v1052_v31 = vpack.c.bf16 %v1023_v55, %v1022_v24 }
  0x99   : > { %v967_v34 = vpop.permute.xlu1 %966  ;;  %v959_v7 = vpop.permute.xlu0 %958 }
  0x9a   : > { %v1020_v47 = vadd.f32 %v959_v7, %v6640_v38  ;;  %v875_v7 = vrot.slane %v6419_v43, 1  ;;  %v1024_v8 = vadd.f32 %v967_v34, %v6681_v48  ;;  %v5918_v34 = vld [vmem:[%s9679_s1 + $0xa8] sm:$0xff]  }
  0x9b   : > { %762 = vrot.lane.b32.xlu1 %v6353_v53, %s6027_s28  ;;  %764 = vrot.lane.b32.xlu0 %v6363_v59, %s6027_s28 }
  0x9c   : > { %v1051_v36 = vpack.c.bf16 %v1021_v46, %v1020_v47  ;;  %v1025_v47 = vadd.f32 %v969_v32, %v6696_v33  ;;  %v6856_v32 = vsel %vm886_vm2, %v873_v15, %v874_v60  ;;  %v6860_v33 = vsel %vm886_vm2, %v874_v60, %v875_v7  ;;  %v5920_v60 = vld [vmem:[%s9679_s1 + $0xa0] sm:$0xff]  }
  0x9d   : > { %v971_v20 = vpop.permute.xlu1 %970  ;;  %v973_v13 = vpop.permute.xlu0 %972  ;;  %9898 = vst [vmem:[#allocation46_spill] sm:$0xff] %v6860_v33  ;;  %v6872_v15 = vsel %vm918_vm3, %v6860_v33, 0.0  ;;  %v879_v33 = vrot.slane %v6477_v49, 1 }
  0x9e   : > { %5375 = vmatmul.mubr.bf16.vlgmr.msra.gmra.mxu0 %v1051_v36  ;;  %v1026_v36 = vadd.f32 %v971_v20, %v6700_v4  ;;  %v1027_v38 = vadd.f32 %v973_v13, %v6713_v52 }
  0x9f   : > { %766 = vrot.lane.b32.xlu1 %v6384_v9, %s6027_s28  ;;  %5378 = vmatprep.mubr.bf16.mxu0 %v1052_v31 }
  0xa0   : > { %1537 = vrot.lane.b32.xlu0 %v6830_v42, %s6027_s28  ;;  %5455 = vmatpush3.bf16.msra.mxu0 %v6483_v41  ;;  %v1053_v41 = vpack.c.bf16 %v1025_v47, %v1024_v8  ;;  %v1054_v52 = vpack.c.bf16 %v1027_v38, %v1026_v36  ;;  %v876_v38 = vrot.slane %v6441_v61, 1 }
  0xa1   : > { %v975_v55 = vpop.permute.xlu1 %974  ;;  %v977_v24 = vpop.permute.xlu0 %976  ;;  %5456 = vmatprep.subr.bf16.mxu0 %v5916_v62 }
  0xa2   : > { %v1028_v31 = vadd.f32 %v975_v55, %v6727_v56  ;;  %v1029_v20 = vadd.f32 %v977_v24, %v6742_v3  ;;  %v5922_v55 = vld [vmem:[%s9679_s1 + $0x98] sm:$0xff]  }
  0xa3   : > { %1539 = vrot.lane.b32.xlu1 %v6849_v63, %s6027_s28 }
  0xa4   : > { %1541 = vrot.lane.b32.xlu0 %v6856_v32, %s6027_s28  ;;  %5457 = vmatpush3.bf16.msra.mxu0 %v5916_v62  ;;  %v1055_v3 = vpack.c.bf16 %v1029_v20, %v1028_v31  ;;  %v5924_v31 = vld [vmem:[%s9679_s1 + $0x90] sm:$0xff]  }
  0xa5   : > { %v979_v13 = vpop.permute.xlu1 %978  ;;  %v981_v46 = vpop.permute.xlu0 %980  ;;  %5458 = vmatprep.subr.bf16.mxu0 %v5918_v34 }
  0xa6   : > { %5379 = vmatmul.mubr.bf16.gmra.mxu0 %v1053_v41  ;;  %v1030_v62 = vadd.f32 %v979_v13, %v6746_v19  ;;  %v1031_v47 = vadd.f32 %v981_v46, %v6759_v0  ;;  %v877_v41 = vrot.slane %v6447_v6, 1  ;;  %v878_v0 = vrot.slane %v6457_v16, 1 }
  0xa7   : > { %1543 = vrot.lane.b32.xlu1 %v6872_v15, %s6027_s28  ;;  %5382 = vmatprep.mubr.bf16.mxu0 %v1054_v52  ;;  %v6897_v13 = vsel %vm886_vm2, %v875_v7, %v876_v38 }
  0xa8   : > { %768 = vrot.lane.b32.xlu0 %v6390_v14, %s6027_s28  ;;  %5459 = vmatpush3.bf16.msra.mxu0 %v5918_v34  ;;  %v1056_v24 = vpack.c.bf16 %v1031_v47, %v1030_v62  ;;  %v6901_v46 = vsel %vm886_vm2, %v876_v38, %v877_v41 }
  0xa9   : > { %v983_v8 = vpop.permute.xlu1 %982  ;;  %v985_v36 = vpop.permute.xlu0 %984  ;;  %5460 = vmatprep.subr.bf16.mxu0 %v5920_v60  ;;  %9899 = vst [vmem:[#allocation47_spill] sm:$0xff] %v6901_v46  ;;  %v940_v20 = vsel %vm918_vm3, %v6901_v46, 0.0  ;;  %v883_v46 = vrot.slane %v6541_v11, 1 }
  0xaa   : > { %v1033_v7 = vadd.f32 %v985_v36, %v6788_v18  ;;  %v6924_v18 = vsel %vm886_vm2, %v878_v0, %v879_v33 }
  0xab   : > { %770 = vrot.lane.b32.xlu1 %v6411_v30, %s6027_s28  ;;  %9900 = vst [vmem:[#allocation48_spill] sm:$0xff] %v6924_v18 }
  0xac   : > { %772 = vrot.lane.b32.xlu0 %v6419_v43, %s6027_s28  ;;  %5461 = vmatpush3.bf16.msra.mxu0 %v5920_v60  ;;  %v1032_v60 = vadd.f32 %v983_v8, %v6773_v26  ;;  %v5925_v8 = vld [vmem:[%s9679_s1 + $0x88] sm:$0xff]  }
  0xad   : > { %v987_v34 = vpop.permute.xlu1 %986  ;;  %v989_v52 = vpop.permute.xlu0 %988  ;;  %5462 = vmatprep.subr.bf16.mxu0 %v5922_v55 }
  0xae   : > { %5383 = vmatmul.mubr.bf16.gmra.mxu0 %v1055_v3  ;;  %v1034_v62 = vadd.f32 %v987_v34, %v6792_v25  ;;  %v1035_v47 = vadd.f32 %v989_v52, %v6805_v5  ;;  %v1057_v36 = vpack.c.bf16 %v1033_v7, %v1032_v60  ;;  %v942_v5 = vsel %vm918_vm3, %v6924_v18, 0.0  ;;  %v5926_v34 = vld [vmem:[%s9679_s1 + $0x80] sm:$0xff]  }
  0xaf   : > { %774 = vrot.lane.b32.xlu1 %v6441_v61, %s6027_s28  ;;  %5386 = vmatprep.mubr.bf16.mxu0 %v1056_v24  ;;  %v6920_v24 = vsel %vm886_vm2, %v877_v41, %v878_v0  ;;  %v880_v18 = vrot.slane %v6503_v17, 1 }
  0xb0   : > { %1545 = vrot.lane.b32.xlu0 %v6897_v13, %s6027_s28  ;;  %5463 = vmatpush3.bf16.msra.mxu0 %v5922_v55  ;;  %v1058_v41 = vpack.c.bf16 %v1035_v47, %v1034_v62 }
  0xb1   : > { %v991_v38 = vpop.permute.xlu1 %990  ;;  %v993_v3 = vpop.permute.xlu0 %992  ;;  %5464 = vmatprep.subr.bf16.mxu0 %v5924_v31 }
  0xb2   : > { %v1036_v52 = vadd.f32 %v991_v38, %v6830_v42  ;;  %v1037_v60 = vadd.f32 %v993_v3, %v6849_v63  ;;  %v6950_v38 = vld [vmem:[%s9679_s1 + $0x138] sm:$0xff]  }
  0xb3   : > { %1547 = vrot.lane.b32.xlu1 %v940_v20, %s6027_s28 }
  0xb4   : > { %1549 = vrot.lane.b32.xlu0 %v6920_v24, %s6027_s28  ;;  %5465 = vmatpush3.bf16.msra.mxu0 %v5924_v31  ;;  %v1059_v63 = vpack.c.bf16 %v1037_v60, %v1036_v52 }
  0xb5   : > { %v995_v55 = vpop.permute.xlu1 %994  ;;  %v997_v0 = vpop.permute.xlu0 %996  ;;  %5466 = vmatprep.subr.bf16.mxu0 %v5925_v8 }
  0xb6   : > { %5387 = vmatmul.mubr.bf16.gmra.mxu0 %v1057_v36  ;;  %v1038_v31 = vadd.f32 %v995_v55, %v6856_v32  ;;  %v1039_v7 = vadd.f32 %v997_v0, %v6872_v15  ;;  %v881_v36 = vrot.slane %v6512_v45, 1  ;;  %v882_v15 = vrot.slane %v6534_v10, 1 }
  0xb7   : > { %1551 = vrot.lane.b32.xlu1 %v942_v5, %s6027_s28  ;;  %5390 = vmatprep.mubr.bf16.mxu0 %v1058_v41  ;;  %v6959_v55 = vsel %vm886_vm2, %v879_v33, %v880_v18 }
  0xb8   : > { %776 = vrot.lane.b32.xlu0 %v6447_v6, %s6027_s28  ;;  %5467 = vmatpush3.bf16.msra.mxu0 %v5925_v8  ;;  %v1060_v3 = vpack.c.bf16 %v1039_v7, %v1038_v31  ;;  %v6963_v0 = vsel %vm886_vm2, %v880_v18, %v881_v36 }
  0xb9   : > { %v999_v62 = vpop.permute.xlu1 %998  ;;  %v1001_v47 = vpop.permute.xlu0 %1000  ;;  %5468 = vmatprep.subr.bf16.mxu0 %v5926_v34  ;;  %9901 = vst [vmem:[#allocation49_spill] sm:$0xff] %v6963_v0  ;;  %v944_v33 = vsel %vm918_vm3, %v6963_v0, 0.0 }
  0xba   : > { %v1041_v52 = vadd.f32 %v1001_v47, %v940_v20 }
  0xbb   : > { %778 = vrot.lane.b32.xlu1 %v6457_v16, %s6027_s28 }
  0xbc   : > { %780 = vrot.lane.b32.xlu0 %v6477_v49, %s6027_s28  ;;  %5469 = vmatpush3.bf16.msra.mxu0 %v5926_v34  ;;  %v1040_v34 = vadd.f32 %v999_v62, %v6897_v13  ;;  %v6982_v62 = vsel %vm886_vm2, %v882_v15, %v883_v46 }
  0xbd   : > { %v1003_v8 = vpop.permute.xlu1 %1002  ;;  %v1005_v41 = vpop.permute.xlu0 %1004  ;;  %5550 = vmatprep.subr.bf16.mxu0 %v6950_v38  ;;  %9902 = vst [vmem:[#allocation50_spill] sm:$0xff] %v6982_v62  ;;  %v946_v47 = vsel %vm918_vm3, %v6982_v62, 0.0 }
  0xbe   : > { %5391 = vmatmul.mubr.bf16.gmra.mxu0 %v1059_v63  ;;  %v1042_v18 = vadd.f32 %v1003_v8, %v6920_v24  ;;  %v1043_v60 = vadd.f32 %v1005_v41, %v942_v5  ;;  %v6978_v63 = vsel %vm886_vm2, %v881_v36, %v882_v15  ;;  %v1061_v20 = vpack.c.bf16 %v1041_v52, %v1040_v34 }
  0xbf   : > { %782 = vrot.lane.b32.xlu1 %v6503_v17, %s6027_s28  ;;  %5394 = vmatprep.mubr.bf16.mxu0 %v1060_v3  ;;  %v884_v36 = vrot.slane %v6548_v37, 1  ;;  %v885_v41 = vrot.slane %v6563_v1, 1 }
  0xc0   : > { %1553 = vrot.lane.b32.xlu0 %v6959_v55, %s6027_s28  ;;  %v1062_v5 = vpack.c.bf16 %v1043_v60, %v1042_v18 }
  0xc1   : > { %v1007_v31 = vpop.permute.xlu1 %1006  ;;  %v1009_v7 = vpop.permute.xlu0 %1008 }
  0xc2   : > { %v1044_v15 = vadd.f32 %v1007_v31, %v6959_v55  ;;  %v1045_v34 = vadd.f32 %v1009_v7, %v944_v33  ;;  %v7007_v31 = vsel %vm886_vm2, %v883_v46, %v884_v36 }
  0xc3   : > { %1555 = vrot.lane.b32.xlu1 %v944_v33, %s6027_s28 }
  0xc4   : > { %1557 = vrot.lane.b32.xlu0 %v6978_v63, %s6027_s28  ;;  %v1063_v0 = vpack.c.bf16 %v1045_v34, %v1044_v15 }
  0xc5   : > { %v1011_v3 = vpop.permute.xlu1 %1010  ;;  %v1013_v8 = vpop.permute.xlu0 %1012 }
  0xc6   : > { %5395 = vmatmul.mubr.bf16.gmra.mxu0 %v1061_v20  ;;  %v1046_v52 = vadd.f32 %v1011_v3, %v6978_v63  ;;  %v1047_v62 = vadd.f32 %v1013_v8, %v946_v47  ;;  %v6999_v20 = vsel %vm886_vm2, %v884_v36, %v885_v41  ;;  %v1500_v3 = vrot.slane %v6190_v28, 1 }
  0xc7   : > { %1559 = vrot.lane.b32.xlu1 %v946_v47, %s6027_s28  ;;  %5398 = vmatprep.mubr.bf16.mxu0 %v1062_v5  ;;  %v948_v7 = vsel %vm918_vm3, %v6999_v20, 0.0 }
  0xc8   : > { %784 = vrot.lane.b32.xlu0 %v6512_v45, %s6027_s28  ;;  %v1064_v33 = vpack.c.bf16 %v1047_v62, %v1046_v52  ;;  %v7022_v52 = vsel %vm886_vm2, %v885_v41, %v1500_v3 }
  0xc9   : > { %v1015_v18 = vpop.permute.xlu1 %1014  ;;  %v1017_v60 = vpop.permute.xlu0 %1016 }
  0xca   : > { %v1048_v46 = vadd.f32 %v1015_v18, %v7007_v31  ;;  %v1049_v62 = vadd.f32 %v1017_v60, %v948_v7  ;;  %v5929_v18 = vld [vmem:[%s9679_s1 + $0xf0] sm:$0xff]  }
  0xcb   : > { %786 = vrot.lane.b32.xlu1 %v6534_v10, %s6027_s28 }
  0xcc   : > { %788 = vrot.lane.b32.xlu0 %v6541_v11, %s6027_s28  ;;  %v1065_v60 = vpack.c.bf16 %v1049_v62, %v1048_v46 }
  0xcd   : > { %v733_v47 = vpop.permute.xlu1 %732  ;;  %v735_v5 = vpop.permute.xlu0 %734 }
  0xce   : > { %5399 = vmatmul.mubr.bf16.gmra.mxu0 %v1063_v0  ;;  %v793_v8 = vadd.f32 %v733_v47, %v6235_v50  ;;  %v794_v15 = vadd.f32 %v735_v5, %v6220_v44  ;;  %v9903_v50 = vrot.slane %v6179_v23, 1 }
  0xcf   : > { %790 = vrot.lane.b32.xlu1 %v6548_v37, %s6027_s28  ;;  %5402 = vmatprep.mubr.bf16.mxu0 %v1064_v33 }
  0xd0   : > { %1561 = vrot.lane.b32.xlu0 %v7007_v31, %s6027_s28  ;;  %v7028_v44 = vsel %vm886_vm2, %v1500_v3, %v9903_v50  ;;  %v824_v33 = vpack.c.bf16 %v794_v15, %v793_v8 }
  0xd1   : > { %v731_v36 = vpop.permute.xlu1 %730  ;;  %v1506_v34 = vpop.permute.xlu0 %1505  ;;  %v1504_v47 = vsel %vm918_vm3, %v7028_v44, 0.0 }
  0xd2   : > { %v7030_v0 = vpack.c.bf16 %v731_v36, %v731_v36  ;;  %v1569_v41 = vadd.f32 %v1506_v34, %v6179_v23  ;;  %v5931_v23 = vld [vmem:[%s9679_s1 + $0xe8] sm:$0xff]   ;;  %v5930_v34 = vld [vmem:[%s9679_s1 + $0x130] sm:$0xff]  }
  0xd3   : > { %1563 = vrot.lane.b32.xlu1 %v948_v7, %s6027_s28 }
  0xd4   : > { %9904 = vst [vmem:[#allocation51_spill] sm:$0xff] %v7030_v0  ;;  %5422 = vmatprep.mubr.bf16.mxu1 %v7030_v0  ;;  %1565 = vrot.lane.b32.xlu0 %v7022_v52, %s6027_s28 }
  0xd5   : > { %v1508_v5 = vpop.permute.xlu1 %1507  ;;  %5423 = vmatmul.mubr.bf16.vlgmr.msra.gmra.mxu1 %v824_v33  ;;  %v1510_v3 = vpop.permute.xlu0 %1509 }
  0xd6   : > { %v1570_v7 = vadd.f32 %v1508_v5, %v6187_v27  ;;  %5403 = vmatmul.mubr.bf16.gmra.mxu0 %v1065_v60  ;;  %5503 = vmatpush3.bf16.msra.mxu1 %v6810_v39  ;;  %v1571_v15 = vadd.f32 %v1510_v3, %v6173_v21  ;;  %v5933_v39 = vld [vmem:[%s9679_s1 + $0xe0] sm:$0xff]  }
  0xd7   : > { %1567 = vrot.lane.b32.xlu1 %v1504_v47, %s6027_s28  ;;  %5504 = vmatprep.subr.bf16.mxu1 %v5929_v18 }
  0xd8   : > { %v1601_v8 = vpack.c.bf16 %v1570_v7, %v1569_v41  ;;  %1874 = vrot.lane.b32.xlu0 %v6563_v1, %s6027_s28  ;;  %v5932_v41 = vld [vmem:[%s9679_s1 + $0x128] sm:$0xff]   ;;  %v5937_v7 = vld [vmem:[%s9679_s1 + $0xd0] sm:$0xff]  }
  0xd9   : > { %v1512_v46 = vpop.permute.xlu1 %1511  ;;  %v737_v62 = vpop.permute.xlu0 %736 }
  0xda   : > { %v1572_v27 = vadd.f32 %v1512_v46, %v6176_v22  ;;  %5470 = vmatprep.mubr.bf16.mxu0 %v1601_v8  ;;  %5505 = vmatpush3.bf16.msra.mxu1 %v5929_v18  ;;  %v795_v21 = vadd.f32 %v737_v62, %v6286_v12  ;;  %v5935_v18 = vld [vmem:[%s9679_s1 + $0xd8] sm:$0xff]   ;;  %v9905_v46 = vld [vmem:[#allocation3_spill] sm:$0xff] }
  0xdb   : > { %1876 = vrot.lane.b32.xlu1 %v6190_v28, %s6027_s28  ;;  %5506 = vmatprep.subr.bf16.mxu1 %v5931_v23  ;;  %v5936_v62 = vld [vmem:[%s9679_s1 + $0x118] sm:$0xff]  }
  0xdc   : > { %v1602_v36 = vpack.c.bf16 %v1572_v27, %v1571_v15  ;;  %v5939_v27 = vld [vmem:[%s9679_s1 + $0xc8] sm:$0xff]  }
  0xdd   : > { %v739_v50 = vpop.permute.xlu1 %738  ;;  %v741_v33 = vpop.permute.xlu0 %740 }
  0xde   : > { %v796_v22 = vadd.f32 %v739_v50, %v6209_v40  ;;  %5471 = vmatmul.mubr.bf16.vlgmr.msra.gmra.mxu0 %v1602_v36  ;;  %5507 = vmatpush3.bf16.msra.mxu1 %v5931_v23  ;;  %v797_v12 = vadd.f32 %v741_v33, %v6252_v58  ;;  %v5934_v58 = vld [vmem:[%s9679_s1 + $0x120] sm:$0xff]   ;;  %v9907_v50 = vld [vmem:[#allocation9_spill] sm:$0xff] }
  0xdf   : > { %5551 = vmatpush3.bf16.msra.mxu0 %v6950_v38  ;;  %5508 = vmatprep.subr.bf16.mxu1 %v5933_v39 }
  0xe0   : > { %v7067_v60 = vpack.c.bf16 %v796_v22, %v795_v21  ;;  %5552 = vmatprep.subr.bf16.mxu0 %v5930_v34  ;;  %v5938_v22 = vld [vmem:[%s9679_s1 + $0x110] sm:$0xff]  }
  0xe1   : > { %v743_v47 = vpop.permute.xlu1 %742  ;;  %v1514_v40 = vpop.permute.xlu0 %1513 }
  0xe2   : > { %v798_v5 = vadd.f32 %v743_v47, %v6239_v51  ;;  %5426 = vmatprep.mubr.bf16.mxu1 %v7067_v60  ;;  %5509 = vmatpush3.bf16.msra.mxu1 %v5933_v39  ;;  %v1573_v3 = vadd.f32 %v1514_v40, %v6193_v29  ;;  %v9908_v47 = vld [vmem:[#allocation6_spill] sm:$0xff] }
  0xe3   : > { %5553 = vmatpush3.bf16.msra.mxu0 %v5930_v34  ;;  %5510 = vmatprep.subr.bf16.mxu1 %v5935_v18 }
  0xe4   : > { %v7075_v38 = vpack.c.bf16 %v798_v5, %v797_v12  ;;  %5554 = vmatprep.subr.bf16.mxu0 %v5932_v41 }
  0xe5   : > { %v1516_v23 = vpop.permute.xlu1 %1515  ;;  %v1518_v51 = vpop.permute.xlu0 %1517 }
  0xe6   : > { %v1574_v8 = vadd.f32 %v1516_v23, %v6201_v35  ;;  %5427 = vmatmul.mubr.bf16.gmra.mxu1 %v7075_v38  ;;  %v1575_v29 = vadd.f32 %v1518_v51, %v9905_v46  ;;  %v9906_v35 = vld [vmem:[#allocation4_spill] sm:$0xff] }
  0xe7   : > { %5555 = vmatpush3.bf16.msra.mxu0 %v5932_v41  ;;  %5511 = vmatpush3.bf16.msra.mxu1 %v5935_v18  ;;  %v5941_v18 = vld [vmem:[%s9679_s1 + $0xc0] sm:$0xff]  }
  0xe8   : > { %v1603_v15 = vpack.c.bf16 %v1574_v8, %v1573_v3  ;;  %5556 = vmatprep.subr.bf16.mxu0 %v5934_v58  ;;  %5512 = vmatprep.subr.bf16.mxu1 %v5937_v7  ;;  %v9909_v3 = vld [vmem:[#allocation12_spill] sm:$0xff]  ;;  %v9910_v8 = vld [vmem:[#allocation15_spill] sm:$0xff] }
  0xe9   : > { %v1520_v39 = vpop.permute.xlu1 %1519  ;;  %v745_v36 = vpop.permute.xlu0 %744 }
  0xea   : > { %v1576_v21 = vadd.f32 %v1520_v39, %v9906_v35  ;;  %5474 = vmatprep.mubr.bf16.mxu0 %v1603_v15  ;;  %v799_v33 = vadd.f32 %v745_v36, %v9907_v50  ;;  %v9912_v35 = vld [vmem:[#allocation7_spill] sm:$0xff]  ;;  %v9913_v50 = vld [vmem:[#allocation8_spill] sm:$0xff] }
  0xeb   : > { %5557 = vmatpush3.bf16.msra.mxu0 %v5934_v58  ;;  %5513 = vmatpush3.bf16.msra.mxu1 %v5937_v7  ;;  %v5940_v7 = vld [vmem:[%s9679_s1 + $0x108] sm:$0xff]  }
  0xec   : > { %v1604_v34 = vpack.c.bf16 %v1576_v21, %v1575_v29  ;;  %5558 = vmatprep.subr.bf16.mxu0 %v5936_v62  ;;  %5514 = vmatprep.subr.bf16.mxu1 %v5939_v27  ;;  %v9911_v29 = vld [vmem:[#allocation5_spill] sm:$0xff] }
  0xed   : > { %v747_v12 = vpop.permute.xlu1 %746  ;;  %v749_v41 = vpop.permute.xlu0 %748 }
  0xee   : > { %v800_v40 = vadd.f32 %v747_v12, %v9908_v47  ;;  %5475 = vmatmul.mubr.bf16.gmra.mxu0 %v1604_v34  ;;  %v801_v58 = vadd.f32 %v749_v41, %v9909_v3  ;;  %v9914_v12 = vld [vmem:[#allocation10_spill] sm:$0xff] }
  0xef   : > { %5559 = vmatpush3.bf16.msra.mxu0 %v5936_v62  ;;  %5515 = vmatpush3.bf16.msra.mxu1 %v5939_v27  ;;  %v5942_v27 = vld [vmem:[%s9679_s1 + $0x100] sm:$0xff]  }
  0xf0   : > { %v7102_v5 = vpack.c.bf16 %v800_v40, %v799_v33  ;;  %5560 = vmatprep.subr.bf16.mxu0 %v5938_v22  ;;  %5516 = vmatprep.subr.bf16.mxu1 %v5941_v18  ;;  %v9915_v40 = vld [vmem:[#allocation16_spill] sm:$0xff] }
  0xf1   : > { %v751_v23 = vpop.permute.xlu1 %750  ;;  %v1522_v51 = vpop.permute.xlu0 %1521 }
  0xf2   : > { %v802_v15 = vadd.f32 %v751_v23, %v9910_v8  ;;  %5430 = vmatprep.mubr.bf16.mxu1 %v7102_v5  ;;  %v1577_v62 = vadd.f32 %v1522_v51, %v9911_v29  ;;  %v9916_v51 = vld [vmem:[#allocation17_spill] sm:$0xff] }
  0xf3   : > { %5561 = vmatpush3.bf16.msra.mxu0 %v5938_v22  ;;  %5517 = vmatpush3.bf16.msra.mxu1 %v5941_v18 }
  0xf4   : > { %v7110_v46 = vpack.c.bf16 %v802_v15, %v801_v58  ;;  %5562 = vmatprep.subr.bf16.mxu0 %v5940_v7 }
  0xf5   : > { %v1524_v39 = vpop.permute.xlu1 %1523  ;;  %v1526_v36 = vpop.permute.xlu0 %1525 }
  0xf6   : > { %v1578_v21 = vadd.f32 %v1524_v39, %v9912_v35  ;;  %5431 = vmatmul.mubr.bf16.gmra.mxu1 %v7110_v46  ;;  %v1579_v33 = vadd.f32 %v1526_v36, %v9913_v50  ;;  %v9918_v36 = vld [vmem:[#allocation19_spill] sm:$0xff] }
  0xf7   : > { %5563 = vmatpush3.bf16.msra.mxu0 %v5940_v7  ;;  %v9917_v7 = vld [vmem:[#allocation18_spill] sm:$0xff] }
  0xf8   : > { %v1605_v34 = vpack.c.bf16 %v1578_v21, %v1577_v62  ;;  %5564 = vmatprep.subr.bf16.mxu0 %v5942_v27 }
  0xf9   : > { %v1528_v22 = vpop.permute.xlu1 %1527  ;;  %v753_v18 = vpop.permute.xlu0 %752 }
  0xfa   : > { %v1580_v41 = vadd.f32 %v1528_v22, %v9914_v12  ;;  %5478 = vmatprep.mubr.bf16.mxu0 %v1605_v34  ;;  %v803_v3 = vadd.f32 %v753_v18, %v9915_v40  ;;  %v9920_v22 = vld [vmem:[#allocation13_spill] sm:$0xff] }
  0xfb   : > { %5565 = vmatpush3.bf16.msra.mxu0 %v5942_v27  ;;  %v9919_v27 = vld [vmem:[#allocation11_spill] sm:$0xff] }
  0xfc   : > { %v1606_v47 = vpack.c.bf16 %v1580_v41, %v1579_v33  ;;  %v9921_v41 = vld [vmem:[#allocation14_spill] sm:$0xff] }
  0xfd   : > { %v755_v58 = vpop.permute.xlu1 %754  ;;  %v757_v23 = vpop.permute.xlu0 %756 }
  0xfe   : > { %v804_v8 = vadd.f32 %v755_v58, %v9916_v51  ;;  %5479 = vmatmul.mubr.bf16.gmra.mxu0 %v1606_v47  ;;  %v805_v29 = vadd.f32 %v757_v23, %v9917_v7  ;;  %v9922_v51 = vld [vmem:[#allocation20_spill] sm:$0xff] }
 0x100   : > { %v7122_v15 = vpack.c.bf16 %v804_v8, %v803_v3 }
 0x101   : > { %v759_v62 = vpop.permute.xlu1 %758  ;;  %v1530_v39 = vpop.permute.xlu0 %1529 }
 0x102   : > { %v806_v35 = vadd.f32 %v759_v62, %v9918_v36  ;;  %5434 = vmatprep.mubr.bf16.mxu1 %v7122_v15  ;;  %v1581_v34 = vadd.f32 %v1530_v39, %v9919_v27  ;;  %v9923_v62 = vld [vmem:[#allocation21_spill] sm:$0xff] }
 0x104   : > { %v7127_v21 = vpack.c.bf16 %v806_v35, %v805_v29  ;;  %v9924_v35 = vld [vmem:[#allocation22_spill] sm:$0xff] }
 0x105   : > { %v1532_v50 = vpop.permute.xlu1 %1531  ;;  %v1534_v33 = vpop.permute.xlu0 %1533 }
 0x106   : > { %v1582_v18 = vadd.f32 %v1532_v50, %v9920_v22  ;;  %5435 = vmatmul.mubr.bf16.gmra.mxu1 %v7127_v21  ;;  %v1583_v47 = vadd.f32 %v1534_v33, %v9921_v41  ;;  %v9925_v50 = vld [vmem:[#allocation23_spill] sm:$0xff] }
 0x108   : > { %v1607_v12 = vpack.c.bf16 %v1582_v18, %v1581_v34 }
 0x109   : > { %v1536_v40 = vpop.permute.xlu1 %1535  ;;  %v761_v3 = vpop.permute.xlu0 %760 }
 0x10a   : > { %v1584_v58 = vadd.f32 %v1536_v40, %v6353_v53  ;;  %5482 = vmatprep.mubr.bf16.mxu0 %v1607_v12  ;;  %v807_v8 = vadd.f32 %v761_v3, %v9922_v51 }
 0x10c   : > { %v1608_v23 = vpack.c.bf16 %v1584_v58, %v1583_v47 }
 0x10d   : > { %v763_v7 = vpop.permute.xlu1 %762  ;;  %v765_v29 = vpop.permute.xlu0 %764 }
 0x10e   : > { %v808_v39 = vadd.f32 %v763_v7, %v9923_v62  ;;  %5483 = vmatmul.mubr.bf16.gmra.mxu0 %v1608_v23  ;;  %v809_v27 = vadd.f32 %v765_v29, %v9924_v35  ;;  %v9926_v7 = vld [vmem:[#allocation24_spill] sm:$0xff] }
 0x110   : > { %v7136_v36 = vpack.c.bf16 %v808_v39, %v807_v8  ;;  %v9927_v39 = vld [vmem:[#allocation25_spill] sm:$0xff] }
 0x111   : > { %v767_v34 = vpop.permute.xlu1 %766 }
 0x112   : > { %v810_v33 = vadd.f32 %v767_v34, %v9925_v50  ;;  %5438 = vmatprep.mubr.bf16.mxu1 %v7136_v36  ;;  %v1538_v22 = vpop.permute.xlu0 %1537 }
 0x113   : > { %v1585_v18 = vadd.f32 %v1538_v22, %v6363_v59 }
 0x114   : > { %v7141_v53 = vpack.c.bf16 %v810_v33, %v809_v27  ;;  %v9928_v27 = vld [vmem:[#allocation26_spill] sm:$0xff]  ;;  %v9929_v33 = vld [vmem:[#allocation27_spill] sm:$0xff] }
 0x115   : > { %v1540_v12 = vpop.permute.xlu1 %1539 }
 0x116   : > { %v1586_v41 = vadd.f32 %v1540_v12, %v6384_v9  ;;  %5439 = vmatmul.mubr.bf16.gmra.mxu1 %v7141_v53  ;;  %v1542_v47 = vpop.permute.xlu0 %1541 }
 0x117   : > { %v1587_v3 = vadd.f32 %v1542_v47, %v6390_v14 }
 0x118   : > { %v1609_v40 = vpack.c.bf16 %v1586_v41, %v1585_v18 }
 0x119   : > { %v1544_v58 = vpop.permute.xlu1 %1543 }
 0x11a   : > { %v1588_v23 = vadd.f32 %v1544_v58, %v6411_v30  ;;  %5486 = vmatprep.mubr.bf16.mxu0 %v1609_v40  ;;  %v769_v51 = vpop.permute.xlu0 %768 }
 0x11b   : > { %v811_v29 = vadd.f32 %v769_v51, %v9926_v7  ;;  %v9930_v7 = vld [vmem:[#allocation29_spill] sm:$0xff] }
 0x11c   : > { %v1610_v8 = vpack.c.bf16 %v1588_v23, %v1587_v3 }
 0x11d   : > { %v771_v62 = vpop.permute.xlu1 %770 }
 0x11e   : > { %v812_v59 = vadd.f32 %v771_v62, %v9927_v39  ;;  %5487 = vmatmul.mubr.bf16.gmra.mxu0 %v1610_v8  ;;  %v773_v35 = vpop.permute.xlu0 %772  ;;  %v9931_v39 = vld [vmem:[#allocation28_spill] sm:$0xff] }
 0x11f   : > { %v813_v34 = vadd.f32 %v773_v35, %v9928_v27  ;;  %v9932_v35 = vld [vmem:[#allocation30_spill] sm:$0xff] }
 0x120   : > { %v7150_v9 = vpack.c.bf16 %v812_v59, %v811_v29 }
 0x121   : > { %v775_v50 = vpop.permute.xlu1 %774 }
 0x122   : > { %v814_v14 = vadd.f32 %v775_v50, %v9929_v33  ;;  %5442 = vmatprep.mubr.bf16.mxu1 %v7150_v9  ;;  %v1546_v30 = vpop.permute.xlu0 %1545  ;;  %v9933_v50 = vld [vmem:[#allocation31_spill] sm:$0xff] }
 0x123   : > { %v1589_v18 = vadd.f32 %v1546_v30, %v6419_v43 }
 0x124   : > { %v7155_v22 = vpack.c.bf16 %v814_v14, %v813_v34 }
 0x125   : > { %v1548_v12 = vpop.permute.xlu1 %1547 }
 0x126   : > { %v1590_v41 = vadd.f32 %v1548_v12, %v6441_v61  ;;  %5443 = vmatmul.mubr.bf16.gmra.mxu1 %v7155_v22  ;;  %v1550_v47 = vpop.permute.xlu0 %1549 }
 0x127   : > { %v1591_v3 = vadd.f32 %v1550_v47, %v6447_v6 }
 0x128   : > { %v1611_v40 = vpack.c.bf16 %v1590_v41, %v1589_v18 }
 0x129   : > { %v1552_v58 = vpop.permute.xlu1 %1551 }
 0x12a   : > { %v1592_v23 = vadd.f32 %v1552_v58, %v6457_v16  ;;  %5490 = vmatprep.mubr.bf16.mxu0 %v1611_v40  ;;  %v777_v51 = vpop.permute.xlu0 %776 }
 0x12b   : > { %v815_v29 = vadd.f32 %v777_v51, %v9930_v7  ;;  %v9934_v51 = vld [vmem:[#allocation32_spill] sm:$0xff] }
 0x12c   : > { %v1612_v8 = vpack.c.bf16 %v1592_v23, %v1591_v3 }
 0x12d   : > { %v779_v62 = vpop.permute.xlu1 %778 }
 0x12e   : > { %v816_v43 = vadd.f32 %v779_v62, %v9931_v39  ;;  %5491 = vmatmul.mubr.bf16.gmra.mxu0 %v1612_v8  ;;  %v781_v59 = vpop.permute.xlu0 %780  ;;  %v9936_v39 = vld [vmem:[#allocation34_spill] sm:$0xff] }
 0x12f   : > { %v817_v27 = vadd.f32 %v781_v59, %v9932_v35  ;;  %v9937_v35 = vld [vmem:[#allocation35_spill] sm:$0xff] }
 0x130   : > { %v7164_v61 = vpack.c.bf16 %v816_v43, %v815_v29  ;;  %v9935_v29 = vld [vmem:[#allocation33_spill] sm:$0xff] }
 0x131   : > { %v783_v34 = vpop.permute.xlu1 %782 }
 0x132   : > { %v818_v6 = vadd.f32 %v783_v34, %v9933_v50  ;;  %5446 = vmatprep.mubr.bf16.mxu1 %v7164_v61  ;;  %v1554_v16 = vpop.permute.xlu0 %1553 }
 0x133   : > { %v1593_v14 = vadd.f32 %v1554_v16, %v6477_v49 }
 0x134   : > { %v7169_v33 = vpack.c.bf16 %v818_v6, %v817_v27 }
 0x135   : > { %v1556_v30 = vpop.permute.xlu1 %1555 }
 0x136   : > { %v1594_v18 = vadd.f32 %v1556_v30, %v6503_v17  ;;  %5447 = vmatmul.mubr.bf16.gmra.mxu1 %v7169_v33  ;;  %v1558_v12 = vpop.permute.xlu0 %1557 }
 0x137   : > { %v1595_v47 = vadd.f32 %v1558_v12, %v6512_v45 }
 0x138   : > { %v1613_v41 = vpack.c.bf16 %v1594_v18, %v1593_v14 }
 0x139   : > { %v1560_v40 = vpop.permute.xlu1 %1559 }
 0x13a   : > { %v1596_v3 = vadd.f32 %v1560_v40, %v6534_v10  ;;  %5494 = vmatprep.mubr.bf16.mxu0 %v1613_v41  ;;  %v785_v58 = vpop.permute.xlu0 %784  ;;  %v9938_v41 = vld [vmem:[#allocation38_spill] sm:$0xff] }
 0x13b   : > { %v819_v8 = vadd.f32 %v785_v58, %v9934_v51  ;;  %v9946_v58 = vld [vmem:[#allocation43_spill] sm:$0xff] }
 0x13c   : > { %v1614_v23 = vpack.c.bf16 %v1596_v3, %v1595_v47  ;;  %v9939_v47 = vld [vmem:[#allocation39_spill] sm:$0xff] }
 0x13d   : > { %v787_v7 = vpop.permute.xlu1 %786  ;;  %v4957_v40 = vpack.c.bf16 %v9939_v47, %v9938_v41 }
 0x13e   : > { %v820_v49 = vadd.f32 %v787_v7, %v9935_v29  ;;  %5495 = vmatmul.mubr.bf16.gmra.mxu0 %v1614_v23  ;;  %v789_v62 = vpop.permute.xlu0 %788  ;;  %v4969_v23 = vpack.c.bf16 %v9946_v58, %v6746_v19  ;;  %v9948_v19 = vld [vmem:[#allocation45_spill] sm:$0xff]  ;;  %v9949_v7 = vld [vmem:[#allocation46_spill] sm:$0xff] }
 0x13f   : > { %v821_v43 = vadd.f32 %v789_v62, %v9936_v39  ;;  %v9951_v62 = vld [vmem:[#allocation48_spill] sm:$0xff] }
 0x140   : > { %v7178_v17 = vpack.c.bf16 %v820_v49, %v819_v8  ;;  %v4978_v8 = vpack.c.bf16 %v6834_v54, %v6830_v42  ;;  %v9950_v54 = vld [vmem:[#allocation47_spill] sm:$0xff] }
 0x141   : > { %v791_v59 = vpop.permute.xlu1 %790  ;;  %v4984_v49 = vpack.c.bf16 %v9950_v54, %v6897_v13  ;;  %v9952_v13 = vld [vmem:[#allocation36_spill] sm:$0xff] }
 0x142   : > { %v822_v45 = vadd.f32 %v791_v59, %v9937_v35  ;;  %5450 = vmatprep.mubr.bf16.mxu1 %v7178_v17  ;;  %v1562_v10 = vpop.permute.xlu0 %1561 }
 0x143   : > { %v1597_v34 = vadd.f32 %v1562_v10, %v6541_v11  ;;  %v9940_v11 = vmov 0 }
 0x144   : > { %v7183_v27 = vpack.c.bf16 %v822_v45, %v821_v43  ;;  %v9941_v11 = vsel %vm7195_vm5, 4294967295, %v9940_v11  ;;  %v9953_v45 = vld [vmem:[#allocation37_spill] sm:$0xff] }
 0x145   : > { %v1564_v50 = vpop.permute.xlu1 %1563  ;;  %9942 = vst [vmem:[#allocation3_spill] sm:$0xff] %v9941_v11 }
 0x146   : > { %v1598_v6 = vadd.f32 %v1564_v50, %v6548_v37  ;;  %5451 = vmatmul.mubr.bf16.gmra.mxu1 %v7183_v27  ;;  %v1566_v16 = vpop.permute.xlu0 %1565 }
 0x147   : > { %5518 = vmatprep.mubr.bf16.mxu1 %v7067_v60  ;;  %v1599_v30 = vadd.f32 %v1566_v16, %v6563_v1  ;;  %v9944_v1 = vld [vmem:[#allocation41_spill] sm:$0xff] }
 0x148   : > { %v1615_v14 = vpack.c.bf16 %v1598_v6, %v1597_v34  ;;  %v4963_v60 = vpack.c.bf16 %v9944_v1, %v6700_v4  ;;  %v9954_v34 = vld [vmem:[#allocation49_spill] sm:$0xff]  ;;  %v9955_v6 = vld [vmem:[#allocation50_spill] sm:$0xff] }
 0x149   : > { %v1568_v18 = vpop.permute.xlu1 %1567  ;;  %v4990_v50 = vpack.c.bf16 %v9954_v34, %v6959_v55  ;;  %v4993_v16 = vpack.c.bf16 %v9955_v6, %v6978_v63 }
 0x14a   : > { %v1600_v12 = vadd.f32 %v1568_v18, %v6190_v28  ;;  %5498 = vmatprep.mubr.bf16.mxu0 %v1615_v14  ;;  %v9943_v28 = vld [vmem:[#allocation40_spill] sm:$0xff]  ;;  %v1875_v39 = vpop.permute.xlu0 %1874  ;;  %v4996_v18 = vpack.c.bf16 %v6999_v20, %v7007_v31 }
 0x14b   : > { %v4960_v37 = vpack.c.bf16 %v9943_v28, %v6681_v48  ;;  %v1878_v35 = vadd.f32 %v1875_v39, %v9952_v13 }
 0x14c   : > { %v1616_v3 = vpack.c.bf16 %v1600_v12, %v1599_v30  ;;  %v4999_v12 = vpack.c.bf16 %v7028_v44, %v7022_v52 }
 0x14d   : > { %v1877_v59 = vpop.permute.xlu1 %1876 }
 0x14e   : > { %5499 = vmatmul.mubr.bf16.gmra.mxu0 %v1616_v3  ;;  %5519 = vmatmul.mubr.bf16.vlgmr.msra.gmra.mxu1 %v7075_v38  ;;  %v9945_v38 = vld [vmem:[#allocation42_spill] sm:$0xff] }
 0x14f   : > { %5522 = vmatprep.mubr.bf16.mxu1 %v7102_v5  ;;  %5566 = vmatprep.mubr.msk.bf16.mxu0 %vm7195_vm5, %v4957_v40  ;;  %v4966_v5 = vpack.c.bf16 %v9945_v38, %v6727_v56  ;;  %v9747_v40 = vmov 0.0|0.0  }
 0x156   : > { %5523 = vmatmul.mubr.bf16.gmra.mxu1 %v7110_v46  ;;  %5567 = vmatmul.mubr.msk.bf16.vlgmr.msra.gmra.mxu0 %vm7195_vm5, %v4960_v37  ;;  %v9947_v46 = vld [vmem:[#allocation44_spill] sm:$0xff] }
 0x157   : > { %5526 = vmatprep.mubr.bf16.mxu1 %v7122_v15  ;;  %5570 = vmatprep.mubr.msk.bf16.mxu0 %vm7195_vm5, %v4963_v60  ;;  %v4972_v56 = vpack.c.bf16 %v9947_v46, %v6773_v26 }
 0x15e   : > { %5527 = vmatmul.mubr.bf16.gmra.mxu1 %v7127_v21  ;;  %5571 = vmatmul.mubr.msk.bf16.gmra.mxu0 %vm7195_vm5, %v4966_v5  ;;  %v7220_v48 = vpop.f32.mrf.mxu0  ;;  %v4975_v21 = vpack.c.bf16 %v9948_v19, %v6792_v25 }
 0x15f   : > { %5530 = vmatprep.mubr.bf16.mxu1 %v7136_v36  ;;  %5574 = vmatprep.mubr.msk.bf16.mxu0 %vm7195_vm5, %v4969_v23 }
 0x160   : > { %v7225_v4 = vpop.f32.mrf.mxu0 }
 0x162   : > { %v7229_v15 = vpop.f32.mrf.mxu0 }
 0x164   : > { %v7233_v51 = vpop.f32.mrf.mxu0 }
 0x166   : > { %5531 = vmatmul.mubr.bf16.gmra.mxu1 %v7141_v53  ;;  %5575 = vmatmul.mubr.msk.bf16.gmra.mxu0 %vm7195_vm5, %v4972_v56  ;;  %v7238_v36 = vpop.f32.mrf.mxu0  ;;  %v4981_v53 = vpack.c.bf16 %v9949_v7, %v6856_v32 }
 0x167   : > { %5534 = vmatprep.mubr.bf16.mxu1 %v7150_v9  ;;  %5578 = vmatprep.mubr.msk.bf16.mxu0 %vm7195_vm5, %v4975_v21 }
 0x168   : > { %v7243_v26 = vpop.f32.mrf.mxu0 }
 0x16a   : > { %v7247_v25 = vpop.f32.mrf.mxu0 }
 0x16c   : > { %v7251_v29 = vpop.f32.mrf.mxu0 }
 0x16e   : > { %5535 = vmatmul.mubr.bf16.gmra.mxu1 %v7155_v22  ;;  %5579 = vmatmul.mubr.msk.bf16.gmra.mxu0 %vm7195_vm5, %v4978_v8  ;;  %v7256_v9 = vpop.f32.mrf.mxu0  ;;  %v4987_v22 = vpack.c.bf16 %v9951_v62, %v6920_v24  ;;  %v1879_v24 = vadd.f32 %v1877_v59, %v9953_v45 }
 0x16f   : > { %5538 = vmatprep.mubr.bf16.mxu1 %v7164_v61  ;;  %5582 = vmatprep.mubr.msk.bf16.mxu0 %vm7195_vm5, %v4981_v53 }
 0x170   : > { %v7261_v42 = vpop.f32.mrf.mxu0  ;;  %v1880_v14 = vpack.c.bf16 %v1879_v24, %v1878_v35 }
 0x172   : > { %v7265_v32 = vpop.f32.mrf.mxu0 }
 0x174   : > { %v7269_v43 = vpop.f32.mrf.mxu0 }
 0x176   : > { %5539 = vmatmul.mubr.bf16.gmra.mxu1 %v7169_v33  ;;  %5583 = vmatmul.mubr.msk.bf16.gmra.mxu0 %vm7195_vm5, %v4984_v49  ;;  %v7274_v61 = vpop.f32.mrf.mxu0 }
 0x177   : > { %5542 = vmatprep.mubr.bf16.mxu1 %v7178_v17  ;;  %5586 = vmatprep.mubr.msk.bf16.mxu0 %vm7195_vm5, %v4987_v22 }
 0x178   : > { %v7281_v10 = vpop.f32.mrf.mxu0 }
 0x17a   : > { %v7285_v33 = vpop.f32.mrf.mxu0 }
 0x17c   : > { %v7289_v30 = vpop.f32.mrf.mxu0 }
 0x17e   : > { %5543 = vmatmul.mubr.bf16.gmra.mxu1 %v7183_v27  ;;  %5587 = vmatmul.mubr.msk.bf16.gmra.mxu0 %vm7195_vm5, %v4990_v50  ;;  %v7294_v17 = vpop.f32.mrf.mxu0 }
 0x17f   : > { %5546 = vmatprep.mubr.bf16.mxu1 %v1880_v14  ;;  %5590 = vmatprep.mubr.msk.bf16.mxu0 %vm7195_vm5, %v4993_v16 }
 0x180   : > { %v7298_v55 = vpop.f32.mrf.mxu0 }
 0x182   : > { %v7302_v63 = vpop.f32.mrf.mxu0 }
 0x184   : > { %v7306_v27 = vpop.f32.mrf.mxu0 }
 0x186   : > { %5547 = vmatmul.mubr.bf16.gmra.mxu1 %v7030_v0  ;;  %5591 = vmatmul.mubr.msk.bf16.gmra.mxu0 %vm7195_vm5, %v4996_v18  ;;  %v7311_v41 = vpop.f32.mrf.mxu0 }
 0x187   : > { %5594 = vmatprep.mubr.msk.bf16.mxu0 %vm7195_vm5, %v4999_v12 }
 0x188   : > { %v7315_v47 = vpop.f32.mrf.mxu0 }
 0x18a   : > { %v7317_v20 = vpop.f32.mrf.mxu0 }
 0x18c   : > { %v7319_v31 = vpop.f32.mrf.mxu0 }
 0x18e   : > { %5595 = vmatmul.mubr.bf16.gmra.mxu0 %v9747_v40  ;;  %v7322_v52 = vpop.f32.mrf.mxu0 }
 0x18f   : > { %5662 = vmatprep.mubr.bf16.mxu0 %v7030_v0 }
 0x190   : > { %v7325_v44 = vpop.f32.mrf.mxu0 }
 0x192   : > { %v7327_v3 = vpop.f32.mrf.mxu0 }
 0x194   : > { %v7329_v28 = vpop.f32.mrf.mxu0 }
 0x195   : > { %v5424_v37 = vpop.f32.mrf.mxu1 }
 0x196   : > { %v1382_v1 = vadd.f32 %v5424_v37, %v7220_v48  ;;  %v7332_v60 = vpop.f32.mrf.mxu0 }
 0x197   : > { %v7338_v58 = vpop.f32.mrf.mxu1 }
 0x198   : > { %v7334_v38 = vpop.f32.mrf.mxu0 }
 0x199   : > { %v7344_v19 = vpop.f32.mrf.mxu1 }
 0x19a   : > { %v7336_v5 = vpop.f32.mrf.mxu0 }
 0x19b   : > { %v7346_v21 = vpop.f32.mrf.mxu1 }
 0x19c   : > { %v7340_v23 = vpop.f32.mrf.mxu0 }
 0x19d   : > { %9956 = vst [vmem:[#allocation4_spill] sm:$0xff] %v7340_v23 }
 0x19e   : > { %v5472_v46 = vpop.f32.mrf.mxu0 }
 0x19f   : > { %v7342_v56 = vadd.f32 %v5472_v46, %v1382_v1 }
 0x1a0   : > { %v7348_v8 = vpop.f32.mrf.mxu0 }
 0x1a2   : > { %v7351_v53 = vpop.f32.mrf.mxu0 }
 0x1a4   : > { %v7355_v39 = vpop.f32.mrf.mxu0 }
 0x1a6   : > { %v5428_v48 = vpop.f32.mrf.mxu1 }
 0x1a7   : > { %v1398_v7 = vadd.f32 %v5428_v48, %v7238_v36 }
 0x1a8   : > { %v1389_v54 = vpop.f32.mrf.mxu1 }
 0x1a9   : > { %v1390_v49 = vadd.f32 %v1389_v54, %v7243_v26 }
 0x1aa   : > { %v5429_v62 = vpop.f32.mrf.mxu1 }
 0x1ab   : > { %v1401_v22 = vadd.f32 %v5429_v62, %v7247_v25 }
 0x1ac   : > { %v7363_v36 = vpop.f32.mrf.mxu1 }
 0x1ae   : > { %v5476_v59 = vpop.f32.mrf.mxu0 }
 0x1af   : > { %v7357_v13 = vadd.f32 %v5476_v59, %v1398_v7 }
 0x1b0   : > { %v1731_v35 = vpop.f32.mrf.mxu0 }
 0x1b1   : > { %v7359_v45 = vadd.f32 %v1731_v35, %v1390_v49 }
 0x1b2   : > { %v5477_v24 = vpop.f32.mrf.mxu0 }
 0x1b3   : > { %v7361_v34 = vadd.f32 %v5477_v24, %v1401_v22 }
 0x1b4   : > { %v7365_v16 = vpop.f32.mrf.mxu0 }
 0x1b6   : > { %v5432_v50 = vpop.f32.mrf.mxu1 }
 0x1b7   : > { %v1414_v26 = vadd.f32 %v5432_v50, %v7256_v9 }
 0x1b8   : > { %v1405_v6 = vpop.f32.mrf.mxu1 }
 0x1b9   : > { %v1406_v18 = vadd.f32 %v1405_v6, %v7261_v42 }
 0x1ba   : > { %v5433_v25 = vpop.f32.mrf.mxu1 }
 0x1bb   : > { %v1417_v1 = vadd.f32 %v5433_v25, %v7265_v32 }
 0x1bc   : > { %v7376_v54 = vpop.f32.mrf.mxu1 }
 0x1be   : > { %v5480_v14 = vpop.f32.mrf.mxu0 }
 0x1bf   : > { %v7369_v12 = vadd.f32 %v5480_v14, %v1414_v26 }
 0x1c0   : > { %v1747_v37 = vpop.f32.mrf.mxu0 }
 0x1c1   : > { %v7372_v46 = vadd.f32 %v1747_v37, %v1406_v18 }
 0x1c2   : > { %v5481_v48 = vpop.f32.mrf.mxu0 }
 0x1c3   : > { %v7374_v7 = vadd.f32 %v5481_v48, %v1417_v1 }
 0x1c4   : > { %v7378_v22 = vpop.f32.mrf.mxu0 }
 0x1c6   : > { %v5436_v49 = vpop.f32.mrf.mxu1 }
 0x1c7   : > { %v1430_v9 = vadd.f32 %v5436_v49, %v7274_v61 }
 0x1c8   : > { %v1421_v62 = vpop.f32.mrf.mxu1 }
 0x1c9   : > { %v1422_v35 = vadd.f32 %v1421_v62, %v7281_v10 }
 0x1ca   : > { %v5437_v59 = vpop.f32.mrf.mxu1 }
 0x1cb   : > { %v1433_v50 = vadd.f32 %v5437_v59, %v7285_v33 }
 0x1cc   : > { %v7389_v14 = vpop.f32.mrf.mxu1 }
 0x1ce   : > { %v5484_v42 = vpop.f32.mrf.mxu0 }
 0x1cf   : > { %v7382_v24 = vadd.f32 %v5484_v42, %v1430_v9 }
 0x1d0   : > { %v1763_v32 = vpop.f32.mrf.mxu0 }
 0x1d1   : > { %v7385_v6 = vadd.f32 %v1763_v32, %v1422_v35 }
 0x1d2   : > { %v5485_v26 = vpop.f32.mrf.mxu0 }
 0x1d3   : > { %v7387_v25 = vadd.f32 %v5485_v26, %v1433_v50 }
 0x1d4   : > { %v7393_v61 = vpop.f32.mrf.mxu0 }
 0x1d6   : > { %v5440_v18 = vpop.f32.mrf.mxu1 }
 0x1d7   : > { %v1446_v1 = vadd.f32 %v5440_v18, %v7294_v17 }
 0x1d8   : > { %v7391_v37 = vpop.f32.mrf.mxu1 }
 0x1da   : > { %v5441_v10 = vpop.f32.mrf.mxu1 }
 0x1db   : > { %v1449_v33 = vadd.f32 %v5441_v10, %v7302_v63 }
 0x1dc   : > { %v7403_v42 = vpop.f32.mrf.mxu1 }
 0x1de   : > { %v5488_v48 = vpop.f32.mrf.mxu0 }
 0x1df   : > { %v7396_v49 = vadd.f32 %v5488_v48, %v1446_v1 }
 0x1e0   : > { %v7398_v62 = vpop.f32.mrf.mxu0 }
 0x1e2   : > { %v5489_v9 = vpop.f32.mrf.mxu0 }
 0x1e3   : > { %v7401_v59 = vadd.f32 %v5489_v9, %v1449_v33 }
 0x1e4   : > { %v7405_v50 = vpop.f32.mrf.mxu0 }
 0x1e5   : > { %9957 = vst [vmem:[#allocation9_spill] sm:$0xff] %v7401_v59 }
 0x1e6   : > { %v5444_v35 = vpop.f32.mrf.mxu1 }
 0x1e7   : > { %v1462_v26 = vadd.f32 %v5444_v35, %v7311_v41 }
 0x1e8   : > { %v1453_v32 = vpop.f32.mrf.mxu1 }
 0x1e9   : > { %v1454_v1 = vadd.f32 %v1453_v32, %v7315_v47 }
 0x1ea   : > { %v5445_v17 = vpop.f32.mrf.mxu1 }
 0x1eb   : > { %v1465_v63 = vadd.f32 %v5445_v17, %v7317_v20 }
 0x1ec   : > { %v7416_v0 = vpop.f32.mrf.mxu1 }
 0x1ee   : > { %v5492_v18 = vpop.f32.mrf.mxu0 }
 0x1ef   : > { %v7409_v48 = vadd.f32 %v5492_v18, %v1462_v26 }
 0x1f0   : > { %v1795_v40 = vpop.f32.mrf.mxu0 }
 0x1f1   : > { %v7412_v10 = vadd.f32 %v1795_v40, %v1454_v1 }
 0x1f2   : > { %v5493_v33 = vpop.f32.mrf.mxu0 }
 0x1f3   : > { %v7414_v9 = vadd.f32 %v5493_v33, %v1465_v63 }
 0x1f4   : > { %v7418_v59 = vpop.f32.mrf.mxu0 }
 0x1f5   : > { %9958 = vst [vmem:[#allocation6_spill] sm:$0xff] %v7414_v9 }
 0x1f6   : > { %v5448_v11 = vpop.f32.mrf.mxu1 }
 0x1f7   : > { %v1478_v41 = vadd.f32 %v5448_v11, %v7322_v52  ;;  %v5943_v11 = vld [vmem:[%s9680_s2 + $0x38] sm:$0xff]  }
 0x1f8   : > { %v1469_v23 = vpop.f32.mrf.mxu1  ;;  %5646 = vmatprep.subr.bf16.mxu0 %v5943_v11 }
 0x1f9   : > { %v1470_v32 = vadd.f32 %v1469_v23, %v7325_v44  ;;  %5647 = vmatpush3.bf16.msra.mxu0 %v5943_v11 }
 0x1fa   : > { %v5449_v35 = vpop.f32.mrf.mxu1 }
 0x1fb   : > { %v1481_v40 = vadd.f32 %v5449_v35, %v7327_v3 }
 0x1fc   : > { %v7429_v63 = vpop.f32.mrf.mxu1 }
 0x1fe   : > { %v5496_v47 = vpop.f32.mrf.mxu0 }
 0x1ff   : > { %v7422_v26 = vadd.f32 %v5496_v47, %v1478_v41  ;;  %v5944_v41 = vld [vmem:[%s9680_s2 + $0x30] sm:$0xff]  }
 0x200   : > { %v1811_v20 = vpop.f32.mrf.mxu0  ;;  %5648 = vmatprep.subr.bf16.mxu0 %v5944_v41 }
 0x201   : > { %v7425_v17 = vadd.f32 %v1811_v20, %v1470_v32  ;;  %5649 = vmatpush3.bf16.msra.mxu0 %v5944_v41 }
 0x202   : > { %v5497_v18 = vpop.f32.mrf.mxu0 }
 0x203   : > { %9959 = vst [vmem:[#allocation12_spill] sm:$0xff] %v7425_v17  ;;  %v7427_v1 = vadd.f32 %v5497_v18, %v1481_v40  ;;  %v1374_v17 = vadd.f32 %v7338_v58, %v7225_v4  ;;  %v7467_v58 = vld [vmem:[%s9683_s5] ss:$0 sm:$0xff] }
 0x204   : > { %v7434_v44 = vpop.f32.mrf.mxu0 }
 0x205   : > { %9960 = vst [vmem:[#allocation15_spill] sm:$0xff] %v7427_v1 }
 0x206   : > { %v5452_v33 = vpop.f32.mrf.mxu1 }
 0x207   : > { %v1494_v3 = vadd.f32 %v5452_v33, %v7332_v60  ;;  %v5945_v60 = vld [vmem:[%s9680_s2 + $0x28] sm:$0xff]  }
 0x208   : > { %v1485_v9 = vpop.f32.mrf.mxu1  ;;  %5650 = vmatprep.subr.bf16.mxu0 %v5945_v60 }
 0x209   : > { %v1486_v32 = vadd.f32 %v1485_v9, %v7334_v38  ;;  %5651 = vmatpush3.bf16.msra.mxu0 %v5945_v60 }
 0x20a   : > { %v5453_v52 = vpop.f32.mrf.mxu1 }
 0x20b   : > { %v1497_v1 = vadd.f32 %v5453_v52, %v7336_v5  ;;  %v1385_v5 = vadd.f32 %v7344_v19, %v7229_v15  ;;  %v1842_v52 = vadd.f32 %v7348_v8, %v1374_v17  ;;  %v1377_v15 = vadd.f32 %v7346_v21, %v7233_v51 }
 0x20c   : > { %v7436_v23 = vpop.f32.mrf.mxu1  ;;  %v1393_v8 = vadd.f32 %v7363_v36, %v7251_v29  ;;  %v1409_v29 = vadd.f32 %v7376_v54, %v7269_v43  ;;  %v7500_v54 = vld [vmem:[%s9685_s7] ss:$0 sm:$0xff] }
 0x20d   : > { %9961 = vst [vmem:[#allocation5_spill] sm:$0xff] %v7436_v23  ;;  %v1843_v51 = vadd.f32 %v7355_v39, %v1377_v15 }
 0x20e   : > { %v5500_v35 = vpop.f32.mrf.mxu0  ;;  %v5520_v47 = vpop.f32.mrf.mxu1 }
 0x20f   : > { %v7443_v20 = vadd.f32 %v5500_v35, %v1494_v3  ;;  %v2108_v41 = vadd.f32 %v5520_v47, %v7342_v56  ;;  %v5946_v35 = vld [vmem:[%s9680_s2 + $0x20] sm:$0xff]  }
 0x210   : > { %v1827_v40 = vpop.f32.mrf.mxu0  ;;  %v1979_v18 = vpop.f32.mrf.mxu1  ;;  %5652 = vmatprep.subr.bf16.mxu0 %v5946_v35 }
 0x211   : > { %v7446_v23 = vadd.f32 %v1827_v40, %v1486_v32  ;;  %v2106_v40 = vadd.f32 %v1979_v18, %v1842_v52  ;;  %5653 = vmatpush3.bf16.msra.mxu0 %v5946_v35  ;;  %v5947_v18 = vld [vmem:[%s9680_s2 + $0x18] sm:$0xff]   ;;  %v1847_v52 = vadd.f32 %v7365_v16, %v1393_v8  ;;  %v1438_v35 = vadd.f32 %v7391_v37, %v7298_v55 }
 0x212   : > { %v5501_v33 = vpop.f32.mrf.mxu0  ;;  %v5521_v11 = vpop.f32.mrf.mxu1  ;;  %5654 = vmatprep.subr.bf16.mxu0 %v5947_v18  ;;  %v7494_v16 = vadd.f32 %v7378_v22, %v1409_v29  ;;  %v1441_v22 = vadd.f32 %v7403_v42, %v7306_v27  ;;  %v5949_v42 = vld [vmem:[%s9680_s2 + $0x8] sm:$0xff]  }
 0x213   : > { %v7453_v38 = vadd.f32 %v5501_v33, %v1497_v1  ;;  %v1845_v1 = vadd.f32 %v7351_v53, %v1385_v5  ;;  %v7478_v33 = vld [vmem:[%s9684_s6] ss:$0 sm:$0xff] }
 0x214   : > { %v7455_v9 = vpop.f32.mrf.mxu0  ;;  %v1982_v3 = vpop.f32.mrf.mxu1 }
 0x215   : > { %v2109_v17 = vadd.f32 %v5521_v11, %v1845_v1  ;;  %5655 = vmatpush3.bf16.msra.mxu0 %v5947_v18 }
 0x216   : > { %v5524_v32 = vpop.f32.mrf.mxu1  ;;  %v5568_v4 = vpop.f32.mrf.mxu0 }
 0x217   : > { %v2381_v60 = vadd.f32 %v5568_v4, %v2108_v41  ;;  %v1425_v41 = vadd.f32 %v7389_v14, %v7289_v30  ;;  %v2107_v4 = vadd.f32 %v1982_v3, %v1843_v51  ;;  %v2112_v43 = vadd.f32 %v5524_v32, %v7357_v13  ;;  %v5948_v14 = vld [vmem:[%s9680_s2 + $0x10] sm:$0xff]  }
 0x218   : > { %v1995_v56 = vpop.f32.mrf.mxu1  ;;  %v2252_v19 = vpop.f32.mrf.mxu0  ;;  %v7513_v13 = vadd.f32 %v7398_v62, %v1438_v35  ;;  %5656 = vmatprep.subr.bf16.mxu0 %v5948_v14 }
 0x219   : > { %v2420_v47 = vmul.f32 %v7467_v58, %v2381_v60  ;;  %v2379_v53 = vadd.f32 %v2252_v19, %v2106_v40  ;;  %v7508_v37 = vadd.f32 %v7393_v61, %v1425_v41  ;;  %v2110_v15 = vadd.f32 %v1995_v56, %v7359_v45  ;;  %5657 = vmatpush3.bf16.msra.mxu0 %v5948_v14 }
 0x21a   : > { %v5525_v21 = vpop.f32.mrf.mxu1  ;;  %v5569_v5 = vpop.f32.mrf.mxu0  ;;  %v7527_v56 = vadd.f32 %v7405_v50, %v1441_v22  ;;  %v1473_v50 = vadd.f32 %v7429_v63, %v7329_v28  ;;  %5658 = vmatprep.subr.bf16.mxu0 %v5949_v42  ;;  %v5950_v28 = vld [vmem:[%s9680_s2] sm:$0xff]  }
 0x21b   : > { %v2418_v36 = vmul.f32 %v7467_v58, %v2379_v53  ;;  %v2382_v11 = vadd.f32 %v5569_v5, %v2109_v17  ;;  %v2459_v39 = vadd.f32 %v7478_v33, %v2420_v47  ;;  %v2113_v19 = vadd.f32 %v5525_v21, %v7361_v34 }
 0x21c   : > { %v1998_v1 = vpop.f32.mrf.mxu1  ;;  %v2255_v40 = vpop.f32.mrf.mxu0  ;;  %v7554_v63 = vadd.f32 %v7434_v44, %v1473_v50 }
 0x21d   : > { %v2457_v30 = vadd.f32 %v7478_v33, %v2418_v36  ;;  %v2421_v55 = vmul.f32 %v7467_v58, %v2382_v11  ;;  %v2380_v3 = vadd.f32 %v2255_v40, %v2107_v4  ;;  %v2530_v61 = vmul.f32 %v7500_v54, %v2459_v39  ;;  %5659 = vmatpush3.bf16.msra.mxu0 %v5949_v42 }
 0x21e   : > { %v5528_v32 = vpop.f32.mrf.mxu1  ;;  %v5572_v60 = vpop.f32.mrf.mxu0  ;;  %vm2491_vm7 = vcmp.ge.f32.partialorder %v2459_v39, 0.0  ;;  %v1457_v36 = vadd.f32 %v7416_v0, %v7319_v31  ;;  %v2111_v40 = vadd.f32 %v1998_v1, %v1847_v52  ;;  %5660 = vmatprep.subr.bf16.mxu0 %v5950_v28 }
 0x21f   : > { %v2460_v8 = vadd.f32 %v7478_v33, %v2421_v55  ;;  %v2385_v17 = vadd.f32 %v5572_v60, %v2112_v43  ;;  %v2419_v47 = vmul.f32 %v7467_v58, %v2380_v3  ;;  %vm2489_vm6 = vcmp.ge.f32.partialorder %v2457_v30, 0.0 }
 0x220   : > { %v2011_v53 = vpop.f32.mrf.mxu1  ;;  %v2268_v27 = vpop.f32.mrf.mxu0  ;;  %v2528_v62 = vmul.f32 %v7500_v54, %v2457_v30  ;;  %v7542_v4 = vsel %vm2491_vm7, %v2459_v39, %v2530_v61  ;;  %v7546_v0 = vadd.f32 %v7418_v59, %v1457_v36  ;;  %v2116_v31 = vadd.f32 %v5528_v32, %v7369_v12 }
 0x221   : > { %vm2492_vm8 = vcmp.ge.f32.partialorder %v2460_v8, 0.0  ;;  %v2531_v45 = vmul.f32 %v7500_v54, %v2460_v8  ;;  %v2424_v34 = vmul.f32 %v7467_v58, %v2385_v17  ;;  %v2458_v18 = vadd.f32 %v7478_v33, %v2419_v47  ;;  %9963 = vst [vmem:[#allocation8_spill] sm:$0xff] %v7542_v4  ;;  %5661 = vmatpush3.bf16.msra.mxu0 %v5950_v28 }
 0x222   : > { %v2383_v51 = vadd.f32 %v2268_v27, %v2110_v15  ;;  %v5529_v21 = vpop.f32.mrf.mxu1  ;;  %v5573_v5 = vpop.f32.mrf.mxu0  ;;  %v7530_v29 = vsel %vm2489_vm6, %v2457_v30, %v2528_v62  ;;  %v2114_v3 = vadd.f32 %v2011_v53, %v7372_v46  ;;  %v2594_v60 = vrot.slane %v7542_v4, 7  ;;  %v5951_v27 = vld [vmem:[%s9680_s2 + $0x78] sm:$0xff]  }
 0x223   : > { %v7534_v11 = vsel %vm2492_vm8, %v2460_v8, %v2531_v45  ;;  %v2463_v41 = vadd.f32 %v7478_v33, %v2424_v34  ;;  %v2386_v35 = vadd.f32 %v5573_v5, %v2113_v19  ;;  %2683 = vrot.lane.b32.xlu1 %v7530_v29, %s6027_s28  ;;  %vm2490_vm9 = vcmp.ge.f32.partialorder %v2458_v18, 0.0  ;;  %5598 = vmatprep.subr.bf16.mxu1 %v5951_v27 }
 0x224   : > { %9962 = vst [vmem:[#allocation7_spill] sm:$0xff] %v7534_v11  ;;  %v2422_v43 = vmul.f32 %v7467_v58, %v2383_v51  ;;  %v2014_v30 = vpop.f32.mrf.mxu1  ;;  %v2271_v55 = vpop.f32.mrf.mxu0  ;;  %v2529_v22 = vmul.f32 %v7500_v54, %v2458_v18  ;;  %v2595_v59 = vrot.slane %v7534_v11, 7  ;;  %v2806_v53 = vrot.slane %v7542_v4, 1  ;;  %5599 = vmatpush3.bf16.msra.mxu1 %v5951_v27 }
 0x225   : > { %v2425_v14 = vmul.f32 %v7467_v58, %v2386_v35  ;;  %v2384_v52 = vadd.f32 %v2271_v55, %v2111_v40  ;;  %v2534_v12 = vmul.f32 %v7500_v54, %v2463_v41  ;;  %vm2495_vm10 = vcmp.ge.f32.partialorder %v2463_v41, 0.0 }
 0x226   : > { %v5532_v39 = vpop.f32.mrf.mxu1  ;;  %v5576_v1 = vpop.f32.mrf.mxu0  ;;  %v2461_v15 = vadd.f32 %v7478_v33, %v2422_v43  ;;  %v7564_v19 = vsel %vm2490_vm9, %v2458_v18, %v2529_v22  ;;  %v2117_v62 = vadd.f32 %v5529_v21, %v7374_v7  ;;  %v9751_v45 = vrot.slane %v7530_v29, 1 }
 0x227   : > { %v2389_v32 = vadd.f32 %v5576_v1, %v2116_v31  ;;  %v2423_v44 = vmul.f32 %v7467_v58, %v2384_v52  ;;  %v2464_v61 = vadd.f32 %v7478_v33, %v2425_v14  ;;  %2685 = vrot.lane.b32.xlu0 %v7564_v19, %s6027_s28  ;;  %v9753_v46 = vrot.slane %v7564_v19, 7 }
 0x228   : > { %v2027_v8 = vpop.f32.mrf.mxu1  ;;  %v2284_v17 = vpop.f32.mrf.mxu0  ;;  %v2115_v34 = vadd.f32 %v2014_v30, %v7494_v16  ;;  %v7582_v42 = vsel %vm667_vm0, %v2594_v60, %v2595_v59  ;;  %v7585_v5 = vsel %vm2495_vm10, %v2463_v41, %v2534_v12  ;;  %vm2493_vm11 = vcmp.ge.f32.partialorder %v2461_v15, 0.0 }
 0x229   : > { %v2428_v47 = vmul.f32 %v7467_v58, %v2389_v32  ;;  %9964 = vst [vmem:[#allocation10_spill] sm:$0xff] %v7582_v42  ;;  %9965 = vst [vmem:[#allocation16_spill] sm:$0xff] %v7585_v5  ;;  %v2462_v36 = vadd.f32 %v7478_v33, %v2423_v44  ;;  %2906 = vrot.lane.b32.xlu1 %v7582_v42, %s6027_s28  ;;  %v2387_v7 = vadd.f32 %v2284_v17, %v2114_v3 }
 0x22a   : > { %v5533_v18 = vpop.f32.mrf.mxu1  ;;  %v5577_v51 = vpop.f32.mrf.mxu0  ;;  %v2532_v16 = vmul.f32 %v7500_v54, %v2461_v15  ;;  %v2120_v21 = vadd.f32 %v5532_v39, %v7382_v24  ;;  %v2535_v41 = vmul.f32 %v7500_v54, %v2464_v61  ;;  %v2805_v30 = vrot.slane %v7564_v19, 1 }
 0x22b   : > { %v2467_v35 = vadd.f32 %v7478_v33, %v2428_v47  ;;  %v2390_v50 = vadd.f32 %v5577_v51, %v2117_v62  ;;  %v2426_v55 = vmul.f32 %v7467_v58, %v2387_v7  ;;  %v2650_v31 = vsel %vm667_vm0, %v9753_v46, %v2594_v60  ;;  %v5952_v51 = vld [vmem:[%s9680_s2 + $0x70] sm:$0xff]  }
 0x22c   : > { %v2030_v40 = vpop.f32.mrf.mxu1  ;;  %v2287_v43 = vpop.f32.mrf.mxu0  ;;  %vm2496_vm12 = vcmp.ge.f32.partialorder %v2464_v61, 0.0  ;;  %v7603_v24 = vsel %vm698_vm1, %v2650_v31, 0.0  ;;  %v9752_v28 = vrot.slane %v7534_v11, 1  ;;  %v2533_v1 = vmul.f32 %v7500_v54, %v2462_v36  ;;  %5600 = vmatprep.subr.bf16.mxu1 %v5952_v51 }
 0x22d   : > { %v2429_v14 = vmul.f32 %v7467_v58, %v2390_v50  ;;  %9966 = vst [vmem:[#allocation17_spill] sm:$0xff] %v7603_v24  ;;  %v2538_v22 = vmul.f32 %v7500_v54, %v2467_v35  ;;  %v2465_v12 = vadd.f32 %v7478_v33, %v2426_v55  ;;  %2904 = vrot.lane.b32.xlu0 %v7603_v24, %s6027_s28  ;;  %vm2494_vm13 = vcmp.ge.f32.partialorder %v2462_v36, 0.0 }
 0x22e   : > { %v5536_v52 = vpop.f32.mrf.mxu1  ;;  %v5580_v39 = vpop.f32.mrf.mxu0  ;;  %v2388_v3 = vadd.f32 %v2287_v43, %v2115_v34  ;;  %vm2499_vm14 = vcmp.ge.f32.partialorder %v2467_v35, 0.0  ;;  %v7615_v32 = vsel %vm886_vm2, %v2806_v53, %v9752_v28  ;;  %v7618_v47 = vsel %vm2493_vm11, %v2461_v15, %v2532_v16  ;;  %5601 = vmatpush3.bf16.msra.mxu1 %v5952_v51 }
 0x22f   : > { %v2393_v60 = vadd.f32 %v5580_v39, %v2120_v21  ;;  %9967 = vst [vmem:[#allocation18_spill] sm:$0xff] %v7618_v47  ;;  %v7621_v27 = vsel %vm2496_vm12, %v2464_v61, %v2535_v41  ;;  %3455 = vrot.lane.b32.xlu1 %v7615_v32, %s6027_s28  ;;  %v2863_v34 = vsel %vm886_vm2, %v2805_v30, %v2806_v53  ;;  %vm2497_vm15 = vcmp.ge.f32.partialorder %v2465_v12, 0.0 }
 0x230   : > { %v2043_v44 = vpop.f32.mrf.mxu1  ;;  %v2300_v17 = vpop.f32.mrf.mxu0  ;;  %9968 = vst [vmem:[#allocation19_spill] sm:$0xff] %v7621_v27  ;;  %v2427_v62 = vmul.f32 %v7467_v58, %v2388_v3  ;;  %v2118_v7 = vadd.f32 %v2027_v8, %v7385_v6  ;;  %v2121_v15 = vadd.f32 %v5533_v18, %v7387_v25  ;;  %v2468_v16 = vadd.f32 %v7478_v33, %v2429_v14 }
 0x231   : > { %v7636_v61 = vsel %vm918_vm3, %v2863_v34, 0.0  ;;  %v7639_v43 = vsel %vm2494_vm13, %v2462_v36, %v2533_v1  ;;  %v7642_v53 = vsel %vm2499_vm14, %v2467_v35, %v2538_v22  ;;  %v2536_v41 = vmul.f32 %v7500_v54, %v2465_v12 }
 0x232   : > { %v5537_v21 = vpop.f32.mrf.mxu1  ;;  %v5581_v50 = vpop.f32.mrf.mxu0  ;;  %9969 = vst [vmem:[#allocation11_spill] sm:$0xff] %v7639_v43  ;;  %9970 = vst [vmem:[#allocation13_spill] sm:$0xff] %v7642_v53  ;;  %v2432_v6 = vmul.f32 %v7467_v58, %v2393_v60  ;;  %3453 = vrot.lane.b32.xlu0 %v7636_v61, %s6027_s28  ;;  %v2466_v25 = vadd.f32 %v7478_v33, %v2427_v62  ;;  %v7653_v8 = vsel %vm886_vm2, %v9751_v45, %v2805_v30 }
 0x233   : > { %v2391_v18 = vadd.f32 %v2300_v17, %v2118_v7  ;;  %v2119_v55 = vadd.f32 %v2030_v40, %v7508_v37  ;;  %v2124_v31 = vadd.f32 %v5536_v52, %v7396_v49  ;;  %3451 = vrot.lane.b32.xlu1 %v7653_v8, %s6027_s28  ;;  %v2394_v14 = vadd.f32 %v5581_v50, %v2121_v15 }
 0x234   : > { %v2046_v36 = vpop.f32.mrf.mxu1  ;;  %v2303_v35 = vpop.f32.mrf.mxu0  ;;  %vm2500_vm4 = vcmp.ge.f32.partialorder %v2468_v16, 0.0  ;;  %v2539_v39 = vmul.f32 %v7500_v54, %v2468_v16  ;;  %v2598_v1 = vrot.slane %v7585_v5, 7  ;;  %v2599_v30 = vrot.slane %v7621_v27, 7  ;;  %v10061_v57 = vld [vmem:[#allocation17_spill] sm:$0xff] }
 0x235   : > { %v7663_v60 = vsel %vm2497_vm15, %v2465_v12, %v2536_v41  ;;  %v2471_v37 = vadd.f32 %v7478_v33, %v2432_v6  ;;  %v2433_v49 = vmul.f32 %v7467_v58, %v2394_v14  ;;  %v2596_v40 = vrot.slane %v7618_v47, 7  ;;  %v5953_v41 = vld [vmem:[%s9680_s2 + $0x68] sm:$0xff]  }
 0x236   : > { %v5540_v22 = vpop.f32.mrf.mxu1  ;;  %v5584_v3 = vpop.f32.mrf.mxu0  ;;  %9971 = vst [vmem:[#allocation14_spill] sm:$0xff] %v7663_v60  ;;  %v2537_v52 = vmul.f32 %v7500_v54, %v2466_v25  ;;  %v2430_v17 = vmul.f32 %v7467_v58, %v2391_v18  ;;  %v7674_v62 = vsel %vm667_vm0, %v2598_v1, %v2599_v30  ;;  %v2392_v34 = vadd.f32 %v2303_v35, %v2119_v55 }
 0x237   : > { %9972 = vst [vmem:[#allocation20_spill] sm:$0xff] %v7674_v62  ;;  %vm2498_vm6 = vcmp.ge.f32.partialorder %v2466_v25, 0.0  ;;  %v2472_v7 = vadd.f32 %v7478_v33, %v2433_v49  ;;  %2914 = vrot.lane.b32.xlu0 %v7674_v62, %s6027_s28  ;;  %v2648_v15 = vsel %vm667_vm0, %v2595_v59, %v2596_v40  ;;  %v2397_v50 = vadd.f32 %v5584_v3, %v2124_v31  ;;  %v9975_v31 = vld [vmem:[#allocation9_spill] sm:$0xff] }
 0x238   : > { %v2059_v51 = vpop.f32.mrf.mxu1  ;;  %v2316_v12 = vpop.f32.mrf.mxu0  ;;  %v7687_v6 = vsel %vm2500_vm4, %v2468_v16, %v2539_v39  ;;  %v2122_v18 = vadd.f32 %v2043_v44, %v7513_v13  ;;  %v7692_v35 = vsel %vm698_vm1, %v2648_v15, 0.0  ;;  %v2431_v55 = vmul.f32 %v7467_v58, %v2392_v34  ;;  %5602 = vmatprep.subr.bf16.mxu1 %v5953_v41 }
 0x239   : > { %9973 = vst [vmem:[#allocation21_spill] sm:$0xff] %v7687_v6  ;;  %9974 = vst [vmem:[#allocation22_spill] sm:$0xff] %v7692_v35  ;;  %v2542_v59 = vmul.f32 %v7500_v54, %v2471_v37  ;;  %v2125_v3 = vadd.f32 %v5537_v21, %v9975_v31  ;;  %2908 = vrot.lane.b32.xlu1 %v7692_v35, %s6027_s28  ;;  %v2436_v16 = vmul.f32 %v7467_v58, %v2397_v50 }
 0x23a   : > { %v5541_v14 = vpop.f32.mrf.mxu1  ;;  %v5585_v49 = vpop.f32.mrf.mxu0  ;;  %v2597_v39 = vrot.slane %v7639_v43, 7  ;;  %v7702_v13 = vsel %vm2498_vm6, %v2466_v25, %v2537_v52  ;;  %vm2503_vm7 = vcmp.ge.f32.partialorder %v2471_v37, 0.0  ;;  %v2469_v44 = vadd.f32 %v7478_v33, %v2430_v17  ;;  %5603 = vmatpush3.bf16.msra.mxu1 %v5953_v41 }
 0x23b   : > { %9976 = vst [vmem:[#allocation23_spill] sm:$0xff] %v7702_v13  ;;  %v2395_v34 = vadd.f32 %v2316_v12, %v2122_v18  ;;  %v2543_v21 = vmul.f32 %v7500_v54, %v2472_v7  ;;  %v2123_v31 = vadd.f32 %v2046_v36, %v7527_v56  ;;  %vm2504_vm8 = vcmp.ge.f32.partialorder %v2472_v7, 0.0 }
 0x23c   : > { %v7705_v15 = vpop.f32.mrf.mxu1  ;;  %v2319_v45 = vpop.f32.mrf.mxu0  ;;  %v7711_v50 = vsel %vm667_vm0, %v2596_v40, %v2597_v39  ;;  %v2646_v25 = vsel %vm667_vm0, %v2597_v39, %v2598_v1  ;;  %v2470_v52 = vadd.f32 %v7478_v33, %v2431_v55  ;;  %v7726_v40 = vsel %vm2503_vm7, %v2471_v37, %v2542_v59 }
 0x23d   : > { %9977 = vst [vmem:[#allocation24_spill] sm:$0xff] %v7711_v50  ;;  %2910 = vrot.lane.b32.xlu0 %v7711_v50, %s6027_s28  ;;  %v7720_v17 = vsel %vm698_vm1, %v2646_v25, 0.0  ;;  %v2434_v12 = vmul.f32 %v7467_v58, %v2395_v34  ;;  %9979 = vst [vmem:[#allocation26_spill] sm:$0xff] %v7726_v40  ;;  %v2128_v1 = vadd.f32 %v5540_v22, %v7409_v48  ;;  %vm2501_vm9 = vcmp.ge.f32.partialorder %v2469_v44, 0.0 }
 0x23e   : > { %9978 = vst [vmem:[#allocation25_spill] sm:$0xff] %v7720_v17  ;;  %v7723_v56 = vpop.f32.mrf.mxu1  ;;  %v5588_v36 = vpop.f32.mrf.mxu0  ;;  %v2475_v41 = vadd.f32 %v7478_v33, %v2436_v16  ;;  %2912 = vrot.lane.b32.xlu1 %v7720_v17, %s6027_s28  ;;  %v2398_v18 = vadd.f32 %v5585_v49, %v2125_v3  ;;  %v2540_v55 = vmul.f32 %v7500_v54, %v2469_v44  ;;  %v2602_v39 = vrot.slane %v7642_v53, 7  ;;  %v5954_v49 = vld [vmem:[%s9680_s2 + $0x60] sm:$0xff]  }
 0x23f   : > { %v9754_v34 = vrot.slane %v7687_v6, 7  ;;  %v7736_v37 = vsel %vm2504_vm8, %v2472_v7, %v2543_v21  ;;  %v2126_v48 = vadd.f32 %v2059_v51, %v7412_v10  ;;  %v2473_v22 = vadd.f32 %v7478_v33, %v2434_v12  ;;  %5604 = vmatprep.subr.bf16.mxu1 %v5954_v49 }
 0x240   : > { %v2075_v25 = vpop.f32.mrf.mxu1  ;;  %v2332_v28 = vpop.f32.mrf.mxu0  ;;  %9980 = vst [vmem:[#allocation27_spill] sm:$0xff] %v7736_v37  ;;  %v2600_v59 = vrot.slane %v7663_v60, 7  ;;  %vm2502_vm10 = vcmp.ge.f32.partialorder %v2470_v52, 0.0  ;;  %v2437_v3 = vmul.f32 %v7467_v58, %v2398_v18  ;;  %v2396_v7 = vadd.f32 %v2319_v45, %v2123_v31  ;;  %5605 = vmatpush3.bf16.msra.mxu1 %v5954_v49 }
 0x241   : > { %v7749_v16 = vsel %vm667_vm0, %v2602_v39, %v9754_v34  ;;  %v2541_v10 = vmul.f32 %v7500_v54, %v2470_v52  ;;  %v2546_v51 = vmul.f32 %v7500_v54, %v2475_v41  ;;  %v2401_v18 = vadd.f32 %v5588_v36, %v2128_v1  ;;  %v9982_v34 = vld [vmem:[#allocation6_spill] sm:$0xff] }
 0x242   : > { %9981 = vst [vmem:[#allocation29_spill] sm:$0xff] %v7749_v16  ;;  %v5589_v21 = vpop.f32.mrf.mxu0  ;;  %2922 = vrot.lane.b32.xlu0 %v7749_v16, %s6027_s28  ;;  %v2644_v12 = vsel %vm667_vm0, %v2599_v30, %v2600_v59  ;;  %v7759_v46 = vpop.f32.mrf.mxu1  ;;  %vm2507_vm11 = vcmp.ge.f32.partialorder %v2475_v41, 0.0  ;;  %v2129_v62 = vadd.f32 %v5541_v14, %v9982_v34  ;;  %v2601_v31 = vrot.slane %v7702_v13, 7 }
 0x243   : > { %v7764_v45 = vsel %vm698_vm1, %v2644_v12, 0.0  ;;  %v2544_v16 = vmul.f32 %v7500_v54, %v2473_v22  ;;  %v2435_v30 = vmul.f32 %v7467_v58, %v2396_v7  ;;  %v2440_v36 = vmul.f32 %v7467_v58, %v2401_v18 }
 0x244   : > { %9983 = vst [vmem:[#allocation28_spill] sm:$0xff] %v7764_v45  ;;  %v2335_v17 = vpop.f32.mrf.mxu0  ;;  %2916 = vrot.lane.b32.xlu1 %v7764_v45, %s6027_s28  ;;  %v2476_v14 = vadd.f32 %v7478_v33, %v2437_v3  ;;  %v7775_v1 = vsel %vm667_vm0, %v2600_v59, %v2601_v31  ;;  %v2642_v34 = vsel %vm667_vm0, %v2601_v31, %v2602_v39  ;;  %vm2505_vm12 = vcmp.ge.f32.partialorder %v2473_v22, 0.0  ;;  %v2078_v59 = vpop.f32.mrf.mxu1 }
 0x245   : > { %9984 = vst [vmem:[#allocation30_spill] sm:$0xff] %v7775_v1  ;;  %v2399_v12 = vadd.f32 %v2332_v28, %v2126_v48  ;;  %v7780_v35 = vsel %vm2501_vm9, %v2469_v44, %v2540_v55  ;;  %v7783_v45 = vsel %vm2502_vm10, %v2470_v52, %v2541_v10  ;;  %v7786_v7 = vsel %vm2507_vm11, %v2475_v41, %v2546_v51 }
 0x246   : > { %v5592_v50 = vpop.f32.mrf.mxu0  ;;  %9985 = vst [vmem:[#allocation31_spill] sm:$0xff] %v7780_v35  ;;  %9986 = vst [vmem:[#allocation32_spill] sm:$0xff] %v7783_v45  ;;  %2918 = vrot.lane.b32.xlu0 %v7775_v1, %s6027_s28  ;;  %v2127_v49 = vadd.f32 %v7705_v15, %v7546_v0  ;;  %v7794_v28 = vsel %vm698_vm1, %v2642_v34, 0.0  ;;  %v2402_v55 = vadd.f32 %v5589_v21, %v2129_v62  ;;  %v2606_v48 = vrot.slane %v7726_v40, 7  ;;  %v5955_v0 = vld [vmem:[%s9680_s2 + $0x58] sm:$0xff]  }
 0x247   : > { %9987 = vst [vmem:[#allocation33_spill] sm:$0xff] %v7786_v7  ;;  %9988 = vst [vmem:[#allocation34_spill] sm:$0xff] %v7794_v28  ;;  %v2438_v44 = vmul.f32 %v7467_v58, %v2399_v12  ;;  %v2474_v39 = vadd.f32 %v7478_v33, %v2435_v30  ;;  %v2479_v41 = vadd.f32 %v7478_v33, %v2440_v36  ;;  %v9761_v3 = vrot.slane %v7736_v37, 7 }
 0x248   : > { %v2348_v52 = vpop.f32.mrf.mxu0  ;;  %2920 = vrot.lane.b32.xlu1 %v7794_v28, %s6027_s28  ;;  %v7806_v15 = vsel %vm2505_vm12, %v2473_v22, %v2544_v16  ;;  %v2547_v62 = vmul.f32 %v7500_v54, %v2476_v14  ;;  %v2132_v21 = vadd.f32 %v7723_v56, %v7422_v26  ;;  %v2604_v10 = vrot.slane %v7780_v35, 7  ;;  %v5548_v22 = vpop.f32.mrf.mxu1  ;;  %5606 = vmatprep.subr.bf16.mxu1 %v5955_v0  ;;  %v9991_v16 = vld [vmem:[#allocation12_spill] sm:$0xff] }
 0x249   : > { %9989 = vst [vmem:[#allocation35_spill] sm:$0xff] %v7806_v15  ;;  %vm2508_vm13 = vcmp.ge.f32.partialorder %v2476_v14, 0.0  ;;  %v2477_v18 = vadd.f32 %v7478_v33, %v2438_v44  ;;  %v7817_v31 = vsel %vm667_vm0, %v2606_v48, %v9761_v3  ;;  %v2400_v30 = vadd.f32 %v2335_v17, %v2127_v49  ;;  %5607 = vmatpush3.bf16.msra.mxu1 %v5955_v0  ;;  %v9995_v3 = vld [vmem:[#allocation15_spill] sm:$0xff] }
 0x24a   : > { %v5593_v51 = vpop.f32.mrf.mxu0  ;;  %9990 = vst [vmem:[#allocation38_spill] sm:$0xff] %v7817_v31  ;;  %v2130_v36 = vadd.f32 %v2075_v25, %v9991_v16  ;;  %v2441_v34 = vmul.f32 %v7467_v58, %v2402_v55  ;;  %2930 = vrot.lane.b32.xlu0 %v7817_v31, %s6027_s28  ;;  %v9992_v26 = vrot.slane %v7687_v6, 7  ;;  %v2545_v44 = vmul.f32 %v7500_v54, %v2474_v39  ;;  %v2091_v31 = vpop.f32.mrf.mxu1 }
 0x24b   : > { %v2550_v17 = vmul.f32 %v7500_v54, %v2479_v41  ;;  %v2439_v25 = vmul.f32 %v7467_v58, %v2400_v30  ;;  %v7835_v55 = vsel %vm2508_vm13, %v2476_v14, %v2547_v62  ;;  %vm2506_vm14 = vcmp.ge.f32.partialorder %v2474_v39, 0.0 }
 0x24c   : > { %v2640_v56 = vsel %vm667_vm0, %v9992_v26, %v2604_v10  ;;  %v2351_v12 = vpop.f32.mrf.mxu0  ;;  %9994 = vst [vmem:[#allocation40_spill] sm:$0xff] %v7835_v55  ;;  %vm2511_vm15 = vcmp.ge.f32.partialorder %v2479_v41, 0.0  ;;  %v2605_v0 = vrot.slane %v7783_v45, 7  ;;  %vm2509_vm4 = vcmp.ge.f32.partialorder %v2477_v18, 0.0 }
 0x24d   : > { %v7831_v49 = vsel %vm698_vm1, %v2640_v56, 0.0  ;;  %v2548_v26 = vmul.f32 %v7500_v54, %v2477_v18  ;;  %v2133_v56 = vadd.f32 %v7759_v46, %v9995_v3  ;;  %v2403_v28 = vadd.f32 %v2348_v52, %v2130_v36  ;;  %v5549_v36 = vpop.f32.mrf.mxu1 }
 0x24e   : > { %9993 = vst [vmem:[#allocation39_spill] sm:$0xff] %v7831_v49  ;;  %2924 = vrot.lane.b32.xlu1 %v7831_v49, %s6027_s28  ;;  %v5596_v16 = vpop.f32.mrf.mxu0  ;;  %v2480_v30 = vadd.f32 %v7478_v33, %v2441_v34  ;;  %v2405_v14 = vadd.f32 %v5592_v50, %v2132_v21  ;;  %v7846_v62 = vsel %vm667_vm0, %v2604_v10, %v2605_v0  ;;  %v2608_v34 = vrot.slane %v7806_v15, 7 }
 0x24f   : > { %9996 = vst [vmem:[#allocation41_spill] sm:$0xff] %v7846_v62  ;;  %v2638_v49 = vsel %vm667_vm0, %v2605_v0, %v2606_v48  ;;  %v7850_v1 = vsel %vm2506_vm14, %v2474_v39, %v2545_v44  ;;  %v7852_v42 = vsel %vm2511_vm15, %v2479_v41, %v2550_v17  ;;  %v2478_v24 = vadd.f32 %v7478_v33, %v2439_v25  ;;  %v5956_v44 = vld [vmem:[%s9680_s2 + $0x50] sm:$0xff]  }
 0x250   : > { %9997 = vst [vmem:[#allocation42_spill] sm:$0xff] %v7850_v1  ;;  %9998 = vst [vmem:[#allocation43_spill] sm:$0xff] %v7852_v42  ;;  %2926 = vrot.lane.b32.xlu0 %v7846_v62, %s6027_s28  ;;  %v7859_v46 = vsel %vm698_vm1, %v2638_v49, 0.0  ;;  %v2364_v50 = vpop.f32.mrf.mxu0  ;;  %v2442_v52 = vmul.f32 %v7467_v58, %v2403_v28  ;;  %v2406_v48 = vadd.f32 %v5593_v51, %v2133_v56  ;;  %v2610_v39 = vrot.slane %v7786_v7, 7 }
 0x251   : > { %9999 = vst [vmem:[#allocation44_spill] sm:$0xff] %v7859_v46  ;;  %v2611_v41 = vrot.slane %v7835_v55, 7  ;;  %v7867_v3 = vsel %vm2509_vm4, %v2477_v18, %v2548_v26  ;;  %v2131_v21 = vadd.f32 %v2078_v59, %v7554_v63  ;;  %v2136_v10 = vadd.f32 %v5548_v22, %v7443_v20  ;;  %5608 = vmatprep.subr.bf16.mxu1 %v5956_v44 }
 0x252   : > { %2928 = vrot.lane.b32.xlu1 %v7859_v46, %s6027_s28  ;;  %10000 = vst [vmem:[#allocation45_spill] sm:$0xff] %v7867_v3  ;;  %v2551_v28 = vmul.f32 %v7500_v54, %v2480_v30  ;;  %v2444_v51 = vmul.f32 %v7467_v58, %v2405_v14  ;;  %v2445_v17 = vmul.f32 %v7467_v58, %v2406_v48  ;;  %v10002_v59 = vrot.slane %v7736_v37, 7  ;;  %v5597_v25 = vpop.f32.mrf.mxu0 }
 0x253   : > { %v7880_v18 = vsel %vm667_vm0, %v2610_v39, %v2611_v41  ;;  %v2134_v63 = vadd.f32 %v2091_v31, %v7446_v23  ;;  %v2481_v20 = vadd.f32 %v7478_v33, %v2442_v52  ;;  %v2404_v49 = vadd.f32 %v2351_v12, %v2131_v21  ;;  %5609 = vmatpush3.bf16.msra.mxu1 %v5956_v44 }
 0x254   : > { %10001 = vst [vmem:[#allocation46_spill] sm:$0xff] %v7880_v18  ;;  %2938 = vrot.lane.b32.xlu0 %v7880_v18, %s6027_s28  ;;  %v2636_v22 = vsel %vm667_vm0, %v10002_v59, %v2608_v34  ;;  %vm2512_vm6 = vcmp.ge.f32.partialorder %v2480_v30, 0.0  ;;  %vm2510_vm7 = vcmp.ge.f32.partialorder %v2478_v24, 0.0  ;;  %v2137_v0 = vadd.f32 %v5549_v36, %v7453_v38 }
 0x255   : > { %v7893_v26 = vsel %vm698_vm1, %v2636_v22, 0.0  ;;  %v2549_v23 = vmul.f32 %v7500_v54, %v2478_v24  ;;  %v2443_v31 = vmul.f32 %v7467_v58, %v2404_v49  ;;  %v2609_v56 = vrot.slane %v7850_v1, 7 }
 0x256   : > { %10003 = vst [vmem:[#allocation47_spill] sm:$0xff] %v7893_v26  ;;  %2932 = vrot.lane.b32.xlu1 %v7893_v26, %s6027_s28  ;;  %v2407_v12 = vadd.f32 %v2364_v50, %v2134_v63  ;;  %v2483_v14 = vadd.f32 %v7478_v33, %v2444_v51  ;;  %v2484_v38 = vadd.f32 %v7478_v33, %v2445_v17  ;;  %vm2513_vm8 = vcmp.ge.f32.partialorder %v2481_v20, 0.0 }
 0x257   : > { %v2409_v52 = vadd.f32 %v5596_v16, %v2136_v10  ;;  %v2410_v48 = vadd.f32 %v5597_v25, %v2137_v0  ;;  %v7902_v21 = vsel %vm2512_vm6, %v2480_v30, %v2551_v28  ;;  %v2552_v36 = vmul.f32 %v7500_v54, %v2481_v20 }
 0x258   : > { %10004 = vst [vmem:[#allocation48_spill] sm:$0xff] %v7902_v21  ;;  %v7907_v59 = vsel %vm667_vm0, %v2608_v34, %v2609_v56  ;;  %v2634_v22 = vsel %vm667_vm0, %v2609_v56, %v2610_v39  ;;  %v2482_v50 = vadd.f32 %v7478_v33, %v2443_v31  ;;  %v2446_v30 = vmul.f32 %v7467_v58, %v2407_v12  ;;  %v5957_v39 = vld [vmem:[%s9680_s2 + $0x48] sm:$0xff]  }
 0x259   : > { %10005 = vst [vmem:[#allocation36_spill] sm:$0xff] %v7907_v59  ;;  %2934 = vrot.lane.b32.xlu0 %v7907_v59, %s6027_s28  ;;  %v7916_v16 = vsel %vm698_vm1, %v2634_v22, 0.0  ;;  %v2449_v10 = vmul.f32 %v7467_v58, %v2410_v48  ;;  %v7921_v44 = vsel %vm2510_vm7, %v2478_v24, %v2549_v23  ;;  %v2554_v34 = vmul.f32 %v7500_v54, %v2483_v14 }
 0x25a   : > { %10006 = vst [vmem:[#allocation37_spill] sm:$0xff] %v7916_v16  ;;  %10007 = vst [vmem:[#allocation49_spill] sm:$0xff] %v7921_v44  ;;  %2936 = vrot.lane.b32.xlu1 %v7916_v16, %s6027_s28  ;;  %v2555_v28 = vmul.f32 %v7500_v54, %v2484_v38  ;;  %v2448_v51 = vmul.f32 %v7467_v58, %v2409_v52  ;;  %v2615_v17 = vrot.slane %v7902_v21, 7  ;;  %vm2516_vm9 = vcmp.ge.f32.partialorder %v2484_v38, 0.0 }
 0x25b   : > { %v2488_v24 = vadd.f32 %v7478_v33, %v2449_v10  ;;  %v2614_v63 = vrot.slane %v7852_v42, 7  ;;  %v2612_v49 = vrot.slane %v7867_v3, 7  ;;  %5610 = vmatprep.subr.bf16.mxu1 %v5957_v39  ;;  %vm2515_vm10 = vcmp.ge.f32.partialorder %v2483_v14, 0.0 }
 0x25c   : > { %v7935_v25 = vsel %vm2513_vm8, %v2481_v20, %v2552_v36  ;;  %v2553_v0 = vmul.f32 %v7500_v54, %v2482_v50  ;;  %v2485_v23 = vadd.f32 %v7478_v33, %v2446_v30  ;;  %5611 = vmatpush3.bf16.msra.mxu1 %v5957_v39  ;;  %vm2514_vm11 = vcmp.ge.f32.partialorder %v2482_v50, 0.0 }
 0x25d   : > { %10008 = vst [vmem:[#allocation50_spill] sm:$0xff] %v7935_v25  ;;  %v7941_v31 = vsel %vm667_vm0, %v2614_v63, %v2615_v17  ;;  %v2632_v56 = vsel %vm667_vm0, %v2611_v41, %v2612_v49  ;;  %v2613_v12 = vrot.slane %v7921_v44, 7  ;;  %v7946_v52 = vsel %vm2516_vm9, %v2484_v38, %v2555_v28 }
 0x25e   : > { %10009 = vst [vmem:[#allocation9_spill] sm:$0xff] %v7941_v31  ;;  %10010 = vst [vmem:[#allocation6_spill] sm:$0xff] %v7946_v52  ;;  %2946 = vrot.lane.b32.xlu0 %v7941_v31, %s6027_s28  ;;  %v7952_v20 = vsel %vm698_vm1, %v2632_v56, 0.0  ;;  %v7954_v48 = vsel %vm2515_vm10, %v2483_v14, %v2554_v34  ;;  %v2487_v36 = vadd.f32 %v7478_v33, %v2448_v51  ;;  %vm2520_vm12 = vcmp.ge.f32.partialorder %v2488_v24, 0.0  ;;  %v5958_v34 = vld [vmem:[%s9680_s2 + $0x40] sm:$0xff]  }
 0x25f   : > { %10011 = vst [vmem:[#allocation12_spill] sm:$0xff] %v7952_v20  ;;  %10012 = vst [vmem:[#allocation15_spill] sm:$0xff] %v7954_v48  ;;  %v2559_v22 = vmul.f32 %v7500_v54, %v2488_v24  ;;  %2940 = vrot.lane.b32.xlu1 %v7952_v20, %s6027_s28  ;;  %v2630_v41 = vsel %vm667_vm0, %v2613_v12, %v2614_v63  ;;  %v7962_v38 = vsel %vm2514_vm11, %v2482_v50, %v2553_v0 }
 0x260   : > { %10013 = vst [vmem:[#allocation52_spill] sm:$0xff] %v7962_v38  ;;  %v2556_v30 = vmul.f32 %v7500_v54, %v2485_v23  ;;  %v2616_v10 = vrot.slane %v7935_v25, 7  ;;  %vm2517_vm13 = vcmp.ge.f32.partialorder %v2485_v23, 0.0  ;;  %v7968_v14 = vsel %vm667_vm0, %v2612_v49, %v2613_v12  ;;  %5612 = vmatprep.subr.bf16.mxu1 %v5958_v34 }
 0x261   : > { %10014 = vst [vmem:[#allocation53_spill] sm:$0xff] %v7968_v14  ;;  %v2619_v39 = vrot.slane %v7946_v52, 7  ;;  %v7978_v50 = vsel %vm698_vm1, %v2630_v41, 0.0  ;;  %v7980_v28 = vsel %vm2520_vm12, %v2488_v24, %v2559_v22  ;;  %v2618_v51 = vrot.slane %v7954_v48, 7  ;;  %5613 = vmatpush3.bf16.msra.mxu1 %v5958_v34 }
 0x262   : > { %2942 = vrot.lane.b32.xlu0 %v7968_v14, %s6027_s28  ;;  %10015 = vst [vmem:[#allocation54_spill] sm:$0xff] %v7978_v50  ;;  %v2628_v63 = vsel %vm667_vm0, %v2615_v17, %v2616_v10  ;;  %v2617_v49 = vrot.slane %v7962_v38, 7  ;;  %v2558_v0 = vmul.f32 %v7500_v54, %v2487_v36  ;;  %v7989_v56 = vsel %vm2517_vm13, %v2485_v23, %v2556_v30  ;;  %v2367_v14 = vpop.f32.mrf.mxu0 }
 0x263   : > { %2944 = vrot.lane.b32.xlu1 %v7978_v50, %s6027_s28  ;;  %10016 = vst [vmem:[#allocation55_spill] sm:$0xff] %v7989_v56  ;;  %vm2519_vm14 = vcmp.ge.f32.partialorder %v2487_v36, 0.0  ;;  %v7993_v24 = vsel %vm667_vm0, %v2618_v51, %v2619_v39  ;;  %v7999_v12 = vsel %vm698_vm1, %v2628_v63, 0.0  ;;  %v2622_v17 = vrot.slane %v7980_v28, 7 }
 0x264   : > { %10017 = vst [vmem:[#allocation56_spill] sm:$0xff] %v7993_v24  ;;  %10018 = vst [vmem:[#allocation57_spill] sm:$0xff] %v7999_v12  ;;  %v2626_v23 = vsel %vm667_vm0, %v2617_v49, %v2618_v51  ;;  %v9768_v22 = vrot.slane %v7989_v56, 7  ;;  %v2592_v41 = vrot.slane %v7530_v29, 7  ;;  %v8008_v30 = vsel %vm2519_vm14, %v2487_v36, %v2558_v0 }
 0x265   : > { %v8012_v34 = vsel %vm667_vm0, %v2616_v10, %v2617_v49  ;;  %v8018_v63 = vsel %vm698_vm1, %v2626_v23, 0.0  ;;  %v9769_v36 = vrot.slane %v8008_v30, 7  ;;  %v8032_v49 = vld [vmem:[%s9680_s2 + $0xb8] sm:$0xff]   ;;  %v2824_v16 = vrot.slane %v7867_v3, 1 }
 0x266   : > { %2954 = vrot.lane.b32.xlu0 %v7993_v24, %s6027_s28  ;;  %10019 = vst [vmem:[#allocation58_spill] sm:$0xff] %v8012_v34  ;;  %10020 = vst [vmem:[#allocation59_spill] sm:$0xff] %v8018_v63  ;;  %v2652_v51 = vsel %vm667_vm0, %v2622_v17, %v2592_v41  ;;  %v2624_v10 = vsel %vm667_vm0, %v2619_v39, %v9768_v22  ;;  %5694 = vmatprep.subr.bf16.mxu1 %v8032_v49  ;;  %v2808_v22 = vrot.slane %v7618_v47, 1 }
 0x267   : > { %2948 = vrot.lane.b32.xlu1 %v7999_v12, %s6027_s28  ;;  %v8038_v0 = vsel %vm667_vm0, %v9769_v36, %v2622_v17  ;;  %v8042_v23 = vsel %vm698_vm1, %v2652_v51, 0.0  ;;  %v8049_v39 = vsel %vm698_vm1, %v2624_v10, 0.0  ;;  %v10023_v17 = vrot.slane %v7564_v19, 7  ;;  %v10028_v12 = vld [vmem:[#allocation5_spill] sm:$0xff] }
 0x268   : > { %10021 = vst [vmem:[#allocation60_spill] sm:$0xff] %v8038_v0  ;;  %10022 = vst [vmem:[#allocation61_spill] sm:$0xff] %v8049_v39  ;;  %v2828_v59 = vrot.slane %v7935_v25, 1  ;;  %v2832_v46 = vrot.slane %v7989_v56, 1 }
 0x269   : > { %v2651_v51 = vsel %vm667_vm0, %v2592_v41, %v10023_v17  ;;  %v2809_v41 = vrot.slane %v7639_v43, 1  ;;  %v2810_v17 = vrot.slane %v7585_v5, 1 }
 0x26a   : > { %2950 = vrot.lane.b32.xlu0 %v8012_v34, %s6027_s28  ;;  %v5898_v36 = vpack.i.bf16 %v2651_v51, %v8042_v23  ;;  %v10027_v34 = vld [vmem:[#allocation4_spill] sm:$0xff] }
 0x26b   : > { %2952 = vrot.lane.b32.xlu1 %v8018_v63, %s6027_s28  ;;  %v8096_v24 = vsel %vm886_vm2, %v2809_v41, %v2810_v17  ;;  %v1489_v31 = vadd.f32 %v10028_v12, %v10027_v34  ;;  %v2813_v34 = vrot.slane %v7702_v13, 1 }
 0x26c   : > { %10026 = vst [vmem:[#allocation63_spill] sm:$0xff] %v8096_v24  ;;  %v8104_v63 = vsel %vm918_vm3, %v8096_v24, 0.0 }
 0x26d   : > { %v1871_v50 = vadd.f32 %v7455_v9, %v1489_v31  ;;  %v2815_v31 = vrot.slane %v7687_v6, 1 }
 0x26e   : > { %2962 = vrot.lane.b32.xlu0 %v8038_v0, %s6027_s28  ;;  %v10024_v0 = vrot.slane %v7534_v11, 1 }
 0x26f   : > { %2956 = vrot.lane.b32.xlu1 %v8049_v39, %s6027_s28 }
 0x270   : > { %v8064_v10 = vsel %vm886_vm2, %v10024_v0, %v2808_v22  ;;  %v2811_v0 = vrot.slane %v7621_v27, 1 }
 0x271   : > { %10025 = vst [vmem:[#allocation62_spill] sm:$0xff] %v8064_v10  ;;  %v8071_v39 = vsel %vm918_vm3, %v8064_v10, 0.0 }
 0x272   : > { %5899 = vrot.lane.b32.xlu0 %v5898_v36, %s6027_s28  ;;  %v8082_v36 = vsel %vm886_vm2, %v2808_v22, %v2809_v41  ;;  %v8092_v10 = vsel %vm886_vm2, %v2810_v17, %v2811_v0  ;;  %v2812_v22 = vrot.slane %v7663_v60, 1  ;;  %v2094_v17 = vpop.f32.mrf.mxu1 }
 0x273   : > { %2687 = vrot.lane.b32.xlu1 %v7542_v4, %s6027_s28  ;;  %v2135_v12 = vadd.f32 %v2094_v17, %v1871_v50  ;;  %v2814_v17 = vrot.slane %v7642_v53, 1 }
 0x274   : > { %v8112_v41 = vsel %vm886_vm2, %v2811_v0, %v2812_v22  ;;  %v8131_v9 = vsel %vm886_vm2, %v2812_v22, %v2813_v34 }
 0x275   : > { %10029 = vst [vmem:[#allocation4_spill] sm:$0xff] %v8112_v41  ;;  %v8120_v24 = vsel %vm918_vm3, %v8112_v41, 0.0  ;;  %v2408_v0 = vadd.f32 %v2367_v14, %v2135_v12  ;;  %v8142_v14 = vsel %vm886_vm2, %v2814_v17, %v2815_v31  ;;  %v8146_v22 = vsel %vm886_vm2, %v2813_v34, %v2814_v17 }
 0x276   : > { %3457 = vrot.lane.b32.xlu0 %v8071_v39, %s6027_s28  ;;  %10030 = vst [vmem:[#allocation5_spill] sm:$0xff] %v8146_v22  ;;  %v2816_v12 = vrot.slane %v7780_v35, 1  ;;  %v2817_v17 = vrot.slane %v7783_v45, 1 }
 0x277   : > { %2691 = vrot.lane.b32.xlu1 %v7618_v47, %s6027_s28  ;;  %v2447_v50 = vmul.f32 %v7467_v58, %v2408_v0  ;;  %v8155_v0 = vsel %vm918_vm3, %v8146_v22, 0.0  ;;  %v2827_v47 = vrot.slane %v7902_v21, 1 }
 0x278   : > { %v8161_v41 = vsel %vm886_vm2, %v2815_v31, %v2816_v12 }
 0x279   : > { %v2486_v58 = vadd.f32 %v7478_v33, %v2447_v50  ;;  %10031 = vst [vmem:[#allocation64_spill] sm:$0xff] %v8161_v41  ;;  %v8169_v33 = vsel %vm918_vm3, %v8161_v41, 0.0  ;;  %v2819_v41 = vrot.slane %v7736_v37, 1 }
 0x27a   : > { %2689 = vrot.lane.b32.xlu0 %v7534_v11, %s6027_s28  ;;  %v2831_v11 = vrot.slane %v7946_v52, 1 }
 0x27b   : > { %3459 = vrot.lane.b32.xlu1 %v8082_v36, %s6027_s28  ;;  %v2557_v34 = vmul.f32 %v7500_v54, %v2486_v58  ;;  %vm2518_vm15 = vcmp.ge.f32.partialorder %v2486_v58, 0.0  ;;  %v8182_v54 = vsel %vm886_vm2, %v2816_v12, %v2817_v17 }
 0x27d   : > { %v8176_v31 = vsel %vm2518_vm15, %v2486_v58, %v2557_v34  ;;  %v2818_v34 = vrot.slane %v7726_v40, 1 }
 0x27e   : > { %2693 = vrot.lane.b32.xlu0 %v7639_v43, %s6027_s28  ;;  %10032 = vst [vmem:[#allocation65_spill] sm:$0xff] %v8176_v31  ;;  %v2829_v43 = vrot.slane %v7962_v38, 1 }
 0x27f   : > { %3463 = vrot.lane.b32.xlu1 %v8092_v10, %s6027_s28  ;;  %v8196_v12 = vsel %vm886_vm2, %v2818_v34, %v2819_v41 }
 0x282   : > { %3461 = vrot.lane.b32.xlu0 %v8104_v63, %s6027_s28 }
 0x283   : > { %2695 = vrot.lane.b32.xlu1 %v7585_v5, %s6027_s28 }
 0x286   : > { %3465 = vrot.lane.b32.xlu0 %v8120_v24, %s6027_s28 }
 0x287   : > { %2699 = vrot.lane.b32.xlu1 %v7663_v60, %s6027_s28 }
 0x28a   : > { %2697 = vrot.lane.b32.xlu0 %v7621_v27, %s6027_s28 }
 0x28b   : > { %3467 = vrot.lane.b32.xlu1 %v8131_v9, %s6027_s28 }
 0x28e   : > { %2701 = vrot.lane.b32.xlu0 %v7702_v13, %s6027_s28 }
 0x28f   : > { %3471 = vrot.lane.b32.xlu1 %v8142_v14, %s6027_s28 }
 0x292   : > { %3469 = vrot.lane.b32.xlu0 %v8155_v0, %s6027_s28 }
 0x293   : > { %2703 = vrot.lane.b32.xlu1 %v7642_v53, %s6027_s28 }
 0x295   : > { %v2684_v50 = vpop.permute.xlu1 %2683 }
 0x296   : > { %3473 = vrot.lane.b32.xlu0 %v8169_v33, %s6027_s28  ;;  %v2743_v53 = vadd.f32 %v2684_v50, %v8042_v23  ;;  %v8200_v23 = vsel %vm886_vm2, %v2817_v17, %v2818_v34  ;;  %v2820_v17 = vrot.slane %v7806_v15, 1 }
 0x297   : > { %2707 = vrot.lane.b32.xlu1 %v7780_v35, %s6027_s28  ;;  %v2621_v35 = vrot.slane %v8176_v31, 7  ;;  %10033 = vst [vmem:[#allocation66_spill] sm:$0xff] %v8200_v23 }
 0x299   : > { %v2686_v22 = vpop.permute.xlu0 %2685 }
 0x29a   : > { %2705 = vrot.lane.b32.xlu0 %v7687_v6, %s6027_s28  ;;  %v2744_v20 = vadd.f32 %v2686_v22, %v2651_v51  ;;  %v10034_v51 = vrot.slane %v8008_v30, 7  ;;  %v8213_v22 = vsel %vm918_vm3, %v8200_v23, 0.0  ;;  %v10038_v23 = vrot.slane %v7989_v56, 7 }
 0x29b   : > { %3475 = vrot.lane.b32.xlu1 %v8182_v54, %s6027_s28  ;;  %v8189_v58 = vpop.permute.xlu1 %2906 }
 0x29c   : > { %v2773_v18 = vpack.c.bf16 %v2744_v20, %v2743_v53  ;;  %v2897_v53 = vsel %vm667_vm0, %v2621_v35, %v10034_v51 }
 0x29e   : > { %2709 = vrot.lane.b32.xlu0 %v7783_v45, %s6027_s28  ;;  %5663 = vmatmul.mubr.bf16.vlgmr.msra.gmra.mxu0 %v2773_v18  ;;  %v8221_v18 = vsel %vm698_vm1, %v2897_v53, 0.0  ;;  %v8233_v45 = vsel %vm667_vm0, %v10038_v23, %v2621_v35  ;;  %v8239_v53 = vsel %vm886_vm2, %v2819_v41, %v2820_v17  ;;  %vm6031_vm0 = vmmov 0  }
 0x29f   : > { %3479 = vrot.lane.b32.xlu1 %v8196_v12, %s6027_s28  ;;  %v8208_v20 = vpop.permute.xlu0 %2904  ;;  %10036 = vst [vmem:[#allocation68_spill] sm:$0xff] %v8221_v18  ;;  %10039 = vst [vmem:[#allocation70_spill] sm:$0xff] %v8233_v45  ;;  %v8254_v23 = vsel %vm918_vm3, %v8239_v53, 0.0 }
 0x2a0   : > { %10040 = vst [vmem:[#allocation71_spill] sm:$0xff] %v8239_v53  ;;  %v2823_v53 = vrot.slane %v7835_v55, 1 }
 0x2a1   : > { %v8215_v50 = vpop.permute.xlu1 %3455 }
 0x2a2   : > { %10035 = vst [vmem:[#allocation67_spill] sm:$0xff] %v8215_v50  ;;  %3477 = vrot.lane.b32.xlu0 %v8213_v22, %s6027_s28 }
 0x2a3   : > { %2960 = vrot.lane.b32.xlu1 %v8221_v18, %s6027_s28 }
 0x2a4   : > { %v3454_v34 = vpop.permute.xlu0 %3453 }
 0x2a5   : > { %v8227_v51 = vadd.f32 %v3454_v34, %v7564_v19  ;;  %v3452_v6 = vpop.permute.xlu1 %3451  ;;  %v5967_v19 = vld [vmem:[%s9680_s2 + $0xf8] sm:$0xff]  }
 0x2a6   : > { %2958 = vrot.lane.b32.xlu0 %v8233_v45, %s6027_s28  ;;  %v8242_v18 = vadd.f32 %v3452_v6, %v7530_v29  ;;  %5742 = vmatprep.subr.bf16.mxu0 %v5967_v19  ;;  %v2821_v6 = vrot.slane %v7850_v1, 1 }
 0x2a7   : > { %10037 = vst [vmem:[#allocation69_spill] sm:$0xff] %v8227_v51  ;;  %2711 = vrot.lane.b32.xlu1 %v7726_v40, %s6027_s28  ;;  %5743 = vmatpush3.bf16.msra.mxu0 %v5967_v19  ;;  %v2822_v40 = vrot.slane %v7786_v7, 1 }
 0x2a8   : > { %10041 = vst [vmem:[#allocation72_spill] sm:$0xff] %v8242_v18  ;;  %v8269_v35 = vsel %vm886_vm2, %v2820_v17, %v2821_v6 }
 0x2a9   : > { %v8256_v41 = vpop.permute.xlu0 %2914  ;;  %v8286_v17 = vsel %vm886_vm2, %v2822_v40, %v2823_v53 }
 0x2aa   : > { %3481 = vrot.lane.b32.xlu0 %v8254_v23, %s6027_s28 }
 0x2ab   : > { %2715 = vrot.lane.b32.xlu1 %v7806_v15, %s6027_s28  ;;  %v8263_v34 = vpop.permute.xlu1 %2908  ;;  %v5969_v15 = vld [vmem:[%s9680_s2 + $0xf0] sm:$0xff]  }
 0x2ac   : > { %5744 = vmatprep.subr.bf16.mxu0 %v5969_v15 }
 0x2ad   : > { %5745 = vmatpush3.bf16.msra.mxu0 %v5969_v15 }
 0x2ae   : > { %2713 = vrot.lane.b32.xlu0 %v7736_v37, %s6027_s28  ;;  %v8290_v37 = vsel %vm886_vm2, %v2821_v6, %v2822_v40  ;;  %v8308_v40 = vsel %vm886_vm2, %v2823_v53, %v2824_v16  ;;  %v5971_v6 = vld [vmem:[%s9680_s2 + $0xe8] sm:$0xff]   ;;  %v2825_v53 = vrot.slane %v7921_v44, 1 }
 0x2af   : > { %v8272_v45 = vpop.permute.xlu0 %2910  ;;  %3483 = vrot.lane.b32.xlu1 %v8269_v35, %s6027_s28  ;;  %10042 = vst [vmem:[#allocation73_spill] sm:$0xff] %v8290_v37  ;;  %10043 = vst [vmem:[#allocation74_spill] sm:$0xff] %v8308_v40  ;;  %5746 = vmatprep.subr.bf16.mxu0 %v5971_v6 }
 0x2b0   : > { %v8276_v19 = vpop.permute.xlu1 %2912 }
 0x2b1   : > { %5747 = vmatpush3.bf16.msra.mxu0 %v5971_v6  ;;  %v5973_v6 = vld [vmem:[%s9680_s2 + $0xe0] sm:$0xff]  }
 0x2b2   : > { %2717 = vrot.lane.b32.xlu0 %v7850_v1, %s6027_s28  ;;  %v8300_v1 = vsel %vm918_vm3, %v8290_v37, 0.0  ;;  %v8320_v37 = vsel %vm918_vm3, %v8308_v40, 0.0  ;;  %v8335_v40 = vsel %vm886_vm2, %v2824_v16, %v2825_v53  ;;  %5748 = vmatprep.subr.bf16.mxu0 %v5973_v6 }
 0x2b3   : > { %3487 = vrot.lane.b32.xlu1 %v8286_v17, %s6027_s28 }
 0x2b4   : > { %v8295_v60 = vpop.permute.xlu0 %2922 }
 0x2b5   : > { %5749 = vmatpush3.bf16.msra.mxu0 %v5973_v6  ;;  %v5975_v6 = vld [vmem:[%s9680_s2 + $0xd8] sm:$0xff]  }
 0x2b6   : > { %v8302_v5 = vpop.permute.xlu1 %2916  ;;  %3485 = vrot.lane.b32.xlu0 %v8300_v1, %s6027_s28  ;;  %5750 = vmatprep.subr.bf16.mxu0 %v5975_v6 }
 0x2b7   : > { %2719 = vrot.lane.b32.xlu1 %v7786_v7, %s6027_s28 }
 0x2b8   : > { %v8312_v15 = vpop.permute.xlu0 %2918 }
 0x2b9   : > { %5751 = vmatpush3.bf16.msra.mxu0 %v5975_v6  ;;  %v5977_v6 = vld [vmem:[%s9680_s2 + $0xd0] sm:$0xff]  }
 0x2ba   : > { %v8322_v13 = vpop.permute.xlu1 %2920  ;;  %3489 = vrot.lane.b32.xlu0 %v8320_v37, %s6027_s28  ;;  %5752 = vmatprep.subr.bf16.mxu0 %v5977_v6 }
 0x2bb   : > { %2723 = vrot.lane.b32.xlu1 %v7867_v3, %s6027_s28  ;;  %v2826_v3 = vrot.slane %v7852_v42, 1 }
 0x2bc   : > { %v8329_v7 = vpop.permute.xlu0 %2930 }
 0x2bd   : > { %v8352_v16 = vsel %vm886_vm2, %v2826_v3, %v2827_v47  ;;  %v8358_v4 = vsel %vm886_vm2, %v2825_v53, %v2826_v3  ;;  %v8374_v3 = vsel %vm886_vm2, %v2827_v47, %v2828_v59  ;;  %5753 = vmatpush3.bf16.msra.mxu0 %v5977_v6 }
 0x2be   : > { %2721 = vrot.lane.b32.xlu0 %v7835_v55, %s6027_s28  ;;  %10044 = vst [vmem:[#allocation75_spill] sm:$0xff] %v8358_v4  ;;  %10045 = vst [vmem:[#allocation76_spill] sm:$0xff] %v8374_v3 }
 0x2bf   : > { %3491 = vrot.lane.b32.xlu1 %v8335_v40, %s6027_s28 }
 0x2c0   : > { %v8337_v27 = vpop.permute.xlu1 %2924 }
 0x2c2   : > { %v8346_v50 = vpop.permute.xlu0 %2926  ;;  %2725 = vrot.lane.b32.xlu0 %v7921_v44, %s6027_s28  ;;  %v8366_v44 = vsel %vm918_vm3, %v8358_v4, 0.0  ;;  %v8386_v4 = vsel %vm918_vm3, %v8374_v3, 0.0  ;;  %v8401_v3 = vsel %vm886_vm2, %v2828_v59, %v2829_v43 }
 0x2c3   : > { %3495 = vrot.lane.b32.xlu1 %v8352_v16, %s6027_s28  ;;  %10046 = vst [vmem:[#allocation77_spill] sm:$0xff] %v8401_v3 }
 0x2c4   : > { %v8354_v55 = vpop.permute.xlu1 %2928 }
 0x2c6   : > { %v8368_v26 = vpop.permute.xlu0 %2938  ;;  %3493 = vrot.lane.b32.xlu0 %v8366_v44, %s6027_s28 }
 0x2c7   : > { %2727 = vrot.lane.b32.xlu1 %v7852_v42, %s6027_s28 }
 0x2c8   : > { %v8378_v53 = vpop.permute.xlu1 %2932 }
 0x2ca   : > { %3497 = vrot.lane.b32.xlu0 %v8386_v4, %s6027_s28 }
 0x2cb   : > { %v8390_v47 = vpop.permute.xlu0 %2934  ;;  %2731 = vrot.lane.b32.xlu1 %v7935_v25, %s6027_s28  ;;  %v2830_v25 = vrot.slane %v7954_v48, 1 }
 0x2cc   : > { %v8395_v42 = vpop.permute.xlu1 %2936 }
 0x2cd   : > { %v8418_v59 = vsel %vm886_vm2, %v2830_v25, %v2831_v11 }
 0x2ce   : > { %2729 = vrot.lane.b32.xlu0 %v7902_v21, %s6027_s28  ;;  %10047 = vst [vmem:[#allocation78_spill] sm:$0xff] %v8418_v59  ;;  %v8422_v21 = vsel %vm886_vm2, %v2829_v43, %v2830_v25  ;;  %v8440_v43 = vsel %vm886_vm2, %v2831_v11, %v2832_v46  ;;  %v5979_v25 = vld [vmem:[%s9680_s2 + $0xc8] sm:$0xff]   ;;  %v2833_v11 = vrot.slane %v8176_v31, 1 }
 0x2cf   : > { %3499 = vrot.lane.b32.xlu1 %v8401_v3, %s6027_s28  ;;  %10048 = vst [vmem:[#allocation79_spill] sm:$0xff] %v8422_v21  ;;  %10050 = vst [vmem:[#allocation81_spill] sm:$0xff] %v8440_v43  ;;  %5754 = vmatprep.subr.bf16.mxu0 %v5979_v25 }
 0x2d0   : > { %v8409_v18 = vpop.permute.xlu0 %2946  ;;  %5755 = vmatpush3.bf16.msra.mxu0 %v5979_v25  ;;  %v5981_v25 = vld [vmem:[%s9680_s2 + $0xc0] sm:$0xff]  }
 0x2d1   : > { %v8412_v51 = vpop.permute.xlu1 %2940  ;;  %5756 = vmatprep.subr.bf16.mxu0 %v5981_v25 }
 0x2d2   : > { %2733 = vrot.lane.b32.xlu0 %v7962_v38, %s6027_s28  ;;  %v8434_v38 = vsel %vm918_vm3, %v8422_v21, 0.0  ;;  %v8454_v21 = vsel %vm918_vm3, %v8440_v43, 0.0  ;;  %v8469_v43 = vsel %vm886_vm2, %v2832_v46, %v2833_v11 }
 0x2d3   : > { %3503 = vrot.lane.b32.xlu1 %v8418_v59, %s6027_s28  ;;  %10049 = vst [vmem:[#allocation80_spill] sm:$0xff] %v8434_v38  ;;  %10053 = vst [vmem:[#allocation84_spill] sm:$0xff] %v8454_v21 }
 0x2d4   : > { %v8427_v3 = vpop.permute.xlu0 %2942  ;;  %10055 = vst [vmem:[#allocation86_spill] sm:$0xff] %v8469_v43  ;;  %5757 = vmatpush3.bf16.msra.mxu0 %v5981_v25 }
 0x2d5   : > { %v8429_v62 = vpop.permute.xlu1 %2944 }
 0x2d6   : > { %3501 = vrot.lane.b32.xlu0 %v8434_v38, %s6027_s28  ;;  %v3446_v38 = vrot.slane %v7980_v28, 1 }
 0x2d7   : > { %2735 = vrot.lane.b32.xlu1 %v7954_v48, %s6027_s28 }
 0x2d8   : > { %v8447_v6 = vpop.permute.xlu0 %2954 }
 0x2d9   : > { %10051 = vst [vmem:[#allocation82_spill] sm:$0xff] %v8447_v6  ;;  %v8449_v59 = vpop.permute.xlu1 %2948 }
 0x2da   : > { %10052 = vst [vmem:[#allocation83_spill] sm:$0xff] %v8449_v59  ;;  %3505 = vrot.lane.b32.xlu0 %v8454_v21, %s6027_s28 }
 0x2db   : > { %2739 = vrot.lane.b32.xlu1 %v7989_v56, %s6027_s28  ;;  %v2834_v56 = vrot.slane %v8008_v30, 1 }
 0x2dc   : > { %v8461_v48 = vpop.permute.xlu0 %2950 }
 0x2dd   : > { %v8463_v6 = vpop.permute.xlu1 %2952  ;;  %v8484_v46 = vsel %vm886_vm2, %v2833_v11, %v2834_v56  ;;  %v2969_v11 = vadd.f32 %v8272_v45, %v8071_v39  ;;  %v2968_v45 = vadd.f32 %v8263_v34, %v7615_v32  ;;  %v5961_v34 = vld [vmem:[%s9680_s2 + $0xa8] sm:$0xff]  }
 0x2de   : > { %10054 = vst [vmem:[#allocation85_spill] sm:$0xff] %v8463_v6  ;;  %2737 = vrot.lane.b32.xlu0 %v7946_v52, %s6027_s28  ;;  %v8490_v52 = vsel %vm886_vm2, %v2834_v56, %v3446_v38 }
 0x2df   : > { %3507 = vrot.lane.b32.xlu1 %v8469_v43, %s6027_s28  ;;  %10058 = vst [vmem:[#allocation89_spill] sm:$0xff] %v8490_v52  ;;  %v10059_v43 = vmov 0.0  }
 0x2e0   : > { %v8478_v21 = vpop.permute.xlu0 %2962  ;;  %5838 = vmatprep.subr.mxu0 %v10059_v43  ;;  %v10060_v43 = vrot.slane %v7530_v29, 1  ;;  %v5960_v29 = vld [vmem:[%s9680_s2 + $0xb0] sm:$0xff]  }
 0x2e1   : > { %10056 = vst [vmem:[#allocation87_spill] sm:$0xff] %v8478_v21  ;;  %v8480_v6 = vpop.permute.xlu1 %2956  ;;  %v2966_v21 = vadd.f32 %v8208_v20, %v7653_v8 }
 0x2e2   : > { %10057 = vst [vmem:[#allocation88_spill] sm:$0xff] %v8480_v6  ;;  %2741 = vrot.lane.b32.xlu0 %v8176_v31, %s6027_s28  ;;  %v8502_v31 = vsel %vm918_vm3, %v8484_v46, 0.0  ;;  %v8510_v8 = vsel %vm886_vm2, %v3446_v38, %v10060_v43  ;;  %vm4567_vm2 = vcmask 130048  }
 0x2e3   : > { %3511 = vrot.lane.b32.xlu1 %v8490_v52, %s6027_s28  ;;  %v2967_v52 = vadd.f32 %v8189_v58, %v7636_v61  ;;  %v2998_v61 = vpack.c.bf16 %v2969_v11, %v2968_v45  ;;  %v3450_v58 = vsel %vm918_vm3, %v8510_v8, 0.0  ;;  %v10062_v11 = vld [vmem:[#allocation10_spill] sm:$0xff] }
 0x2e4   : > { %v5900_v6 = vpop.permute.xlu0 %5899 }
 0x2e5   : > { %v5902_v56 = vunpack.i.h.bf16 %v5900_v6  ;;  %v5901_v59 = vunpack.i.l.bf16 %v5900_v6  ;;  %v2688_v25 = vpop.permute.xlu1 %2687  ;;  %v2997_v20 = vpack.c.bf16 %v2967_v52, %v2966_v21  ;;  %v2970_v21 = vadd.f32 %v8276_v19, %v8082_v36 }
 0x2e6   : > { %3509 = vrot.lane.b32.xlu0 %v8502_v31, %s6027_s28  ;;  %v2745_v43 = vadd.f32 %v2688_v25, %v10061_v57  ;;  %v2972_v19 = vadd.f32 %v8302_v5, %v8092_v10 }
 0x2e7   : > { %v2996_v39 = vpack.c.bf16 %v5902_v56, %v5901_v59  ;;  %3820 = vrot.lane.b32.xlu1 %v8008_v30, %s6027_s28  ;;  %v2973_v59 = vadd.f32 %v8312_v15, %v8120_v24  ;;  %v5962_v15 = vld [vmem:[%s9680_s2 + $0xa0] sm:$0xff]  }
 0x2e8   : > { %v8518_v6 = vpop.permute.xlu0 %3457 }
 0x2e9   : > { %v2692_v38 = vpop.permute.xlu1 %2691  ;;  %5614 = vmatprep.mubr.bf16.mxu1 %v2996_v39  ;;  %v3000_v25 = vpack.c.bf16 %v2973_v59, %v2972_v19  ;;  %v2977_v59 = vadd.f32 %v8346_v50, %v8169_v33  ;;  %v2981_v50 = vadd.f32 %v8390_v47, %v8254_v23  ;;  %v10065_v19 = vld [vmem:[#allocation25_spill] sm:$0xff]  ;;  %v5966_v23 = vld [vmem:[%s9680_s2 + $0x80] sm:$0xff]  }
 0x2ea   : > { %3513 = vrot.lane.b32.xlu0 %v3450_v58, %s6027_s28  ;;  %5615 = vmatmul.mubr.bf16.vlgmr.msra.gmra.mxu1 %v2997_v20 }
 0x2eb   : > { %5695 = vmatpush3.bf16.msra.mxu1 %v8032_v49  ;;  %5618 = vmatprep.mubr.bf16.mxu1 %v2998_v61  ;;  %v2971_v49 = vadd.f32 %v8256_v41, %v8104_v63  ;;  %v10063_v61 = vld [vmem:[#allocation22_spill] sm:$0xff]  ;;  %v10064_v63 = vld [vmem:[#allocation24_spill] sm:$0xff] }
 0x2ec   : > { %v2690_v52 = vpop.permute.xlu0 %2689  ;;  %5696 = vmatprep.subr.bf16.mxu1 %v5960_v29  ;;  %v2747_v58 = vadd.f32 %v2692_v38, %v10063_v61  ;;  %v5963_v38 = vld [vmem:[%s9680_s2 + $0x98] sm:$0xff]   ;;  %v2979_v61 = vadd.f32 %v8329_v7, %v8213_v22  ;;  %v2982_v22 = vadd.f32 %v8395_v42, %v8269_v35  ;;  %v2984_v42 = vadd.f32 %v8412_v51, %v8286_v17 }
 0x2ed   : > { %v2746_v56 = vadd.f32 %v2690_v52, %v10062_v11  ;;  %v8537_v45 = vpop.permute.xlu1 %3459  ;;  %v2999_v20 = vpack.c.bf16 %v2971_v49, %v2970_v21  ;;  %v10070_v51 = vld [vmem:[#allocation29_spill] sm:$0xff] }
 0x2ee   : > { %3822 = vrot.lane.b32.xlu0 %v7980_v28, %s6027_s28 }
 0x2ef   : > { %v8545_v39 = vpack.c.bf16 %v2746_v56, %v2745_v43  ;;  %5697 = vmatpush3.bf16.msra.mxu1 %v5960_v29  ;;  %v2974_v29 = vadd.f32 %v8322_v13, %v8131_v9  ;;  %v2975_v43 = vadd.f32 %v8295_v60, %v8155_v0  ;;  %v5964_v56 = vld [vmem:[%s9680_s2 + $0x90] sm:$0xff]   ;;  %v2978_v60 = vadd.f32 %v8354_v55, %v8182_v54 }
 0x2f0   : > { %v2694_v24 = vpop.permute.xlu0 %2693  ;;  %5698 = vmatprep.subr.bf16.mxu1 %v5961_v34  ;;  %v2980_v55 = vadd.f32 %v8378_v53, %v8196_v12 }
 0x2f1   : > { %v2748_v41 = vadd.f32 %v2694_v24, %v10064_v63  ;;  %v8552_v52 = vpop.permute.xlu1 %3463  ;;  %5666 = vmatprep.mubr.bf16.mxu0 %v8545_v39  ;;  %v3001_v13 = vpack.c.bf16 %v2975_v43, %v2974_v29  ;;  %v10066_v24 = vld [vmem:[#allocation20_spill] sm:$0xff]  ;;  %v3003_v63 = vpack.c.bf16 %v2979_v61, %v2978_v60 }
 0x2f2   : > { %5619 = vmatmul.mubr.bf16.gmra.mxu1 %v2999_v20  ;;  %v3004_v47 = vpack.c.bf16 %v2981_v50, %v2980_v55  ;;  %v10067_v29 = vld [vmem:[#allocation28_spill] sm:$0xff] }
 0x2f3   : > { %v8555_v5 = vpack.c.bf16 %v2748_v41, %v2747_v58  ;;  %5622 = vmatprep.mubr.bf16.mxu1 %v3000_v25  ;;  %5699 = vmatpush3.bf16.msra.mxu1 %v5961_v34  ;;  %v2976_v34 = vadd.f32 %v8337_v27, %v8142_v14  ;;  %v5965_v27 = vld [vmem:[%s9680_s2 + $0x88] sm:$0xff]  }
 0x2f4   : > { %v8559_v21 = vpop.permute.xlu0 %3461  ;;  %5700 = vmatprep.subr.bf16.mxu1 %v5962_v15 }
 0x2f5   : > { %v2696_v57 = vpop.permute.xlu1 %2695  ;;  %5667 = vmatmul.mubr.bf16.gmra.mxu0 %v8555_v5  ;;  %v3002_v49 = vpack.c.bf16 %v2977_v59, %v2976_v34  ;;  %v10068_v59 = vld [vmem:[#allocation30_spill] sm:$0xff]  ;;  %v8610_v34 = vld [vmem:[%s9680_s2 + $0x138] sm:$0xff]  }
 0x2f6   : > { %v2749_v20 = vadd.f32 %v2696_v57, %v10065_v19 }
 0x2f7   : > { %5701 = vmatpush3.bf16.msra.mxu1 %v5962_v15 }
 0x2f8   : > { %v8571_v11 = vpop.permute.xlu0 %3465  ;;  %5702 = vmatprep.subr.bf16.mxu1 %v5963_v38 }
 0x2f9   : > { %v2700_v33 = vpop.permute.xlu1 %2699 }
 0x2fa   : > { %5623 = vmatmul.mubr.bf16.gmra.mxu1 %v3001_v13  ;;  %v2985_v13 = vadd.f32 %v8427_v3, %v8320_v37  ;;  %v2986_v37 = vadd.f32 %v8429_v62, %v8335_v40 }
 0x2fb   : > { %5626 = vmatprep.mubr.bf16.mxu1 %v3002_v49  ;;  %5703 = vmatpush3.bf16.msra.mxu1 %v5963_v38  ;;  %v2751_v38 = vadd.f32 %v2700_v33, %v10067_v29  ;;  %v2983_v49 = vadd.f32 %v8368_v26, %v8300_v1  ;;  %v2989_v1 = vadd.f32 %v8461_v48, %v8386_v4  ;;  %v10069_v26 = vld [vmem:[#allocation34_spill] sm:$0xff]  ;;  %v10073_v4 = vld [vmem:[#allocation41_spill] sm:$0xff] }
 0x2fc   : > { %v2698_v0 = vpop.permute.xlu0 %2697  ;;  %5704 = vmatprep.subr.bf16.mxu1 %v5964_v56 }
 0x2fd   : > { %v2750_v15 = vadd.f32 %v2698_v0, %v10066_v24  ;;  %v8585_v25 = vpop.permute.xlu1 %3467  ;;  %v3005_v33 = vpack.c.bf16 %v2983_v49, %v2982_v22  ;;  %v3006_v0 = vpack.c.bf16 %v2985_v13, %v2984_v42  ;;  %v2987_v24 = vadd.f32 %v8409_v18, %v8366_v44  ;;  %v10074_v44 = vld [vmem:[#allocation77_spill] sm:$0xff]  ;;  %v10076_v13 = vld [vmem:[#allocation80_spill] sm:$0xff] }
 0x2fe   : > { %v10075_v18 = vld [vmem:[#allocation85_spill] sm:$0xff] }
 0x2ff   : > { %v8591_v58 = vpack.c.bf16 %v2750_v15, %v2749_v20  ;;  %5705 = vmatpush3.bf16.msra.mxu1 %v5964_v56  ;;  %v10071_v15 = vld [vmem:[#allocation83_spill] sm:$0xff] }
 0x300   : > { %v2702_v41 = vpop.permute.xlu0 %2701  ;;  %5706 = vmatprep.subr.bf16.mxu1 %v5965_v27  ;;  %v2988_v61 = vadd.f32 %v10071_v15, %v8352_v16 }
 0x301   : > { %v2752_v57 = vadd.f32 %v2702_v41, %v10068_v59  ;;  %v8598_v43 = vpop.permute.xlu1 %3471  ;;  %5670 = vmatprep.mubr.bf16.mxu0 %v8591_v58  ;;  %v2990_v59 = vadd.f32 %v10075_v18, %v10074_v44 }
 0x302   : > { %5627 = vmatmul.mubr.bf16.gmra.mxu1 %v3003_v63  ;;  %v3007_v63 = vpack.c.bf16 %v2987_v24, %v2986_v37  ;;  %v3008_v41 = vpack.c.bf16 %v2989_v1, %v2988_v61  ;;  %v10082_v61 = vld [vmem:[#allocation87_spill] sm:$0xff] }
 0x303   : > { %v8601_v7 = vpack.c.bf16 %v2752_v57, %v2751_v38  ;;  %5630 = vmatprep.mubr.bf16.mxu1 %v3004_v47  ;;  %5707 = vmatpush3.bf16.msra.mxu1 %v5965_v27 }
 0x304   : > { %v8605_v53 = vpop.permute.xlu0 %3469  ;;  %5708 = vmatprep.subr.bf16.mxu1 %v5966_v23 }
 0x305   : > { %v2704_v56 = vpop.permute.xlu1 %2703  ;;  %5671 = vmatmul.mubr.bf16.gmra.mxu0 %v8601_v7 }
 0x306   : > { %v2753_v50 = vadd.f32 %v2704_v56, %v10069_v26  ;;  %v10077_v56 = vld [vmem:[#allocation82_spill] sm:$0xff] }
 0x307   : > { %5709 = vmatpush3.bf16.msra.mxu1 %v5966_v23  ;;  %v10072_v23 = vld [vmem:[#allocation39_spill] sm:$0xff]  ;;  %v2991_v49 = vadd.f32 %v10077_v56, %v10076_v13  ;;  %v10085_v13 = vld [vmem:[#allocation69_spill] sm:$0xff] }
 0x308   : > { %v8619_v60 = vpop.permute.xlu0 %3473  ;;  %5790 = vmatprep.subr.bf16.mxu1 %v8610_v34 }
 0x309   : > { %v2708_v27 = vpop.permute.xlu1 %2707  ;;  %v3009_v42 = vpack.c.bf16 %v2991_v49, %v2990_v59  ;;  %v10088_v49 = vld [vmem:[#allocation7_spill] sm:$0xff] }
 0x30a   : > { %5631 = vmatmul.mubr.bf16.gmra.mxu1 %v3005_v33  ;;  %v2755_v47 = vadd.f32 %v2708_v27, %v10072_v23  ;;  %v10079_v27 = vld [vmem:[#allocation88_spill] sm:$0xff] }
 0x30b   : > { %5634 = vmatprep.mubr.bf16.mxu1 %v3006_v0  ;;  %v10078_v0 = vld [vmem:[#allocation78_spill] sm:$0xff]  ;;  %v10083_v23 = vld [vmem:[#allocation44_spill] sm:$0xff] }
 0x30c   : > { %v2706_v3 = vpop.permute.xlu0 %2705  ;;  %v2992_v37 = vadd.f32 %v10079_v27, %v10078_v0 }
 0x30d   : > { %v2754_v19 = vadd.f32 %v2706_v3, %v10070_v51  ;;  %v8628_v20 = vpop.permute.xlu1 %3475  ;;  %v10080_v3 = vld [vmem:[#allocation84_spill] sm:$0xff]  ;;  %v10081_v51 = vld [vmem:[#allocation86_spill] sm:$0xff] }
 0x30f   : > { %v8634_v55 = vpack.c.bf16 %v2754_v19, %v2753_v50 }
 0x310   : > { %v2710_v62 = vpop.permute.xlu0 %2709 }
 0x311   : > { %v2756_v48 = vadd.f32 %v2710_v62, %v10073_v4  ;;  %v8638_v29 = vpop.permute.xlu1 %3479  ;;  %5674 = vmatprep.mubr.bf16.mxu0 %v8634_v55  ;;  %v10084_v4 = vld [vmem:[#allocation38_spill] sm:$0xff] }
 0x312   : > { %5635 = vmatmul.mubr.bf16.gmra.mxu1 %v3007_v63  ;;  %v2995_v63 = vadd.f32 %v10082_v61, %v8502_v31  ;;  %v10089_v31 = vld [vmem:[#allocation11_spill] sm:$0xff] }
 0x313   : > { %v8641_v38 = vpack.c.bf16 %v2756_v48, %v2755_v47  ;;  %5638 = vmatprep.mubr.bf16.mxu1 %v3008_v41  ;;  %v3520_v27 = vadd.f32 %v8559_v21, %v10089_v31  ;;  %v10093_v61 = vld [vmem:[#allocation67_spill] sm:$0xff]  ;;  %v5970_v21 = vld [vmem:[%s9680_s2 + $0x130] sm:$0xff]  }
 0x314   : > { %v8645_v57 = vpop.permute.xlu0 %3477 }
 0x315   : > { %v2961_v22 = vpop.permute.xlu1 %2960  ;;  %5675 = vmatmul.mubr.bf16.gmra.mxu0 %v8641_v38 }
 0x316   : > { %v2994_v19 = vadd.f32 %v2961_v22, %v10081_v51  ;;  %v10086_v22 = vld [vmem:[#allocation72_spill] sm:$0xff] }
 0x317   : > { %v10087_v56 = vpack.c.bf16 %v10085_v13, %v10086_v22  ;;  %v5972_v22 = vld [vmem:[%s9680_s2 + $0x128] sm:$0xff]  }
 0x318   : > { %v2959_v33 = vpop.permute.xlu0 %2958  ;;  %v3011_v62 = vpack.c.bf16 %v2995_v63, %v2994_v19  ;;  %v10092_v19 = vld [vmem:[#allocation8_spill] sm:$0xff] }
 0x319   : > { %v2993_v1 = vadd.f32 %v2959_v33, %v10080_v3  ;;  %v2712_v26 = vpop.permute.xlu1 %2711  ;;  %v3517_v63 = vadd.f32 %v10093_v61, %v10092_v19  ;;  %v10100_v61 = vld [vmem:[#allocation46_spill] sm:$0xff] }
 0x31a   : > { %5639 = vmatmul.mubr.bf16.gmra.mxu1 %v3009_v42  ;;  %v2757_v47 = vadd.f32 %v2712_v26, %v10083_v23  ;;  %v3518_v42 = vadd.f32 %v8518_v6, %v10088_v49 }
 0x31b   : > { %v3010_v50 = vpack.c.bf16 %v2993_v1, %v2992_v37  ;;  %v10090_v37 = vld [vmem:[#allocation47_spill] sm:$0xff]  ;;  %v10091_v1 = vld [vmem:[#allocation36_spill] sm:$0xff] }
 0x31c   : > { %v8654_v24 = vpop.permute.xlu0 %3481  ;;  %v3548_v6 = vpack.c.bf16 %v3518_v42, %v3517_v63 }
 0x31d   : > { %v2716_v15 = vpop.permute.xlu1 %2715  ;;  %5642 = vmatprep.mubr.bf16.mxu1 %v3010_v50 }
 0x31e   : > { %v2759_v3 = vadd.f32 %v2716_v15, %v10090_v37 }
 0x320   : > { %v2714_v41 = vpop.permute.xlu0 %2713 }
 0x321   : > { %v2758_v48 = vadd.f32 %v2714_v41, %v10084_v4  ;;  %v8660_v18 = vpop.permute.xlu1 %3483 }
 0x322   : > { %5643 = vmatmul.mubr.bf16.gmra.mxu1 %v3011_v62  ;;  %v10094_v62 = vld [vmem:[#allocation18_spill] sm:$0xff] }
 0x323   : > { %v8662_v59 = vpack.c.bf16 %v2758_v48, %v2757_v47  ;;  %5710 = vmatprep.mubr.bf16.mxu1 %v10087_v56  ;;  %v3519_v41 = vadd.f32 %v8537_v45, %v10094_v62  ;;  %v10095_v48 = vld [vmem:[#allocation19_spill] sm:$0xff] }
 0x324   : > { %v2718_v33 = vpop.permute.xlu0 %2717  ;;  %v3522_v13 = vadd.f32 %v8571_v11, %v10095_v48  ;;  %v10096_v56 = vld [vmem:[#allocation23_spill] sm:$0xff] }
 0x325   : > { %v2760_v26 = vadd.f32 %v2718_v33, %v10091_v1  ;;  %v8673_v50 = vpop.permute.xlu1 %3487  ;;  %5678 = vmatprep.mubr.bf16.mxu0 %v8662_v59  ;;  %v3549_v15 = vpack.c.bf16 %v3520_v27, %v3519_v41  ;;  %v3524_v49 = vadd.f32 %v8605_v53, %v10096_v56  ;;  %v10097_v33 = vld [vmem:[#allocation16_spill] sm:$0xff]  ;;  %v10098_v27 = vld [vmem:[#allocation14_spill] sm:$0xff] }
 0x326   : > { %v3521_v31 = vadd.f32 %v8552_v52, %v10097_v33  ;;  %v10101_v52 = vld [vmem:[#allocation21_spill] sm:$0xff] }
 0x327   : > { %v8680_v23 = vpack.c.bf16 %v2760_v26, %v2759_v3  ;;  %v5974_v3 = vld [vmem:[%s9680_s2 + $0x120] sm:$0xff]   ;;  %v10099_v26 = vld [vmem:[#allocation37_spill] sm:$0xff] }
 0x328   : > { %v3486_v47 = vpop.permute.xlu0 %3485  ;;  %v3550_v37 = vpack.c.bf16 %v3522_v13, %v3521_v31  ;;  %v10104_v13 = vld [vmem:[#allocation53_spill] sm:$0xff] }
 0x329   : > { %v2720_v4 = vpop.permute.xlu1 %2719  ;;  %5679 = vmatmul.mubr.bf16.gmra.mxu0 %v8680_v23 }
 0x32a   : > { %5711 = vmatmul.mubr.bf16.vlgmr.msra.gmra.mxu1 %v3548_v6  ;;  %v2761_v19 = vadd.f32 %v2720_v4, %v10099_v26  ;;  %v5976_v6 = vld [vmem:[%s9680_s2 + $0x118] sm:$0xff]   ;;  %v10103_v4 = vld [vmem:[#allocation12_spill] sm:$0xff]  ;;  %v10108_v26 = vld [vmem:[#allocation42_spill] sm:$0xff] }
 0x32b   : > { %5791 = vmatpush3.bf16.msra.mxu1 %v8610_v34  ;;  %5714 = vmatprep.mubr.bf16.mxu1 %v3549_v15  ;;  %v3523_v34 = vadd.f32 %v8585_v25, %v10098_v27  ;;  %v3526_v25 = vadd.f32 %v8619_v60, %v10101_v52  ;;  %v10106_v60 = vld [vmem:[#allocation31_spill] sm:$0xff] }
 0x32c   : > { %v8689_v45 = vpop.permute.xlu0 %3489  ;;  %5792 = vmatprep.subr.bf16.mxu1 %v5970_v21  ;;  %v3527_v31 = vadd.f32 %v8628_v20, %v10106_v60  ;;  %v10114_v60 = vld [vmem:[#allocation49_spill] sm:$0xff] }
 0x32d   : > { %v2724_v42 = vpop.permute.xlu1 %2723  ;;  %v3551_v1 = vpack.c.bf16 %v3524_v49, %v3523_v34 }
 0x32e   : > { %v2763_v48 = vadd.f32 %v2724_v42, %v10103_v4  ;;  %v10111_v4 = vld [vmem:[#allocation54_spill] sm:$0xff] }
 0x32f   : > { %5793 = vmatpush3.bf16.msra.mxu1 %v5970_v21  ;;  %v10102_v21 = vld [vmem:[#allocation32_spill] sm:$0xff] }
 0x330   : > { %v2722_v11 = vpop.permute.xlu0 %2721  ;;  %5794 = vmatprep.subr.bf16.mxu1 %v5972_v22  ;;  %v3528_v15 = vadd.f32 %v8645_v57, %v10102_v21  ;;  %v5978_v57 = vld [vmem:[%s9680_s2 + $0x110] sm:$0xff]  }
 0x331   : > { %v2762_v53 = vadd.f32 %v2722_v11, %v10100_v61  ;;  %v3492_v63 = vpop.permute.xlu1 %3491 }
 0x332   : > { %5715 = vmatmul.mubr.bf16.gmra.mxu1 %v3550_v37  ;;  %v3553_v42 = vpack.c.bf16 %v3528_v15, %v3527_v31 }
 0x333   : > { %v8705_v62 = vpack.c.bf16 %v2762_v53, %v2761_v19  ;;  %5718 = vmatprep.mubr.bf16.mxu1 %v3551_v1  ;;  %5795 = vmatpush3.bf16.msra.mxu1 %v5972_v22  ;;  %v10105_v22 = vld [vmem:[#allocation13_spill] sm:$0xff]  ;;  %v3532_v19 = vadd.f32 %v3486_v47, %v10108_v26  ;;  %v10109_v53 = vld [vmem:[#allocation26_spill] sm:$0xff] }
 0x334   : > { %v2726_v41 = vpop.permute.xlu0 %2725  ;;  %5796 = vmatprep.subr.bf16.mxu1 %v5974_v3  ;;  %v3525_v33 = vadd.f32 %v8598_v43, %v10105_v22  ;;  %v10107_v43 = vld [vmem:[#allocation27_spill] sm:$0xff]  ;;  %v3529_v52 = vadd.f32 %v8638_v29, %v10109_v53  ;;  %v10113_v29 = vld [vmem:[#allocation40_spill] sm:$0xff] }
 0x335   : > { %v2764_v56 = vadd.f32 %v2726_v41, %v10104_v13  ;;  %v3496_v49 = vpop.permute.xlu1 %3495  ;;  %5682 = vmatprep.mubr.bf16.mxu0 %v8705_v62  ;;  %v3530_v20 = vadd.f32 %v8654_v24, %v10107_v43  ;;  %v5982_v24 = vld [vmem:[%s9680_s2 + $0x100] sm:$0xff]   ;;  %v10112_v13 = vld [vmem:[#allocation9_spill] sm:$0xff] }
 0x336   : > { %v3552_v34 = vpack.c.bf16 %v3526_v25, %v3525_v33  ;;  %v10110_v25 = vld [vmem:[#allocation35_spill] sm:$0xff] }
 0x337   : > { %v8721_v27 = vpack.c.bf16 %v2764_v56, %v2763_v48  ;;  %5797 = vmatpush3.bf16.msra.mxu1 %v5974_v3  ;;  %v5980_v3 = vld [vmem:[%s9680_s2 + $0x108] sm:$0xff]   ;;  %v3531_v41 = vadd.f32 %v8660_v18, %v10110_v25  ;;  %v3534_v18 = vadd.f32 %v8689_v45, %v10113_v29  ;;  %v10119_v25 = vmov 0.0  }
 0x338   : > { %v3494_v37 = vpop.permute.xlu0 %3493  ;;  %5798 = vmatprep.subr.bf16.mxu1 %v5976_v6 }
 0x339   : > { %v2728_v11 = vpop.permute.xlu1 %2727  ;;  %5683 = vmatmul.mubr.bf16.gmra.mxu0 %v8721_v27  ;;  %v3555_v15 = vpack.c.bf16 %v3532_v19, %v3531_v41  ;;  %v3536_v31 = vadd.f32 %v3494_v37, %v10114_v60  ;;  %v10118_v19 = vld [vmem:[#allocation45_spill] sm:$0xff] }
 0x33a   : > { %5719 = vmatmul.mubr.bf16.gmra.mxu1 %v3552_v34  ;;  %v2765_v48 = vadd.f32 %v2728_v11, %v10111_v4  ;;  %v10115_v34 = vld [vmem:[#allocation57_spill] sm:$0xff]  ;;  %v3535_v53 = vadd.f32 %v3492_v63, %v10118_v19  ;;  %v10122_v4 = vld [vmem:[#allocation43_spill] sm:$0xff] }
 0x33b   : > { %5722 = vmatprep.mubr.bf16.mxu1 %v3553_v42  ;;  %5799 = vmatpush3.bf16.msra.mxu1 %v5976_v6  ;;  %v3554_v6 = vpack.c.bf16 %v3530_v20, %v3529_v52  ;;  %v10116_v42 = vld [vmem:[#allocation58_spill] sm:$0xff]  ;;  %v10117_v20 = vld [vmem:[#allocation33_spill] sm:$0xff]  ;;  %v3537_v63 = vadd.f32 %v3496_v49, %v10122_v4 }
 0x33c   : > { %v3498_v1 = vpop.permute.xlu0 %3497  ;;  %5800 = vmatprep.subr.bf16.mxu1 %v5978_v57  ;;  %v3533_v26 = vadd.f32 %v8673_v50, %v10117_v20  ;;  %v3557_v37 = vpack.c.bf16 %v3536_v31, %v3535_v53  ;;  %v10125_v31 = vld [vmem:[#allocation56_spill] sm:$0xff]  ;;  %v10128_v49 = vld [vmem:[#allocation70_spill] sm:$0xff] }
 0x33d   : > { %v2732_v61 = vpop.permute.xlu1 %2731 }
 0x33e   : > { %v3556_v45 = vpack.c.bf16 %v3534_v18, %v3533_v26  ;;  %v10127_v26 = vld [vmem:[#allocation61_spill] sm:$0xff] }
 0x33f   : > { %5801 = vmatpush3.bf16.msra.mxu1 %v5978_v57  ;;  %v2767_v57 = vadd.f32 %v2732_v61, %v10115_v34  ;;  %v10120_v61 = vld [vmem:[#allocation48_spill] sm:$0xff] }
 0x340   : > { %v2730_v21 = vpop.permute.xlu0 %2729  ;;  %5802 = vmatprep.subr.bf16.mxu1 %v5980_v3 }
 0x341   : > { %v2766_v47 = vadd.f32 %v2730_v21, %v10112_v13  ;;  %v3500_v56 = vpop.permute.xlu1 %3499  ;;  %v10123_v13 = vld [vmem:[#allocation50_spill] sm:$0xff] }
 0x342   : > { %5723 = vmatmul.mubr.bf16.gmra.mxu1 %v3554_v6  ;;  %v3538_v6 = vadd.f32 %v3498_v1, %v10120_v61 }
 0x343   : > { %v8742_v22 = vpack.c.bf16 %v2766_v47, %v2765_v48  ;;  %5726 = vmatprep.mubr.bf16.mxu1 %v3555_v15  ;;  %5803 = vmatpush3.bf16.msra.mxu1 %v5980_v3  ;;  %v10121_v15 = vld [vmem:[#allocation52_spill] sm:$0xff] }
 0x344   : > { %v2734_v33 = vpop.permute.xlu0 %2733  ;;  %5804 = vmatprep.subr.bf16.mxu1 %v5982_v24  ;;  %v3558_v47 = vpack.c.bf16 %v3538_v6, %v3537_v63 }
 0x345   : > { %v2768_v43 = vadd.f32 %v2734_v33, %v10116_v42  ;;  %v3504_v11 = vpop.permute.xlu1 %3503  ;;  %5686 = vmatprep.mubr.bf16.mxu0 %v8742_v22  ;;  %v10124_v33 = vld [vmem:[#allocation59_spill] sm:$0xff]  ;;  %v10126_v42 = vld [vmem:[#allocation6_spill] sm:$0xff] }
 0x347   : > { %v8753_v3 = vpack.c.bf16 %v2768_v43, %v2767_v57  ;;  %5805 = vmatpush3.bf16.msra.mxu1 %v5982_v24  ;;  %v3539_v24 = vadd.f32 %v3500_v56, %v10123_v13  ;;  %v10129_v56 = vld [vmem:[#allocation15_spill] sm:$0xff] }
 0x348   : > { %v3502_v52 = vpop.permute.xlu0 %3501  ;;  %5873 = vmatprep.subr.mxu1 %v10119_v25 }
 0x349   : > { %v2736_v41 = vpop.permute.xlu1 %2735  ;;  %5687 = vmatmul.mubr.bf16.gmra.mxu0 %v8753_v3  ;;  %v3540_v50 = vadd.f32 %v3502_v52, %v10121_v15  ;;  %v10131_v15 = vld [vmem:[#allocation65_spill] sm:$0xff] }
 0x34a   : > { %5727 = vmatmul.mubr.bf16.gmra.mxu1 %v3556_v45  ;;  %v2769_v60 = vadd.f32 %v2736_v41, %v10124_v33  ;;  %v3541_v45 = vadd.f32 %v3504_v11, %v10129_v56  ;;  %v10130_v41 = vld [vmem:[#allocation55_spill] sm:$0xff] }
 0x34b   : > { %5730 = vmatprep.mubr.bf16.mxu1 %v3557_v37  ;;  %v3559_v18 = vpack.c.bf16 %v3540_v50, %v3539_v24  ;;  %v10132_v24 = vld [vmem:[#allocation62_spill] sm:$0xff] }
 0x34c   : > { %v3506_v21 = vpop.permute.xlu0 %3505 }
 0x34d   : > { %v2740_v48 = vpop.permute.xlu1 %2739  ;;  %v3542_v1 = vadd.f32 %v3506_v21, %v10126_v42 }
 0x34e   : > { %v2771_v19 = vadd.f32 %v2740_v48, %v10127_v26 }
 0x34f   : > { %v3560_v37 = vpack.c.bf16 %v3542_v1, %v3541_v45 }
 0x350   : > { %v2738_v29 = vpop.permute.xlu0 %2737 }
 0x351   : > { %v2770_v34 = vadd.f32 %v2738_v29, %v10125_v31  ;;  %v3508_v43 = vpop.permute.xlu1 %3507 }
 0x352   : > { %5731 = vmatmul.mubr.bf16.gmra.mxu1 %v3558_v47  ;;  %v3543_v6 = vadd.f32 %v3508_v43, %v10130_v41  ;;  %v5045_v47 = vpack.c.bf16 %v10132_v24, %v7615_v32  ;;  %v10136_v32 = vld [vmem:[#allocation5_spill] sm:$0xff] }
 0x353   : > { %v2786_v57 = vpack.c.bf16 %v2770_v34, %v2769_v60  ;;  %5734 = vmatprep.mubr.bf16.mxu1 %v3559_v18  ;;  %v10145_v60 = vld [vmem:[#allocation68_spill] sm:$0xff] }
 0x354   : > { %v2742_v20 = vpop.permute.xlu0 %2741 }
 0x355   : > { %v2772_v53 = vadd.f32 %v2742_v20, %v10128_v49  ;;  %5690 = vmatprep.mubr.bf16.mxu0 %v2786_v57  ;;  %v3512_v4 = vpop.permute.xlu1 %3511  ;;  %v10149_v20 = vld [vmem:[#allocation51_spill] sm:$0xff] }
 0x356   : > { %v3545_v48 = vadd.f32 %v3512_v4, %v8008_v30  ;;  %v10135_v30 = vld [vmem:[#allocation4_spill] sm:$0xff] }
 0x357   : > { %v2787_v52 = vpack.c.bf16 %v2772_v53, %v2771_v19  ;;  %v5051_v33 = vpack.c.bf16 %v10135_v30, %v8092_v10  ;;  %v10138_v10 = vld [vmem:[#allocation66_spill] sm:$0xff] }
 0x358   : > { %v3510_v61 = vpop.permute.xlu0 %3509 }
 0x359   : > { %v3544_v50 = vadd.f32 %v3510_v61, %v10131_v15  ;;  %5691 = vmatmul.mubr.bf16.gmra.mxu0 %v2787_v52 }
 0x35a   : > { %5735 = vmatmul.mubr.bf16.gmra.mxu1 %v3560_v37  ;;  %5758 = vmatprep.mubr.bf16.mxu0 %v8545_v39  ;;  %v10134_v39 = vld [vmem:[#allocation63_spill] sm:$0xff] }
 0x35b   : > { %v3561_v21 = vpack.c.bf16 %v3544_v50, %v3543_v6  ;;  %v5048_v18 = vpack.c.bf16 %v10134_v39, %v8082_v36  ;;  %v5060_v36 = vpack.c.bf16 %v10138_v10, %v8182_v54  ;;  %v10142_v54 = vld [vmem:[#allocation75_spill] sm:$0xff] }
 0x35c   : > { %v3514_v63 = vpop.permute.xlu0 %3513 }
 0x35d   : > { %v3546_v13 = vadd.f32 %v3514_v63, %v7980_v28  ;;  %5738 = vmatprep.mubr.bf16.mxu1 %v3561_v21  ;;  %v5054_v28 = vpack.c.bf16 %v10136_v32, %v8131_v9  ;;  %v10140_v9 = vld [vmem:[#allocation73_spill] sm:$0xff] }
 0x35f   : > { %v3562_v11 = vpack.c.bf16 %v3546_v13, %v3545_v48 }
 0x361   : > { %5759 = vmatmul.mubr.bf16.vlgmr.msra.gmra.mxu0 %v8555_v5  ;;  %v10137_v5 = vld [vmem:[#allocation64_spill] sm:$0xff] }
 0x362   : > { %5739 = vmatmul.mubr.bf16.gmra.mxu1 %v3562_v11  ;;  %5762 = vmatprep.mubr.bf16.mxu0 %v8591_v58  ;;  %v5057_v58 = vpack.c.bf16 %v10137_v5, %v8142_v14  ;;  %v5066_v14 = vpack.c.bf16 %v10140_v9, %v8269_v35  ;;  %v3823_v35 = vpop.permute.xlu0 %3822  ;;  %v4486_v9 = vld [vmem:[%s9688_s10 + $0x68] sm:$0xff] }
 0x363   : > { %5806 = vmatprep.mubr.msk.bf16.mxu1 %vm7195_vm5, %v5045_v47 }
 0x369   : > { %5763 = vmatmul.mubr.bf16.gmra.mxu0 %v8601_v7  ;;  %v10139_v7 = vld [vmem:[#allocation71_spill] sm:$0xff] }
 0x36a   : > { %5766 = vmatprep.mubr.bf16.mxu0 %v8634_v55  ;;  %5807 = vmatmul.mubr.msk.bf16.vlgmr.msra.gmra.mxu1 %vm7195_vm5, %v5048_v18  ;;  %v5063_v55 = vpack.c.bf16 %v10139_v7, %v8196_v12  ;;  %v5072_v12 = vpack.c.bf16 %v10142_v54, %v8335_v40  ;;  %v10146_v40 = vld [vmem:[#allocation79_spill] sm:$0xff] }
 0x36b   : > { %5810 = vmatprep.mubr.msk.bf16.mxu1 %vm7195_vm5, %v5051_v33  ;;  %v5078_v34 = vpack.c.bf16 %v10146_v40, %v10074_v44  ;;  %v10150_v44 = vmov 0.0|0.0  }
 0x371   : > { %5767 = vmatmul.mubr.bf16.gmra.mxu0 %v8641_v38  ;;  %v10141_v38 = vld [vmem:[#allocation74_spill] sm:$0xff] }
 0x372   : > { %5770 = vmatprep.mubr.bf16.mxu0 %v8662_v59  ;;  %5811 = vmatmul.mubr.msk.bf16.gmra.mxu1 %vm7195_vm5, %v5054_v28  ;;  %v5069_v59 = vpack.c.bf16 %v10141_v38, %v8286_v17  ;;  %v3821_v17 = vpop.permute.xlu1 %3820  ;;  %v4488_v28 = vld [vmem:[%s9688_s10 + $0x78] sm:$0xff] }
 0x373   : > { %5814 = vmatprep.mubr.msk.bf16.mxu1 %vm7195_vm5, %v5057_v58  ;;  %v3824_v31 = vadd.f32 %v3821_v17, %v10145_v60  ;;  %5839 = vmatpush3.msra.mxu0 %v4488_v28 }
 0x374   : > { %5840 = vmatprep.subr.mxu0 %v10119_v25 }
 0x379   : > { %5771 = vmatmul.mubr.bf16.gmra.mxu0 %v8680_v23  ;;  %v10143_v23 = vld [vmem:[#allocation76_spill] sm:$0xff] }
 0x37a   : > { %5774 = vmatprep.mubr.bf16.mxu0 %v8705_v62  ;;  %5815 = vmatmul.mubr.msk.bf16.gmra.mxu1 %vm7195_vm5, %v5060_v36  ;;  %v5075_v62 = vpack.c.bf16 %v10143_v23, %v8352_v16  ;;  %v10147_v16 = vld [vmem:[#allocation81_spill] sm:$0xff]  ;;  %v4487_v36 = vld [vmem:[%s9688_s10 + $0x70] sm:$0xff] }
 0x37b   : > { %5818 = vmatprep.mubr.msk.bf16.mxu1 %vm7195_vm5, %v5063_v55  ;;  %v5081_v1 = vpack.c.bf16 %v10147_v16, %v10078_v0  ;;  %v8847_v0 = vpop.f32.mrf.mxu0  ;;  %5841 = vmatpush3.msra.mxu0 %v4487_v36 }
 0x37c   : > { %5842 = vmatprep.subr.mxu0 %v10119_v25 }
 0x37d   : > { %v3319_v19 = vpop.f32.mrf.mxu0  ;;  %5843 = vmatpush3.msra.mxu0 %v4486_v9 }
 0x37e   : > { %5844 = vmatprep.subr.mxu0 %v10119_v25 }
 0x381   : > { %5775 = vmatmul.mubr.bf16.gmra.mxu0 %v8721_v27  ;;  %v10144_v27 = vld [vmem:[#allocation60_spill] sm:$0xff] }
 0x382   : > { %5778 = vmatprep.mubr.bf16.mxu0 %v8742_v22  ;;  %5819 = vmatmul.mubr.msk.bf16.gmra.mxu1 %vm7195_vm5, %v5066_v14  ;;  %v3825_v22 = vadd.f32 %v3823_v35, %v10144_v27 }
 0x383   : > { %5822 = vmatprep.mubr.msk.bf16.mxu1 %vm7195_vm5, %v5069_v59 }
 0x384   : > { %v3826_v42 = vpack.c.bf16 %v3825_v22, %v3824_v31  ;;  %v4484_v22 = vld [vmem:[%s9688_s10 + $0x58] sm:$0xff] }
 0x389   : > { %5779 = vmatmul.mubr.bf16.gmra.mxu0 %v8753_v3  ;;  %v5084_v3 = vpack.c.bf16 %v8484_v46, %v10081_v51 }
 0x38a   : > { %5782 = vmatprep.mubr.bf16.mxu0 %v2786_v57  ;;  %5823 = vmatmul.mubr.msk.bf16.gmra.mxu1 %vm7195_vm5, %v5072_v12  ;;  %v10148_v57 = vld [vmem:[#allocation89_spill] sm:$0xff]  ;;  %v4485_v12 = vld [vmem:[%s9688_s10 + $0x60] sm:$0xff] }
 0x38b   : > { %5826 = vmatprep.mubr.msk.bf16.mxu1 %vm7195_vm5, %v5075_v62  ;;  %v5087_v43 = vpack.c.bf16 %v8510_v8, %v10148_v57  ;;  %v8855_v8 = vpop.f32.mrf.mxu0  ;;  %5845 = vmatpush3.msra.mxu0 %v4485_v12 }
 0x38c   : > { %5846 = vmatprep.subr.mxu0 %v10119_v25 }
 0x38d   : > { %v8859_v45 = vpop.f32.mrf.mxu0  ;;  %5847 = vmatpush3.msra.mxu0 %v4484_v22 }
 0x38e   : > { %5848 = vmatprep.subr.mxu0 %v10119_v25 }
 0x391   : > { %5783 = vmatmul.mubr.bf16.gmra.mxu0 %v2787_v52 }
 0x392   : > { %5786 = vmatprep.mubr.bf16.mxu0 %v3826_v42  ;;  %5827 = vmatmul.mubr.msk.bf16.gmra.mxu1 %vm7195_vm5, %v5078_v34  ;;  %v4483_v34 = vld [vmem:[%s9688_s10 + $0x50] sm:$0xff] }
 0x393   : > { %5830 = vmatprep.mubr.msk.bf16.mxu1 %vm7195_vm5, %v5081_v1  ;;  %5849 = vmatpush3.msra.mxu0 %v4483_v34  ;;  %v4482_v1 = vld [vmem:[%s9688_s10 + $0x48] sm:$0xff] }
 0x394   : > { %5850 = vmatprep.subr.mxu0 %v10119_v25 }
 0x395   : > { %5851 = vmatpush3.msra.mxu0 %v4482_v1 }
 0x396   : > { %5852 = vmatprep.subr.mxu0 %v10119_v25 }
 0x399   : > { %5787 = vmatmul.mubr.bf16.gmra.mxu0 %v10149_v20 }
 0x39a   : > { %5831 = vmatmul.mubr.msk.bf16.gmra.mxu1 %vm7195_vm5, %v5084_v3  ;;  %5870 = vmatprep.mubr.msk.f32.mxu0 %vm6031_vm0, %v10119_v25 }
 0x39b   : > { %5834 = vmatprep.mubr.msk.bf16.mxu1 %vm7195_vm5, %v5087_v43  ;;  %v4481_v43 = vld [vmem:[%s9688_s10 + $0x40] sm:$0xff] }
 0x39c   : > { %5853 = vmatpush3.msra.mxu0 %v4481_v43 }
 0x39d   : > { %5854 = vmatprep.subr.mxu0 %v10119_v25 }
 0x3a2   : > { %5835 = vmatmul.mubr.bf16.gmra.mxu1 %v10150_v44 }
 0x3a3   : > { %5877 = vmatprep.mubr.msk.f32.mxu1 %vm6031_vm0, %v10119_v25 }
 0x3aa   : > { %v8849_v26 = vpop.f32.mrf.mxu1 }
 0x3ac   : > { %v3110_v49 = vpop.f32.mrf.mxu1 }
 0x3ad   : > { %v8851_v46 = vadd.f32 %v3319_v19, %v3110_v49  ;;  %v3328_v49 = vadd.f32 %v8847_v0, %v8849_v26 }
 0x3ae   : > { %v8853_v51 = vpop.f32.mrf.mxu1 }
 0x3b0   : > { %v8857_v53 = vpop.f32.mrf.mxu1 }
 0x3b2   : > { %v5620_v56 = vpop.f32.mrf.mxu1 }
 0x3b4   : > { %v8861_v52 = vpop.f32.mrf.mxu1 }
 0x3b5   : > { %v5668_v37 = vpop.f32.mrf.mxu0 }
 0x3b6   : > { %v8863_v61 = vadd.f32 %v5668_v37, %v5620_v56  ;;  %v5621_v41 = vpop.f32.mrf.mxu1  ;;  %v4480_v37 = vld [vmem:[%s9688_s10 + $0x38] sm:$0xff] }
 0x3b7   : > { %v8865_v6 = vpop.f32.mrf.mxu0  ;;  %5855 = vmatpush3.msra.mxu0 %v4480_v37 }
 0x3b8   : > { %v8867_v15 = vpop.f32.mrf.mxu1  ;;  %5856 = vmatprep.subr.mxu0 %v10119_v25 }
 0x3b9   : > { %v5669_v50 = vpop.f32.mrf.mxu0 }
 0x3ba   : > { %v8869_v4 = vadd.f32 %v5669_v50, %v5621_v41  ;;  %v5624_v21 = vpop.f32.mrf.mxu1 }
 0x3bb   : > { %v8875_v24 = vpop.f32.mrf.mxu0 }
 0x3bc   : > { %v8871_v63 = vpop.f32.mrf.mxu1 }
 0x3be   : > { %v5625_v48 = vpop.f32.mrf.mxu1 }
 0x3c0   : > { %v8873_v13 = vpop.f32.mrf.mxu1 }
 0x3c2   : > { %v5628_v11 = vpop.f32.mrf.mxu1 }
 0x3c4   : > { %v8877_v47 = vpop.f32.mrf.mxu1 }
 0x3c5   : > { %v5672_v29 = vpop.f32.mrf.mxu0 }
 0x3c6   : > { %v8879_v39 = vadd.f32 %v5672_v29, %v5624_v21  ;;  %v5629_v18 = vpop.f32.mrf.mxu1  ;;  %v3331_v29 = vadd.f32 %v8855_v8, %v8853_v51 }
 0x3c7   : > { %v8881_v30 = vpop.f32.mrf.mxu0 }
 0x3c8   : > { %v8883_v33 = vpop.f32.mrf.mxu1 }
 0x3c9   : > { %v5673_v32 = vpop.f32.mrf.mxu0 }
 0x3ca   : > { %v8888_v5 = vadd.f32 %v5673_v32, %v5625_v48  ;;  %v5632_v58 = vpop.f32.mrf.mxu1 }
 0x3cb   : > { %v8904_v38 = vpop.f32.mrf.mxu0 }
 0x3cc   : > { %v8891_v10 = vpop.f32.mrf.mxu1 }
 0x3ce   : > { %v5633_v7 = vpop.f32.mrf.mxu1 }
 0x3d0   : > { %v8897_v55 = vpop.f32.mrf.mxu1 }
 0x3d2   : > { %v8902_v14 = vpop.f32.mrf.mxu1 }
 0x3d4   : > { %v8907_v59 = vpop.f32.mrf.mxu1 }
 0x3d5   : > { %v5676_v54 = vpop.f32.mrf.mxu0 }
 0x3d6   : > { %v8912_v23 = vadd.f32 %v5676_v54, %v5628_v11  ;;  %v5637_v62 = vpop.f32.mrf.mxu1 }
 0x3d7   : > { %v8914_v35 = vpop.f32.mrf.mxu0 }
 0x3d8   : > { %v8917_v17 = vpop.f32.mrf.mxu1 }
 0x3d9   : > { %v5677_v27 = vpop.f32.mrf.mxu0 }
 0x3da   : > { %v8922_v60 = vadd.f32 %v5677_v27, %v5629_v18  ;;  %v8924_v31 = vpop.f32.mrf.mxu1  ;;  %v4479_v18 = vld [vmem:[%s9688_s10 + $0x30] sm:$0xff] }
 0x3db   : > { %v8950_v44 = vpop.f32.mrf.mxu0  ;;  %5857 = vmatpush3.msra.mxu0 %v4479_v18 }
 0x3dc   : > { %v8927_v40 = vpop.f32.mrf.mxu1  ;;  %5858 = vmatprep.subr.mxu0 %v10119_v25 }
 0x3dd   : > { %10151 = vst [vmem:[#allocation17_spill] sm:$0xff] %v8927_v40 }
 0x3de   : > { %v8932_v42 = vpop.f32.mrf.mxu1 }
 0x3e0   : > { %v8935_v16 = vpop.f32.mrf.mxu1 }
 0x3e1   : > { %10152 = vst [vmem:[#allocation10_spill] sm:$0xff] %v8935_v16 }
 0x3e2   : > { %v8940_v3 = vpop.f32.mrf.mxu1 }
 0x3e4   : > { %v8943_v57 = vpop.f32.mrf.mxu1 }
 0x3e5   : > { %10153 = vst [vmem:[#allocation22_spill] sm:$0xff] %v8943_v57 }
 0x3e6   : > { %v8948_v20 = vpop.f32.mrf.mxu1 }
 0x3e8   : > { %v8953_v19 = vpop.f32.mrf.mxu1 }
 0x3e9   : > { %10154 = vst [vmem:[#allocation24_spill] sm:$0xff] %v8953_v19  ;;  %v5680_v56 = vpop.f32.mrf.mxu0 }
 0x3ea   : > { %v8960_v41 = vadd.f32 %v5680_v56, %v5632_v58  ;;  %v5712_v50 = vpop.f32.mrf.mxu1 }
 0x3eb   : > { %v8962_v21 = vadd.f32 %v5712_v50, %v3328_v49  ;;  %v8964_v48 = vpop.f32.mrf.mxu0 }
 0x3ec   : > { %v3661_v11 = vpop.f32.mrf.mxu1 }
 0x3ed   : > { %v8970_v0 = vadd.f32 %v3661_v11, %v8851_v46  ;;  %v5681_v26 = vpop.f32.mrf.mxu0 }
 0x3ee   : > { %v8975_v32 = vadd.f32 %v5681_v26, %v5633_v7  ;;  %v5713_v28 = vpop.f32.mrf.mxu1  ;;  %v4564_v26 = vld [vmem:[%s9691_s13] sm:$0xff] }
 0x3ef   : > { %v8977_v58 = vadd.f32 %v5713_v28, %v3331_v29  ;;  %v8987_v54 = vpop.f32.mrf.mxu0  ;;  %v4565_v29 = vld [vmem:[%s9691_s13 + $0x8] sm:$0xff] }
 0x3f0   : > { %v8980_v36 = vpop.f32.mrf.mxu1  ;;  %5874 = vmatpush3.msra.mxu1 %v4565_v29 }
 0x3f1   : > { %5875 = vmatprep.subr.mxu1 %v10119_v25 }
 0x3f2   : > { %v5716_v9 = vpop.f32.mrf.mxu1  ;;  %5876 = vmatpush3.msra.mxu1 %v4564_v26 }
 0x3f3   : > { %v8983_v51 = vadd.f32 %v5716_v9, %v8863_v61 }
 0x3f4   : > { %v8985_v46 = vpop.f32.mrf.mxu1 }
 0x3f6   : > { %v5717_v8 = vpop.f32.mrf.mxu1 }
 0x3f7   : > { %v8990_v7 = vadd.f32 %v5717_v8, %v8869_v4 }
 0x3f8   : > { %v8992_v12 = vpop.f32.mrf.mxu1 }
 0x3f9   : > { %v5684_v27 = vpop.f32.mrf.mxu0 }
 0x3fa   : > { %v3408_v22 = vadd.f32 %v5684_v27, %v8902_v14  ;;  %v5720_v34 = vpop.f32.mrf.mxu1  ;;  %v4478_v14 = vld [vmem:[%s9688_s10 + $0x28] sm:$0xff] }
 0x3fb   : > { %v8996_v1 = vadd.f32 %v5720_v34, %v8879_v39  ;;  %v8998_v43 = vpop.f32.mrf.mxu0  ;;  %v4477_v39 = vld [vmem:[%s9688_s10 + $0x20] sm:$0xff]  ;;  %5859 = vmatpush3.msra.mxu0 %v4478_v14  ;;  %v4474_v27 = vld [vmem:[%s9688_s10 + $0x8] sm:$0xff] }
 0x3fc   : > { %v9000_v61 = vpop.f32.mrf.mxu1  ;;  %5860 = vmatprep.subr.mxu0 %v10119_v25 }
 0x3fd   : > { %v5685_v49 = vpop.f32.mrf.mxu0  ;;  %5861 = vmatpush3.msra.mxu0 %v4477_v39 }
 0x3fe   : > { %v3411_v56 = vadd.f32 %v5685_v49, %v5637_v62  ;;  %v5721_v37 = vpop.f32.mrf.mxu1  ;;  %5862 = vmatprep.subr.mxu0 %v10119_v25 }
 0x3ff   : > { %v9003_v50 = vadd.f32 %v5721_v37, %v8888_v5  ;;  %v4476_v5 = vld [vmem:[%s9688_s10 + $0x18] sm:$0xff]  ;;  %v9035_v9 = vpop.f32.mrf.mxu0  ;;  %v4473_v37 = vld [vmem:[%s9688_s10] sm:$0xff] }
 0x400   : > { %v9005_v4 = vpop.f32.mrf.mxu1  ;;  %5863 = vmatpush3.msra.mxu0 %v4476_v5 }
 0x401   : > { %5864 = vmatprep.subr.mxu0 %v10119_v25 }
 0x402   : > { %v5724_v11 = vpop.f32.mrf.mxu1 }
 0x403   : > { %v9015_v62 = vadd.f32 %v5724_v11, %v8912_v23  ;;  %v4475_v23 = vld [vmem:[%s9688_s10 + $0x10] sm:$0xff] }
 0x404   : > { %v9028_v18 = vpop.f32.mrf.mxu1  ;;  %5865 = vmatpush3.msra.mxu0 %v4475_v23 }
 0x405   : > { %5866 = vmatprep.subr.mxu0 %v10119_v25 }
 0x406   : > { %v5725_v28 = vpop.f32.mrf.mxu1  ;;  %5867 = vmatpush3.msra.mxu0 %v4474_v27 }
 0x407   : > { %v9038_v8 = vadd.f32 %v5725_v28, %v8922_v60  ;;  %5868 = vmatprep.subr.mxu0 %v10119_v25 }
 0x408   : > { %v9044_v34 = vpop.f32.mrf.mxu1  ;;  %5869 = vmatpush3.msra.mxu0 %v4473_v37 }
 0x409   : > { %v5688_v49 = vpop.f32.mrf.mxu0 }
 0x40a   : > { %v3424_v14 = vadd.f32 %v5688_v49, %v8924_v31  ;;  %v5728_v60 = vpop.f32.mrf.mxu1 }
 0x40b   : > { %v9052_v39 = vadd.f32 %v5728_v60, %v8960_v41  ;;  %v9054_v11 = vpop.f32.mrf.mxu0 }
 0x40c   : > { %10155 = vst [vmem:[#allocation25_spill] sm:$0xff] %v9054_v11  ;;  %v9057_v5 = vpop.f32.mrf.mxu1 }
 0x40d   : > { %v5689_v29 = vpop.f32.mrf.mxu0 }
 0x40e   : > { %v3427_v26 = vadd.f32 %v5689_v29, %v8932_v42  ;;  %v5729_v23 = vpop.f32.mrf.mxu1 }
 0x40f   : > { %v9061_v28 = vadd.f32 %v5729_v23, %v8975_v32  ;;  %v9069_v2 = vpop.f32.mrf.mxu0 }
 0x410   : > { %v9063_v31 = vpop.f32.mrf.mxu1  ;;  %10156 = vst [vmem:[#allocation20_spill] sm:$0xff] %v9069_v2 }
 0x412   : > { %v5732_v27 = vpop.f32.mrf.mxu1 }
 0x413   : > { %v9065_v49 = vadd.f32 %v5732_v27, %v3408_v22 }
 0x414   : > { %v9067_v41 = vpop.f32.mrf.mxu1 }
 0x416   : > { %v5733_v60 = vpop.f32.mrf.mxu1 }
 0x417   : > { %v9071_v25 = vadd.f32 %v5733_v60, %v3411_v56 }
 0x418   : > { %v9073_v37 = vpop.f32.mrf.mxu1 }
 0x419   : > { %10157 = vst [vmem:[#allocation28_spill] sm:$0xff] %v9071_v25  ;;  %v5692_v19 = vpop.f32.mrf.mxu0 }
 0x41a   : > { %v3440_v42 = vadd.f32 %v5692_v19, %v8940_v3  ;;  %v5736_v29 = vpop.f32.mrf.mxu1 }
 0x41b   : > { %v9076_v32 = vadd.f32 %v5736_v29, %v3424_v14  ;;  %v9078_v23 = vpop.f32.mrf.mxu0 }
 0x41c   : > { %10159 = vst [vmem:[#allocation34_spill] sm:$0xff] %v9078_v23  ;;  %v9080_v57 = vpop.f32.mrf.mxu1 }
 0x41d   : > { %10158 = vst [vmem:[#allocation30_spill] sm:$0xff] %v9076_v32  ;;  %10160 = vst [vmem:[#allocation29_spill] sm:$0xff] %v9080_v57  ;;  %v5693_v22 = vpop.f32.mrf.mxu0 }
 0x41e   : > { %v3443_v27 = vadd.f32 %v5693_v22, %v8948_v20  ;;  %v5737_v16 = vpop.f32.mrf.mxu1  ;;  %v3323_v22 = vadd.f32 %v8859_v45, %v8857_v53  ;;  %v9108_v53 = vld [vmem:[%s9686_s8] ss:$0 sm:$0xff] }
 0x41f   : > { %v9083_v11 = vadd.f32 %v5737_v16, %v3427_v26  ;;  %v9085_v56 = vpop.f32.mrf.mxu0 }
 0x420   : > { %10162 = vst [vmem:[#allocation39_spill] sm:$0xff] %v9085_v56  ;;  %v9087_v60 = vpop.f32.mrf.mxu1 }
 0x421   : > { %10161 = vst [vmem:[#allocation83_spill] sm:$0xff] %v9083_v11  ;;  %10163 = vst [vmem:[#allocation41_spill] sm:$0xff] %v9087_v60  ;;  %v5760_v2 = vpop.f32.mrf.mxu0 }
 0x422   : > { %v5740_v25 = vpop.f32.mrf.mxu1 }
 0x423   : > { %v9089_v3 = vadd.f32 %v5740_v25, %v3440_v42  ;;  %v3925_v19 = vpop.f32.mrf.mxu0  ;;  %v4054_v25 = vadd.f32 %v5760_v2, %v8962_v21 }
 0x424   : > { %v9091_v14 = vpop.f32.mrf.mxu1  ;;  %v4052_v56 = vadd.f32 %v3925_v19, %v8970_v0 }
 0x425   : > { %10164 = vst [vmem:[#allocation77_spill] sm:$0xff] %v9089_v3  ;;  %10165 = vst [vmem:[#allocation85_spill] sm:$0xff] %v9091_v14  ;;  %v5761_v29 = vpop.f32.mrf.mxu0  ;;  %v3789_v3 = vadd.f32 %v8980_v36, %v3323_v22 }
 0x426   : > { %v5741_v23 = vpop.f32.mrf.mxu1 }
 0x427   : > { %v9093_v32 = vadd.f32 %v5741_v23, %v3443_v27  ;;  %v3928_v57 = vpop.f32.mrf.mxu0 }
 0x428   : > { %v9095_v20 = vpop.f32.mrf.mxu1  ;;  %v4053_v40 = vadd.f32 %v3928_v57, %v3789_v3 }
 0x429   : > { %10166 = vst [vmem:[#allocation80_spill] sm:$0xff] %v9093_v32  ;;  %10167 = vst [vmem:[#allocation82_spill] sm:$0xff] %v9095_v20  ;;  %v5764_v16 = vpop.f32.mrf.mxu0  ;;  %v3336_v32 = vadd.f32 %v8865_v6, %v8861_v52  ;;  %v4055_v20 = vadd.f32 %v5761_v29, %v8977_v58  ;;  %v3339_v52 = vadd.f32 %v8875_v24, %v8867_v15  ;;  %v9118_v58 = vld [vmem:[%s9687_s9] ss:$0 sm:$0xff] }
 0x42a   : > { %v5808_v26 = vpop.f32.mrf.mxu1 }
 0x42b   : > { %v3941_v11 = vpop.f32.mrf.mxu0  ;;  %v4326_v23 = vadd.f32 %v5808_v26, %v4054_v25  ;;  %v3792_v21 = vadd.f32 %v8985_v46, %v3336_v32  ;;  %v3793_v32 = vadd.f32 %v8992_v12, %v3339_v52 }
 0x42c   : > { %v4197_v42 = vpop.f32.mrf.mxu1 }
 0x42d   : > { %v4324_v14 = vadd.f32 %v4197_v42, %v4052_v56  ;;  %v5765_v60 = vpop.f32.mrf.mxu0  ;;  %v4365_v6 = vmul.f32 %v9108_v53, %v4326_v23  ;;  %v4056_v3 = vadd.f32 %v3941_v11, %v3792_v21  ;;  %v3352_v11 = vadd.f32 %v8881_v30, %v8871_v63 }
 0x42e   : > { %v5809_v27 = vpop.f32.mrf.mxu1  ;;  %v4059_v12 = vadd.f32 %v5765_v60, %v8990_v7  ;;  %v3355_v60 = vadd.f32 %v8904_v38, %v8873_v13 }
 0x42f   : > { %v3944_v45 = vpop.f32.mrf.mxu0  ;;  %v4363_v0 = vmul.f32 %v9108_v53, %v4324_v14  ;;  %v4327_v36 = vadd.f32 %v5809_v27, %v4055_v20  ;;  %v9133_v25 = vadd.f32 %v9118_v58, %v4365_v6  ;;  %v3796_v21 = vadd.f32 %v9000_v61, %v3352_v11 }
 0x430   : > { %v4200_v2 = vpop.f32.mrf.mxu1  ;;  %v3368_v11 = vadd.f32 %v8914_v35, %v8877_v47 }
 0x431   : > { %v4325_v56 = vadd.f32 %v4200_v2, %v4053_v40  ;;  %v5768_v19 = vpop.f32.mrf.mxu0  ;;  %v4058_v40 = vadd.f32 %v5764_v16, %v8983_v51  ;;  %v9124_v20 = vadd.f32 %v9118_v58, %v4363_v0  ;;  %v4366_v15 = vmul.f32 %v9108_v53, %v4327_v36 }
 0x432   : > { %v5812_v57 = vpop.f32.mrf.mxu1  ;;  %v4057_v16 = vadd.f32 %v3944_v45, %v3793_v32  ;;  %v3797_v32 = vadd.f32 %v9005_v4, %v3355_v60 }
 0x433   : > { %v4364_v29 = vmul.f32 %v9108_v53, %v4325_v56  ;;  %v3957_v46 = vpop.f32.mrf.mxu0  ;;  %v4330_v23 = vadd.f32 %v5812_v57, %v4058_v40  ;;  %v9141_v36 = vadd.f32 %v9118_v58, %v4366_v15  ;;  %v4062_v40 = vadd.f32 %v5768_v19, %v8996_v1 }
 0x434   : > { %v4213_v14 = vpop.f32.mrf.mxu1  ;;  %v4060_v45 = vadd.f32 %v3957_v46, %v3796_v21 }
 0x435   : > { %v9128_v24 = vadd.f32 %v9118_v58, %v4364_v29  ;;  %v4328_v26 = vadd.f32 %v4213_v14, %v4056_v3  ;;  %v5769_v22 = vpop.f32.mrf.mxu0  ;;  %v4369_v6 = vmul.f32 %v9108_v53, %v4330_v23 }
 0x436   : > { %v5813_v51 = vpop.f32.mrf.mxu1 }
 0x437   : > { %v4434_v42 = vadd.f32 %v9128_v24, %v9124_v20  ;;  %v4367_v27 = vmul.f32 %v9108_v53, %v4328_v26  ;;  %v3960_v2 = vpop.f32.mrf.mxu0  ;;  %v4331_v30 = vadd.f32 %v5813_v51, %v4059_v12  ;;  %v4063_v12 = vadd.f32 %v5769_v22, %v9003_v50 }
 0x438   : > { %v4216_v0 = vpop.f32.mrf.mxu1  ;;  %v9163_v4 = vadd.f32 %v9118_v58, %v4369_v6  ;;  %v4061_v1 = vadd.f32 %v3960_v2, %v3797_v32 }
 0x439   : > { %v4435_v63 = vadd.f32 %v4434_v42, %v9133_v25  ;;  %v4329_v56 = vadd.f32 %v4216_v0, %v4057_v16  ;;  %v5772_v7 = vpop.f32.mrf.mxu0  ;;  %v9148_v57 = vadd.f32 %v9118_v58, %v4367_v27  ;;  %v4370_v13 = vmul.f32 %v9108_v53, %v4331_v30 }
 0x43a   : > { %v5816_v52 = vpop.f32.mrf.mxu1  ;;  %v3800_v27 = vadd.f32 %v9028_v18, %v3368_v11 }
 0x43b   : > { %v4436_v61 = vadd.f32 %v4435_v63, %v9141_v36  ;;  %v4368_v3 = vmul.f32 %v9108_v53, %v4329_v56  ;;  %v3973_v29 = vpop.f32.mrf.mxu0  ;;  %v4334_v51 = vadd.f32 %v5816_v52, %v4062_v40  ;;  %v9169_v0 = vadd.f32 %v9118_v58, %v4370_v13 }
 0x43c   : > { %v4229_v14 = vpop.f32.mrf.mxu1  ;;  %v3371_v63 = vadd.f32 %v8950_v44, %v8883_v33  ;;  %v4064_v56 = vadd.f32 %v3973_v29, %v3800_v27 }
 0x43d   : > { %v4437_v15 = vadd.f32 %v4436_v61, %v9148_v57  ;;  %v9157_v38 = vadd.f32 %v9118_v58, %v4368_v3  ;;  %v4332_v46 = vadd.f32 %v4229_v14, %v4060_v45  ;;  %v5773_v26 = vpop.f32.mrf.mxu0  ;;  %v4373_v2 = vmul.f32 %v9108_v53, %v4334_v51 }
 0x43e   : > { %v5817_v16 = vpop.f32.mrf.mxu1  ;;  %v3801_v6 = vadd.f32 %v9044_v34, %v3371_v63  ;;  %v4066_v61 = vadd.f32 %v5772_v7, %v9015_v62  ;;  %v3384_v14 = vadd.f32 %v8964_v48, %v8891_v10  ;;  %v4067_v34 = vadd.f32 %v5773_v26, %v9038_v8 }
 0x43f   : > { %v4438_v19 = vadd.f32 %v4437_v15, %v9157_v38  ;;  %v4371_v42 = vmul.f32 %v9108_v53, %v4332_v46  ;;  %v3976_v23 = vpop.f32.mrf.mxu0  ;;  %v4335_v35 = vadd.f32 %v5817_v16, %v4063_v12  ;;  %v9190_v15 = vadd.f32 %v9118_v58, %v4373_v2 }
 0x440   : > { %v4232_v21 = vpop.f32.mrf.mxu1  ;;  %v4065_v62 = vadd.f32 %v3976_v23, %v3801_v6  ;;  %v3804_v51 = vadd.f32 %v9057_v5, %v3384_v14  ;;  %v3387_v8 = vadd.f32 %v8987_v54, %v8897_v55 }
 0x441   : > { %v4439_v47 = vadd.f32 %v4438_v19, %v9163_v4  ;;  %v4333_v50 = vadd.f32 %v4232_v21, %v4061_v1  ;;  %v5776_v22 = vpop.f32.mrf.mxu0  ;;  %v9176_v60 = vadd.f32 %v9118_v58, %v4371_v42  ;;  %v4374_v33 = vmul.f32 %v9108_v53, %v4335_v35 }
 0x442   : > { %v5820_v30 = vpop.f32.mrf.mxu1  ;;  %v4070_v63 = vadd.f32 %v5776_v22, %v9052_v39 }
 0x443   : > { %v4440_v18 = vadd.f32 %v4439_v47, %v9169_v0  ;;  %v4372_v45 = vmul.f32 %v9108_v53, %v4333_v50  ;;  %v3989_v52 = vpop.f32.mrf.mxu0  ;;  %v4338_v46 = vadd.f32 %v5820_v30, %v4066_v61  ;;  %v9197_v1 = vadd.f32 %v9118_v58, %v4374_v33 }
 0x444   : > { %v4245_v3 = vpop.f32.mrf.mxu1  ;;  %v4068_v26 = vadd.f32 %v3989_v52, %v3804_v51  ;;  %v3805_v50 = vadd.f32 %v9063_v31, %v3387_v8 }
 0x445   : > { %v4441_v32 = vadd.f32 %v4440_v18, %v9176_v60  ;;  %v9185_v44 = vadd.f32 %v9118_v58, %v4372_v45  ;;  %v4336_v29 = vadd.f32 %v4245_v3, %v4064_v56  ;;  %v5777_v40 = vpop.f32.mrf.mxu0  ;;  %v4377_v27 = vmul.f32 %v9108_v53, %v4338_v46 }
 0x446   : > { %v5821_v13 = vpop.f32.mrf.mxu1  ;;  %v3400_v45 = vadd.f32 %v8998_v43, %v8907_v59  ;;  %v4071_v52 = vadd.f32 %v5777_v40, %v9061_v28 }
 0x447   : > { %v4442_v7 = vadd.f32 %v4441_v32, %v9185_v44  ;;  %v4375_v11 = vmul.f32 %v9108_v53, %v4336_v29  ;;  %v3992_v12 = vpop.f32.mrf.mxu0  ;;  %v4339_v48 = vadd.f32 %v5821_v13, %v4067_v34  ;;  %v9219_v31 = vadd.f32 %v9118_v58, %v4377_v27 }
 0x448   : > { %v4248_v16 = vpop.f32.mrf.mxu1  ;;  %v4069_v39 = vadd.f32 %v3992_v12, %v3805_v50  ;;  %v3808_v33 = vadd.f32 %v9067_v41, %v3400_v45  ;;  %v3403_v34 = vadd.f32 %v9035_v9, %v8917_v17 }
 0x449   : > { %v4443_v10 = vadd.f32 %v4442_v7, %v9190_v15  ;;  %v4337_v19 = vadd.f32 %v4248_v16, %v4065_v62  ;;  %v5780_v42 = vpop.f32.mrf.mxu0  ;;  %v9204_v21 = vadd.f32 %v9118_v58, %v4375_v11  ;;  %v4378_v55 = vmul.f32 %v9108_v53, %v4339_v48 }
 0x44a   : > { %v5824_v23 = vpop.f32.mrf.mxu1  ;;  %v3809_v51 = vadd.f32 %v9073_v37, %v3403_v34  ;;  %v4074_v16 = vadd.f32 %v5780_v42, %v9065_v49  ;;  %v10174_v34 = vld [vmem:[#allocation41_spill] sm:$0xff] }
 0x44b   : > { %v4444_v5 = vadd.f32 %v4443_v10, %v9197_v1  ;;  %v4376_v47 = vmul.f32 %v9108_v53, %v4337_v19  ;;  %v4005_v35 = vpop.f32.mrf.mxu0  ;;  %v4342_v6 = vadd.f32 %v5824_v23, %v4070_v63  ;;  %v9225_v14 = vadd.f32 %v9118_v58, %v4378_v55  ;;  %v10169_v23 = vld [vmem:[#allocation25_spill] sm:$0xff] }
 0x44c   : > { %v4261_v2 = vpop.f32.mrf.mxu1  ;;  %v4072_v7 = vadd.f32 %v4005_v35, %v3808_v33 }
 0x44d   : > { %v4445_v30 = vadd.f32 %v4444_v5, %v9204_v21  ;;  %v9213_v54 = vadd.f32 %v9118_v58, %v4376_v47  ;;  %v4340_v56 = vadd.f32 %v4261_v2, %v4068_v26  ;;  %v5781_v18 = vpop.f32.mrf.mxu0  ;;  %v4381_v13 = vmul.f32 %v9108_v53, %v4342_v6  ;;  %v10168_v26 = vld [vmem:[#allocation17_spill] sm:$0xff]  ;;  %v10170_v47 = vld [vmem:[#allocation28_spill] sm:$0xff] }
 0x44e   : > { %v5825_v61 = vpop.f32.mrf.mxu1  ;;  %v3416_v27 = vadd.f32 %v10169_v23, %v10168_v26  ;;  %v4075_v37 = vadd.f32 %v5781_v18, %v10170_v47  ;;  %v10172_v18 = vld [vmem:[#allocation10_spill] sm:$0xff]  ;;  %v10178_v26 = vld [vmem:[#allocation83_spill] sm:$0xff] }
 0x44f   : > { %v4446_v22 = vadd.f32 %v4445_v30, %v9213_v54  ;;  %v4379_v3 = vmul.f32 %v9108_v53, %v4340_v56  ;;  %v4008_v32 = vpop.f32.mrf.mxu0  ;;  %v4343_v43 = vadd.f32 %v5825_v61, %v4071_v52  ;;  %v9246_v5 = vadd.f32 %v9118_v58, %v4381_v13  ;;  %v10171_v30 = vld [vmem:[#allocation29_spill] sm:$0xff] }
 0x450   : > { %v4264_v29 = vpop.f32.mrf.mxu1  ;;  %v4073_v49 = vadd.f32 %v4008_v32, %v3809_v51  ;;  %v3812_v55 = vadd.f32 %v10171_v30, %v3416_v27 }
 0x451   : > { %v4447_v59 = vadd.f32 %v4446_v22, %v9219_v31  ;;  %v4341_v28 = vadd.f32 %v4264_v29, %v4069_v39  ;;  %v5784_v40 = vpop.f32.mrf.mxu0  ;;  %v9232_v46 = vadd.f32 %v9118_v58, %v4379_v3  ;;  %v4382_v17 = vmul.f32 %v9108_v53, %v4343_v43  ;;  %v10173_v22 = vld [vmem:[#allocation20_spill] sm:$0xff] }
 0x452   : > { %v5828_v62 = vpop.f32.mrf.mxu1  ;;  %v3419_v3 = vadd.f32 %v10173_v22, %v10172_v18 }
 0x453   : > { %v4448_v41 = vadd.f32 %v4447_v59, %v9225_v14  ;;  %v4380_v11 = vmul.f32 %v9108_v53, %v4341_v28  ;;  %v4021_v12 = vpop.f32.mrf.mxu0  ;;  %v4346_v50 = vadd.f32 %v5828_v62, %v4074_v16  ;;  %v9253_v45 = vadd.f32 %v9118_v58, %v4382_v17  ;;  %v10175_v62 = vld [vmem:[#allocation30_spill] sm:$0xff] }
 0x454   : > { %v4277_v10 = vpop.f32.mrf.mxu1  ;;  %v4076_v32 = vadd.f32 %v4021_v12, %v3812_v55  ;;  %v3813_v13 = vadd.f32 %v10174_v34, %v3419_v3  ;;  %v10177_v17 = vld [vmem:[#allocation34_spill] sm:$0xff]  ;;  %v10183_v34 = vld [vmem:[#allocation77_spill] sm:$0xff] }
 0x455   : > { %v4449_v48 = vadd.f32 %v4448_v41, %v9232_v46  ;;  %v9241_v9 = vadd.f32 %v9118_v58, %v4380_v11  ;;  %v4344_v19 = vadd.f32 %v4277_v10, %v4072_v7  ;;  %v5785_v8 = vpop.f32.mrf.mxu0  ;;  %v4385_v29 = vmul.f32 %v9108_v53, %v4346_v50 }
 0x456   : > { %v5829_v35 = vpop.f32.mrf.mxu1  ;;  %v4078_v7 = vadd.f32 %v5784_v40, %v10175_v62  ;;  %v4079_v23 = vadd.f32 %v5785_v8, %v10178_v26 }
 0x457   : > { %v4450_v42 = vadd.f32 %v4449_v48, %v9241_v9  ;;  %v4383_v63 = vmul.f32 %v9108_v53, %v4344_v19  ;;  %v4024_v2 = vpop.f32.mrf.mxu0  ;;  %v4347_v6 = vadd.f32 %v5829_v35, %v4075_v37  ;;  %v10176_v48 = vld [vmem:[#allocation22_spill] sm:$0xff]  ;;  %v9275_v37 = vadd.f32 %v9118_v58, %v4385_v29 }
 0x458   : > { %v4280_v56 = vpop.f32.mrf.mxu1  ;;  %v3432_v19 = vadd.f32 %v10177_v17, %v10176_v48  ;;  %v4077_v40 = vadd.f32 %v4024_v2, %v3813_v13  ;;  %v10184_v48 = vld [vmem:[#allocation80_spill] sm:$0xff] }
 0x459   : > { %v4451_v52 = vadd.f32 %v4450_v42, %v9246_v5  ;;  %v4345_v61 = vadd.f32 %v4280_v56, %v4073_v49  ;;  %v5788_v39 = vpop.f32.mrf.mxu0  ;;  %v9260_v59 = vadd.f32 %v9118_v58, %v4383_v63  ;;  %v4386_v12 = vmul.f32 %v9108_v53, %v4347_v6  ;;  %v10179_v42 = vld [vmem:[#allocation85_spill] sm:$0xff]  ;;  %v10180_v6 = vld [vmem:[#allocation24_spill] sm:$0xff] }
 0x45a   : > { %v5832_v33 = vpop.f32.mrf.mxu1  ;;  %v3816_v50 = vadd.f32 %v10179_v42, %v3432_v19  ;;  %v4082_v13 = vadd.f32 %v5788_v39, %v10183_v34 }
 0x45b   : > { %v4452_v43 = vadd.f32 %v4451_v52, %v9253_v45  ;;  %v4384_v28 = vmul.f32 %v9108_v53, %v4345_v61  ;;  %v4037_v41 = vpop.f32.mrf.mxu0  ;;  %v4350_v27 = vadd.f32 %v5832_v33, %v4078_v7  ;;  %v9281_v55 = vadd.f32 %v9118_v58, %v4386_v12  ;;  %v10181_v61 = vld [vmem:[#allocation39_spill] sm:$0xff] }
 0x45c   : > { %v4293_v11 = vpop.f32.mrf.mxu1  ;;  %v3435_v18 = vadd.f32 %v10181_v61, %v10180_v6  ;;  %v4080_v3 = vadd.f32 %v4037_v41, %v3816_v50 }
 0x45d   : > { %v4453_v51 = vadd.f32 %v4452_v43, %v9260_v59  ;;  %v9269_v16 = vadd.f32 %v9118_v58, %v4384_v28  ;;  %v4348_v10 = vadd.f32 %v4293_v11, %v4076_v32  ;;  %v5789_v63 = vpop.f32.mrf.mxu0  ;;  %v4389_v2 = vmul.f32 %v9108_v53, %v4350_v27  ;;  %v10182_v43 = vld [vmem:[#allocation82_spill] sm:$0xff] }
 0x45e   : > { %v5833_v47 = vpop.f32.mrf.mxu1  ;;  %v3817_v28 = vadd.f32 %v10182_v43, %v3435_v18  ;;  %v4083_v17 = vadd.f32 %v5789_v63, %v10184_v48 }
 0x45f   : > { %v4454_v35 = vadd.f32 %v4453_v51, %v9269_v16  ;;  %v4387_v49 = vmul.f32 %v9108_v53, %v4348_v10  ;;  %v4351_v8 = vadd.f32 %v5833_v47, %v4079_v23  ;;  %v4040_v62 = vpop.f32.mrf.mxu0  ;;  %v9300_v10 = vadd.f32 %v9118_v58, %v4389_v2 }
 0x460   : > { %v4296_v30 = vpop.f32.mrf.mxu1  ;;  %v4081_v26 = vadd.f32 %v4040_v62, %v3817_v28  ;;  %v4489_v62 = vld [vmem:[%s9689_s11] sm:$0x1] }
 0x461   : > { %v4455_v56 = vadd.f32 %v4454_v35, %v9275_v37  ;;  %v4349_v52 = vadd.f32 %v4296_v30, %v4077_v40  ;;  %v9288_v32 = vadd.f32 %v9118_v58, %v4387_v49  ;;  %v4390_v51 = vmul.f32 %v9108_v53, %v4351_v8 }
 0x462   : > { %v5836_v22 = vpop.f32.mrf.mxu1 }
 0x463   : > { %v4456_v33 = vadd.f32 %v4455_v56, %v9281_v55  ;;  %v4388_v29 = vmul.f32 %v9108_v53, %v4349_v52  ;;  %v4354_v39 = vadd.f32 %v5836_v22, %v4082_v13  ;;  %v9306_v40 = vadd.f32 %v9118_v58, %v4390_v51 }
 0x464   : > { %v4309_v7 = vpop.f32.mrf.mxu1 }
 0x465   : > { %v4457_v11 = vadd.f32 %v4456_v33, %v9288_v32  ;;  %v9297_v12 = vadd.f32 %v9118_v58, %v4388_v29  ;;  %v4352_v41 = vadd.f32 %v4309_v7, %v4080_v3  ;;  %v4393_v50 = vmul.f32 %v9108_v53, %v4354_v39 }
 0x466   : > { %v5837_v19 = vpop.f32.mrf.mxu1 }
 0x467   : > { %v4458_v23 = vadd.f32 %v4457_v11, %v9297_v12  ;;  %v4391_v27 = vmul.f32 %v9108_v53, %v4352_v41  ;;  %v4355_v49 = vadd.f32 %v5837_v19, %v4083_v17  ;;  %v9321_v61 = vadd.f32 %v9118_v58, %v4393_v50  ;;  %v4566_v17 = vld [vmem:[%s9692_s14] sm:$0x1] }
 0x468   : > { %v4312_v47 = vpop.f32.mrf.mxu1 }
 0x469   : > { %v4459_v35 = vadd.f32 %v4458_v23, %v9300_v10  ;;  %v4353_v42 = vadd.f32 %v4312_v47, %v4081_v26  ;;  %v9311_v30 = vadd.f32 %v9118_v58, %v4391_v27  ;;  %v4394_v52 = vmul.f32 %v9108_v53, %v4355_v49 }
 0x46b   : > { %v4460_v63 = vadd.f32 %v4459_v35, %v9306_v40  ;;  %v4392_v56 = vmul.f32 %v9108_v53, %v4353_v42  ;;  %v9325_v2 = vadd.f32 %v9118_v58, %v4394_v52  ;;  %v10185_v35 = vld [vmem:[#allocation2_spill] sm:$0xff] }
 0x46c   : > { %v4649_v49 = vsub.s32 0, %v10185_v35  ;;  %v6001_v35 = vld [vmem:[%s6151_s20 + $0x70] sm:$0xff] }
 0x46d   : > { %v4461_v8 = vadd.f32 %v4460_v63, %v9311_v30  ;;  %v9318_v6 = vadd.f32 %v9118_v58, %v4392_v56  ;;  %v4561_v58 = vld [vmem:[%s9690_s12] sm:$0x1] }
 0x46f   : > { %v4462_v18 = vadd.f32 %v4461_v8, %v9318_v6 }
 0x471   : > { %v4463_v22 = vadd.f32 %v4462_v18, %v9321_v61 }
 0x473   : > { %v4464_v3 = vadd.f32 %v4463_v22, %v9325_v2 }
 0x475   : > { %v4465_v33 = vrot.slane %v4464_v3, 4 }
 0x477   : > { %v4466_v29 = vadd.f32 %v4465_v33, %v4464_v3 }
 0x479   : > { %v4467_v43 = vrot.slane %v4466_v29, 2 }
 0x47b   : > { %v4468_v28 = vadd.f32 %v4467_v43, %v4466_v29 }
 0x47d   : > { %v4469_v53 = vrot.slane %v4468_v28, 1 }
 0x47f   : > { %v4470_v34 = vadd.f32 %v4469_v53, %v4468_v28  ;;  %v5992_v28 = vld [vmem:[%s6151_s20 + $0x28] sm:$0xff] }
 0x481   : > { %v4472_v13 = vmul.f32 0.00390625, %v4470_v34  ;;  %v5993_v34 = vld [vmem:[%s6151_s20 + $0x30] sm:$0xff] }
 0x483   : > { %5871 = vmatmul.mubr.f32.vlgmr.msra.gmra.mxu0 %v4472_v13 }
 0x543   : > { %v4556_v7 = vpop.f32.mrf.mxu0 }
 0x544   : > { %v4557_v11 = vadd.f32 %v4556_v7, %v4489_v62  ;;  %v5994_v62 = vld [vmem:[%s6151_s20 + $0x38] sm:$0xff] }
 0x545   : > { %v5872_v51 = vpop.f32.mrf.mxu0 }
 0x546   : > { %vm4560_vm1 = vcmp.ge.f32.partialorder %v4557_v11, 0.0  ;;  %v4562_v41 = vmul.f32 %v4561_v58, %v4557_v11  ;;  %v5995_v58 = vld [vmem:[%s6151_s20 + $0x40] sm:$0xff]  ;;  %v5996_v51 = vld [vmem:[%s6151_s20 + $0x48] sm:$0xff] }
 0x548   : > { %v4563_v48 = vsel %vm4560_vm1, %v4557_v11, %v4562_v41 }
 0x549   : > { %5878 = vmatmul.mubr.msk.f32.vlgmr.msra.gmra.mxu1 %vm4567_vm2, %v4563_v48  ;;  %v5997_v48 = vld [vmem:[%s6151_s20 + $0x50] sm:$0xff] }
 0x609   : > { %v4637_v19 = vpop.f32.mrf.mxu1 }
 0x60a   : > { %v4638_v26 = vadd.f32 %v4637_v19, %v4566_v17  ;;  %v5998_v19 = vld [vmem:[%s6151_s20 + $0x58] sm:$0xff] }
 0x60b   : > { %v5879_v23 = vpop.f32.mrf.mxu1 }
 0x60c   : > { %v5092_v39 = vmul.f32 -1.442695, %v4638_v26  ;;  %v5999_v23 = vld [vmem:[%s6151_s20 + $0x60] sm:$0xff] }
 0x60e   : > { %5983 = vpow2.f32 %v5092_v39 }
 0x61b   : > { %v5984_v27 = vpop.eup %5983 }
 0x61c   : > { %v4644_v47 = vadd.f32 1.0, %v5984_v27  ;;  %v6000_v27 = vld [vmem:[%s6151_s20 + $0x68] sm:$0xff] }
 0x61e   : > { %5985 = vrcp.f32 %v4644_v47 }
 0x62b   : > { %v5986_v42 = vpop.eup %5985 }
 0x62c   : > { %v4650_v50 = vrot.slane %v5986_v42, %v4649_v49  ;;  %v6002_v42 = vld [vmem:[%s6151_s20 + $0x78] sm:$0xff] }
 0x62e   : > { %v4651_v63 = vmul.f32 %v4650_v50, %v9124_v20  ;;  %v4652_v56 = vmul.f32 %v4650_v50, %v9128_v24  ;;  %v4653_v8 = vmul.f32 %v4650_v50, %v9133_v25  ;;  %v4654_v52 = vmul.f32 %v4650_v50, %v9141_v36 }
 0x62f   : > { %v4655_v18 = vmul.f32 %v4650_v50, %v9148_v57  ;;  %v4656_v22 = vmul.f32 %v4650_v50, %v9157_v38  ;;  %v4657_v3 = vmul.f32 %v4650_v50, %v9163_v4  ;;  %v4658_v33 = vmul.f32 %v4650_v50, %v9169_v0 }
 0x630   : > { %v4659_v29 = vmul.f32 %v4650_v50, %v9176_v60  ;;  %v4660_v43 = vmul.f32 %v4650_v50, %v9185_v44  ;;  %v4661_v20 = vmul.f32 %v4650_v50, %v9190_v15  ;;  %v4662_v24 = vmul.f32 %v4650_v50, %v9197_v1 }
 0x631   : > { %v4663_v25 = vmul.f32 %v4650_v50, %v9204_v21  ;;  %v4664_v36 = vmul.f32 %v4650_v50, %v9213_v54  ;;  %v4665_v57 = vmul.f32 %v4650_v50, %v9219_v31  ;;  %v4666_v38 = vmul.f32 %v4650_v50, %v9225_v14 }
 0x632   : > { %v4667_v4 = vmul.f32 %v4650_v50, %v9232_v46  ;;  %v4668_v0 = vmul.f32 %v4650_v50, %v9241_v9  ;;  %v4669_v60 = vmul.f32 %v4650_v50, %v9246_v5  ;;  %v4670_v44 = vmul.f32 %v4650_v50, %v9253_v45 }
 0x633   : > { %v4671_v15 = vmul.f32 %v4650_v50, %v9260_v59  ;;  %v4672_v1 = vmul.f32 %v4650_v50, %v9269_v16  ;;  %v4673_v21 = vmul.f32 %v4650_v50, %v9275_v37  ;;  %v4674_v54 = vmul.f32 %v4650_v50, %v9281_v55  ;;  %v5987_v37 = vld [vmem:[%s6151_s20] sm:$0xff] }
 0x634   : > { %v4675_v31 = vmul.f32 %v4650_v50, %v9288_v32  ;;  %v4676_v14 = vmul.f32 %v4650_v50, %v9297_v12  ;;  %v4677_v46 = vmul.f32 %v4650_v50, %v9300_v10  ;;  %v4678_v9 = vmul.f32 %v4650_v50, %v9306_v40  ;;  %v5988_v32 = vld [vmem:[%s6151_s20 + $0x8] sm:$0xff]  ;;  %v5989_v10 = vld [vmem:[%s6151_s20 + $0x10] sm:$0xff] }
 0x635   : > { %v4679_v5 = vmul.f32 %v4650_v50, %v9311_v30  ;;  %v4680_v45 = vmul.f32 %v4650_v50, %v9318_v6  ;;  %v9370_v59 = vmul.f32 %v4650_v50, %v9321_v61  ;;  %v9373_v16 = vmul.f32 %v4650_v50, %v9325_v2  ;;  %v5990_v30 = vld [vmem:[%s6151_s20 + $0x18] sm:$0xff]  ;;  %v5991_v61 = vld [vmem:[%s6151_s20 + $0x20] sm:$0xff] }
 0x636   : > { %v9376_v55 = vadd.f32 %v5987_v37, %v4651_v63  ;;  %v9379_v12 = vadd.f32 %v5988_v32, %v4652_v56  ;;  %v9382_v40 = vadd.f32 %v5989_v10, %v4653_v8  ;;  %v9385_v6 = vadd.f32 %v5990_v30, %v4654_v52  ;;  %v6003_v63 = vld [vmem:[%s6151_s20 + $0x80] sm:$0xff]  ;;  %v6004_v8 = vld [vmem:[%s6151_s20 + $0x88] sm:$0xff]  ;;  %v6014_v32 = vld [vmem:[%s6151_s20 + $0xd8] sm:$0xff] }
 0x637   : > { %v9388_v2 = vadd.f32 %v5991_v61, %v4655_v18  ;;  %v9391_v53 = vadd.f32 %v5992_v28, %v4656_v22  ;;  %v9394_v13 = vadd.f32 %v5993_v34, %v4657_v3  ;;  %v9397_v7 = vadd.f32 %v5994_v62, %v4658_v33  ;;  %v6005_v18 = vld [vmem:[%s6151_s20 + $0x90] sm:$0xff]  ;;  %v6006_v3 = vld [vmem:[%s6151_s20 + $0x98] sm:$0xff]  ;;  %v6015_v10 = vld [vmem:[%s6151_s20 + $0xe0] sm:$0xff] }
 0x638   : > { %v9400_v11 = vadd.f32 %v5995_v58, %v4659_v29  ;;  %v9403_v41 = vadd.f32 %v5996_v51, %v4660_v43  ;;  %v9406_v17 = vadd.f32 %v5997_v48, %v4661_v20  ;;  %v9409_v26 = vadd.f32 %v5998_v19, %v4662_v24  ;;  %v6007_v29 = vld [vmem:[%s6151_s20 + $0xa0] sm:$0xff]  ;;  %v6008_v20 = vld [vmem:[%s6151_s20 + $0xa8] sm:$0xff] }
 0x639   : > { %v9412_v39 = vadd.f32 %v5999_v23, %v4663_v25  ;;  %v9415_v47 = vadd.f32 %v6000_v27, %v4664_v36  ;;  %v9418_v49 = vadd.f32 %v6001_v35, %v4665_v57  ;;  %v9421_v50 = vadd.f32 %v6002_v42, %v4666_v38  ;;  %v6009_v25 = vld [vmem:[%s6151_s20 + $0xb0] sm:$0xff]  ;;  %v6010_v57 = vld [vmem:[%s6151_s20 + $0xb8] sm:$0xff] }
 0x63a   : > { %v9424_v56 = vadd.f32 %v6003_v63, %v4667_v4  ;;  %v9427_v52 = vadd.f32 %v6004_v8, %v4668_v0  ;;  %v9430_v22 = vadd.f32 %v6005_v18, %v4669_v60  ;;  %v9433_v33 = vadd.f32 %v6006_v3, %v4670_v44  ;;  %v6011_v4 = vld [vmem:[%s6151_s20 + $0xc0] sm:$0xff]  ;;  %v6012_v60 = vld [vmem:[%s6151_s20 + $0xc8] sm:$0xff] }
 0x63b   : > { %v9436_v43 = vadd.f32 %v6007_v29, %v4671_v15  ;;  %v9439_v24 = vadd.f32 %v6008_v20, %v4672_v1  ;;  %v9442_v36 = vadd.f32 %v6009_v25, %v4673_v21  ;;  %v9445_v38 = vadd.f32 %v6010_v57, %v4674_v54  ;;  %v6013_v15 = vld [vmem:[%s6151_s20 + $0xd0] sm:$0xff]  ;;  %v6016_v21 = vld [vmem:[%s6151_s20 + $0xe8] sm:$0xff] }
 0x63c   : > { %v9448_v0 = vadd.f32 %v6011_v4, %v4675_v31  ;;  %v9451_v44 = vadd.f32 %v6012_v60, %v4676_v14  ;;  %v9454_v37 = vadd.f32 %v6013_v15, %v4677_v46  ;;  %v9457_v1 = vadd.f32 %v6014_v32, %v4678_v9  ;;  %v6017_v54 = vld [vmem:[%s6151_s20 + $0xf0] sm:$0xff]  ;;  %v6018_v31 = vld [vmem:[%s6151_s20 + $0xf8] sm:$0xff]  ;;  %v5093_v46 = vld [vmem:[%s9693_s15] ss:$0 sm:$0xff] }
 0x63d   : > { %10186 = vst [vmem:[#allocation78_spill] sm:$0xff] %v9445_v38  ;;  %v9460_v30 = vadd.f32 %v6015_v10, %v4679_v5  ;;  %v9463_v61 = vadd.f32 %v6016_v21, %v4680_v45  ;;  %v9467_v28 = vadd.f32 %v6017_v54, %v9370_v59  ;;  %v9471_v14 = vadd.f32 %v6018_v31, %v9373_v16 }
 0x63e   : > { %10187 = vst [vmem:[#allocation88_spill] sm:$0xff] %v9448_v0  ;;  %10188 = vst [vmem:[#allocation84_spill] sm:$0xff] %v9454_v37  ;;  %vm4715_vm3 = vcmp.ge.f32.partialorder %v9376_v55, 0.0  ;;  %vm4716_vm5 = vcmp.ge.f32.partialorder %v9379_v12, 0.0  ;;  %vm4717_vm4 = vcmp.ge.f32.partialorder %v9382_v40, 0.0  ;;  %vm4718_vm6 = vcmp.ge.f32.partialorder %v9385_v6, 0.0 }
 0x63f   : > { %10189 = vst [vmem:[#allocation86_spill] sm:$0xff] %v9460_v30  ;;  %10190 = vst [vmem:[#allocation87_spill] sm:$0xff] %v9467_v28  ;;  %vm4719_vm7 = vcmp.ge.f32.partialorder %v9388_v2, 0.0  ;;  %vm4720_vm8 = vcmp.ge.f32.partialorder %v9391_v53, 0.0  ;;  %vm4721_vm9 = vcmp.ge.f32.partialorder %v9394_v13, 0.0  ;;  %vm4722_vm10 = vcmp.ge.f32.partialorder %v9397_v7, 0.0 }
 0x640   : > { %vm4723_vm11 = vcmp.ge.f32.partialorder %v9400_v11, 0.0  ;;  %vm4724_vm12 = vcmp.ge.f32.partialorder %v9403_v41, 0.0  ;;  %v4754_v9 = vmul.f32 %v5093_v46, %v9376_v55  ;;  %v4755_v5 = vmul.f32 %v5093_v46, %v9379_v12 }
 0x641   : > { %v4756_v45 = vmul.f32 %v5093_v46, %v9382_v40  ;;  %v4757_v59 = vmul.f32 %v5093_v46, %v9385_v6  ;;  %v4758_v16 = vmul.f32 %v5093_v46, %v9388_v2  ;;  %v4759_v34 = vmul.f32 %v5093_v46, %v9391_v53 }
 0x642   : > { %v4760_v62 = vmul.f32 %v5093_v46, %v9394_v13  ;;  %v4761_v58 = vmul.f32 %v5093_v46, %v9397_v7  ;;  %v4762_v51 = vmul.f32 %v5093_v46, %v9400_v11  ;;  %v4763_v48 = vmul.f32 %v5093_v46, %v9403_v41 }
 0x643   : > { %v4764_v19 = vmul.f32 %v5093_v46, %v9406_v17  ;;  %v4765_v23 = vmul.f32 %v5093_v46, %v9409_v26  ;;  %vm4741_vm2 = vcmp.ge.f32.partialorder %v9454_v37, 0.0  ;;  %vm4742_vm1 = vcmp.ge.f32.partialorder %v9457_v1, 0.0 }
 0x644   : > { %v4766_v27 = vmul.f32 %v5093_v46, %v9412_v39  ;;  %v4767_v35 = vmul.f32 %v5093_v46, %v9415_v47  ;;  %v4768_v42 = vmul.f32 %v5093_v46, %v9418_v49  ;;  %v4769_v63 = vmul.f32 %v5093_v46, %v9421_v50 }
 0x645   : > { %vm4743_vm14 = vcmp.ge.f32.partialorder %v9460_v30, 0.0  ;;  %vm4744_vm13 = vcmp.ge.f32.partialorder %v9463_v61, 0.0  ;;  %vm4745_vm0 = vcmp.ge.f32.partialorder %v9467_v28, 0.0  ;;  %vm4746_vm15 = vcmp.ge.f32.partialorder %v9471_v14, 0.0 }
 0x646   : > { %v4770_v8 = vmul.f32 %v5093_v46, %v9424_v56  ;;  %v4771_v18 = vmul.f32 %v5093_v46, %v9427_v52  ;;  %v4772_v3 = vmul.f32 %v5093_v46, %v9430_v22  ;;  %v4773_v29 = vmul.f32 %v5093_v46, %v9433_v33 }
 0x647   : > { %v4774_v20 = vmul.f32 %v5093_v46, %v9436_v43  ;;  %v4775_v25 = vmul.f32 %v5093_v46, %v9439_v24  ;;  %v4776_v57 = vmul.f32 %v5093_v46, %v9442_v36  ;;  %v4777_v4 = vmul.f32 %v5093_v46, %v9445_v38 }
 0x648   : > { %v4778_v60 = vmul.f32 %v5093_v46, %v9448_v0  ;;  %v4779_v15 = vmul.f32 %v5093_v46, %v9451_v44  ;;  %v4780_v32 = vmul.f32 %v5093_v46, %v9454_v37  ;;  %v4781_v10 = vmul.f32 %v5093_v46, %v9457_v1 }
 0x649   : > { %v4782_v21 = vmul.f32 %v5093_v46, %v9460_v30  ;;  %v4783_v54 = vmul.f32 %v5093_v46, %v9463_v61  ;;  %v4784_v31 = vmul.f32 %v5093_v46, %v9467_v28  ;;  %v4785_v38 = vmul.f32 %v5093_v46, %v9471_v14 }
 0x64a   : > { %v4786_v0 = vsel %vm4715_vm3, %v9376_v55, %v4754_v9  ;;  %v4787_v37 = vsel %vm4716_vm5, %v9379_v12, %v4755_v5  ;;  %v4788_v30 = vsel %vm4717_vm4, %v9382_v40, %v4756_v45  ;;  %v4789_v28 = vsel %vm4718_vm6, %v9385_v6, %v4757_v59  ;;  %v10211_v5 = vld [vmem:[#allocation87_spill] sm:$0xff] }
 0x64b   : > { %v4790_v55 = vsel %vm4719_vm7, %v9388_v2, %v4758_v16  ;;  %v4791_v46 = vsel %vm4720_vm8, %v9391_v53, %v4759_v34  ;;  %v4792_v12 = vsel %vm4721_vm9, %v9394_v13, %v4760_v62  ;;  %v4793_v40 = vsel %vm4722_vm10, %v9397_v7, %v4761_v58  ;;  %4818 = vst [vmem:[%s9537_s29] sm:$0xff] %v4786_v0  ;;  %v10209_v0 = vld [vmem:[#allocation84_spill] sm:$0xff] }
 0x64c   : > { %4819 = vst [vmem:[%s9537_s29 + $0x8] sm:$0xff] %v4787_v37  ;;  %4820 = vst [vmem:[%s9537_s29 + $0x10] sm:$0xff] %v4788_v30  ;;  %v4794_v6 = vsel %vm4723_vm11, %v9400_v11, %v4762_v51  ;;  %v4795_v2 = vsel %vm4724_vm12, %v9403_v41, %v4763_v48  ;;  %vm10191_vm3 = vcmp.ge.f32.partialorder %v9406_v17, 0.0  ;;  %vm10192_vm5 = vcmp.ge.f32.partialorder %v9409_v26, 0.0 }
 0x64d   : > { %4821 = vst [vmem:[%s9537_s29 + $0x18] sm:$0xff] %v4789_v28  ;;  %v4796_v53 = vsel %vm10191_vm3, %v9406_v17, %v4764_v19  ;;  %v4797_v13 = vsel %vm10192_vm5, %v9409_v26, %v4765_v23  ;;  %4822 = vst [vmem:[%s9537_s29 + $0x20] sm:$0xff] %v4790_v55  ;;  %vm10193_vm4 = vcmp.ge.f32.partialorder %v9412_v39, 0.0  ;;  %vm10194_vm6 = vcmp.ge.f32.partialorder %v9415_v47, 0.0  ;;  %v10210_v28 = vld [vmem:[#allocation86_spill] sm:$0xff] }
 0x64e   : > { %4823 = vst [vmem:[%s9537_s29 + $0x28] sm:$0xff] %v4791_v46  ;;  %4824 = vst [vmem:[%s9537_s29 + $0x30] sm:$0xff] %v4792_v12  ;;  %v4798_v7 = vsel %vm10193_vm4, %v9412_v39, %v4766_v27  ;;  %v4799_v11 = vsel %vm10194_vm6, %v9415_v47, %v4767_v35  ;;  %vm10195_vm7 = vcmp.ge.f32.partialorder %v9418_v49, 0.0  ;;  %vm10196_vm8 = vcmp.ge.f32.partialorder %v9421_v50, 0.0 }
 0x64f   : > { %4825 = vst [vmem:[%s9537_s29 + $0x38] sm:$0xff] %v4793_v40  ;;  %v4800_v41 = vsel %vm10195_vm7, %v9418_v49, %v4768_v42  ;;  %v4801_v17 = vsel %vm10196_vm8, %v9421_v50, %v4769_v63  ;;  %4826 = vst [vmem:[%s9537_s29 + $0x40] sm:$0xff] %v4794_v6  ;;  %vm10197_vm9 = vcmp.ge.f32.partialorder %v9424_v56, 0.0  ;;  %vm10198_vm10 = vcmp.ge.f32.partialorder %v9427_v52, 0.0 }
 0x650   : > { %4827 = vst [vmem:[%s9537_s29 + $0x48] sm:$0xff] %v4795_v2  ;;  %4828 = vst [vmem:[%s9537_s29 + $0x50] sm:$0xff] %v4796_v53  ;;  %v4802_v26 = vsel %vm10197_vm9, %v9424_v56, %v4770_v8  ;;  %v4803_v39 = vsel %vm10198_vm10, %v9427_v52, %v4771_v18  ;;  %vm10199_vm11 = vcmp.ge.f32.partialorder %v9430_v22, 0.0  ;;  %vm10200_vm12 = vcmp.ge.f32.partialorder %v9433_v33, 0.0 }
 0x651   : > { %4829 = vst [vmem:[%s9537_s29 + $0x58] sm:$0xff] %v4797_v13  ;;  %v4804_v47 = vsel %vm10199_vm11, %v9430_v22, %v4772_v3  ;;  %v4805_v49 = vsel %vm10200_vm12, %v9433_v33, %v4773_v29  ;;  %4830 = vst [vmem:[%s9537_s29 + $0x60] sm:$0xff] %v4798_v7  ;;  %vm10201_vm3 = vcmp.ge.f32.partialorder %v9436_v43, 0.0  ;;  %vm10202_vm5 = vcmp.ge.f32.partialorder %v9439_v24, 0.0  ;;  %v10204_v22 = vld [vmem:[#allocation78_spill] sm:$0xff] }
 0x652   : > { %4831 = vst [vmem:[%s9537_s29 + $0x68] sm:$0xff] %v4799_v11  ;;  %4832 = vst [vmem:[%s9537_s29 + $0x70] sm:$0xff] %v4800_v41  ;;  %v4806_v50 = vsel %vm10201_vm3, %v9436_v43, %v4774_v20  ;;  %v4807_v56 = vsel %vm10202_vm5, %v9439_v24, %v4775_v25  ;;  %vm10203_vm4 = vcmp.ge.f32.partialorder %v9442_v36, 0.0  ;;  %vm10205_vm6 = vcmp.ge.f32.partialorder %v10204_v22, 0.0  ;;  %v10206_v43 = vld [vmem:[#allocation88_spill] sm:$0xff] }
 0x653   : > { %4833 = vst [vmem:[%s9537_s29 + $0x78] sm:$0xff] %v4801_v17  ;;  %v4808_v52 = vsel %vm10203_vm4, %v9442_v36, %v4776_v57  ;;  %v4809_v33 = vsel %vm10205_vm6, %v10204_v22, %v4777_v4  ;;  %4834 = vst [vmem:[%s9537_s29 + $0x80] sm:$0xff] %v4802_v26  ;;  %vm10207_vm7 = vcmp.ge.f32.partialorder %v10206_v43, 0.0  ;;  %vm10208_vm8 = vcmp.ge.f32.partialorder %v9451_v44, 0.0 }
 0x654   : > { %4835 = vst [vmem:[%s9537_s29 + $0x88] sm:$0xff] %v4803_v39  ;;  %4836 = vst [vmem:[%s9537_s29 + $0x90] sm:$0xff] %v4804_v47  ;;  %v4810_v24 = vsel %vm10207_vm7, %v10206_v43, %v4778_v60  ;;  %v4811_v36 = vsel %vm10208_vm8, %v9451_v44, %v4779_v15  ;;  %v4812_v37 = vsel %vm4741_vm2, %v10209_v0, %v4780_v32 }
 0x655   : > { %4837 = vst [vmem:[%s9537_s29 + $0x98] sm:$0xff] %v4805_v49  ;;  %v4813_v30 = vsel %vm4742_vm1, %v9457_v1, %v4781_v10  ;;  %4838 = vst [vmem:[%s9537_s29 + $0xa0] sm:$0xff] %v4806_v50  ;;  %v4814_v9 = vsel %vm4743_vm14, %v10210_v28, %v4782_v21  ;;  %v4815_v44 = vsel %vm4744_vm13, %v9463_v61, %v4783_v54 }
 0x656   : > { %4839 = vst [vmem:[%s9537_s29 + $0xa8] sm:$0xff] %v4807_v56  ;;  %4840 = vst [vmem:[%s9537_s29 + $0xb0] sm:$0xff] %v4808_v52  ;;  %v4816_v45 = vsel %vm4745_vm0, %v10211_v5, %v4784_v31  ;;  %v4817_v1 = vsel %vm4746_vm15, %v9471_v14, %v4785_v38 }
 0x657   : > { %4841 = vst [vmem:[%s9537_s29 + $0xb8] sm:$0xff] %v4809_v33  ;;  %4842 = vst [vmem:[%s9537_s29 + $0xc0] sm:$0xff] %v4810_v24 }
 0x658   : > { %4843 = vst [vmem:[%s9537_s29 + $0xc8] sm:$0xff] %v4811_v36  ;;  %4844 = vst [vmem:[%s9537_s29 + $0xd0] sm:$0xff] %v4812_v37 }
 0x659   : > { %4845 = vst [vmem:[%s9537_s29 + $0xd8] sm:$0xff] %v4813_v30  ;;  %4846 = vst [vmem:[%s9537_s29 + $0xe0] sm:$0xff] %v4814_v9 }
 0x65a   : > { %4847 = vst [vmem:[%s9537_s29 + $0xe8] sm:$0xff] %v4815_v44  ;;  %4848 = vst [vmem:[%s9537_s29 + $0xf0] sm:$0xff] %v4816_v45 }
 0x65b   : > { %4849 = vst [vmem:[%s9537_s29 + $0xf8] sm:$0xff] %v4817_v1 }
 0x65c PF: > { %s26_s21 = sadd.s32 1, %s6025_s21  }
 0x65d   : > { %p23_p4 = scmp.ge.s32.totalorder %s26_s21, 4  }
 0x65f   :  { %25 = sbr.rel (!%p23_p4) target bundleno = 2 (0x2), region = 114 }

</bundles_post_ra>
